<compile_context>
chip_gen: v6e
topology: v6e:2x2x1
jax: 0.10.0
libtpu: 0.0.40
codegen_flags: <defaults>
</compile_context>

<pallas_src>
import jax
import jax.numpy as jnp
from jax.experimental import pallas as pl
from jax.experimental.pallas import tpu as pltpu

# -------- scaled-down configuration (structure identical to the torch module) -
CFG = dict(
    B=8,                 # batch; gives the dense matmuls a real M dimension
    CH=4,                # n_channels           (torch default 14)
    T=32,                # n_timepoints         (torch default 256)
    C1=8, C2=16, C3=32,  # conv channels        (torch: 32, 64, 128)
    K=7,                 # temporal kernel width
    PW=16,               # adaptive-avg-pool output width (torch: 32)
    LAT=64,              # latent_dim           (torch: 512)
    DEC1=256, DEC2=512, IMG=784,
)
BN_EPS = 1e-5
VMEM_LIMIT = 32 * 1024 * 1024   # explicit scoped-VMEM limit (review item 2)


# ------------------------------ encoder kernel ---------------------------------
def encoder_kernel(x_ref,
                   w1_ref, s1_ref, t1_ref,
                   w2_ref, s2_ref, t2_ref,
                   w3_ref, s3_ref, t3_ref,
                   pool_ref,
                   feat_ref):
    # NOTE: at the toy T=32 every encoder vreg uses 32 of 128 lanes; at the
    # torch scale (T=256) these slabs are lane-dense, so we accept it here
    # rather than packing batch rows along lanes.
    f32, bf16 = jnp.float32, jnp.bfloat16
    C2 = w2_ref.shape[0]
    K = w3_ref.shape[1] // C2
    p = (K - 1) // 2
    T = pool_ref.shape[0]

    # conv1 (1xK over time, 1 input channel) + BN + ReLU: init-time
    # block-diagonal weight applied to the wrapper-built (CH*K, T) im2col ->
    # one MXU matmul (conv1 moved off the VPU).
    x = x_ref[0].astype(bf16)                                    # (CH*K, T)
    h1 = jnp.maximum(
        jnp.dot(w1_ref[...], x, preferred_element_type=f32)
        * s1_ref[...] + t1_ref[...], 0.0)                        # (CH*C1, T)

    # conv2 (CHx1 over EEG channels) + BN + ReLU: one matmul.
    h2 = jnp.maximum(
        jnp.dot(w2_ref[...], h1.astype(bf16), preferred_element_type=f32)
        * s2_ref[...] + t2_ref[...], 0.0)                        # (C2, T)

    # conv3 (1xK over time) + BN + ReLU: im2col built from value slices of the
    # zero-padded activation (no pad scratch, no VMEM round-trip), one matmul.
    zp = jnp.zeros((C2, p), f32)
    h2p = jnp.concatenate([zp, h2, zp], axis=1)                  # (C2, T + 2p)
    cols = jnp.concatenate([h2p[:, k:k + T] for k in range(K)], axis=0)
    h3 = jnp.maximum(
        jnp.dot(w3_ref[...], cols.astype(bf16), preferred_element_type=f32)
        * s3_ref[...] + t3_ref[...], 0.0)                        # (C3, T)

    # AdaptiveAvgPool2d((1, PW)) as a matmul with the averaging matrix.
    feat_ref[0] = jnp.dot(h3.astype(bf16), pool_ref[...],
                          preferred_element_type=f32)            # (C3, PW)


# ------------------------------- dense kernel ----------------------------------
def dense_kernel(f_ref,
                 wv_ref, bv_ref, wo_ref, bo_ref,
                 wl1_ref, bl1_ref, sl1_ref, tl1_ref,
                 wl2_ref, bl2_ref, sl2_ref, tl2_ref,
                 wd1_ref, bd1_ref, sd1_ref, td1_ref,
                 wd2_ref, bd2_ref, sd2_ref, td2_ref,
                 wd3_ref, bd3_ref,
                 img_ref, lat_ref):
    f32, bf16 = jnp.float32, jnp.bfloat16

    def bdot(a, w_ref):          # bf16 MXU inputs, f32 accumulation
        return jnp.dot(a.astype(bf16), w_ref[...], preferred_element_type=f32)

    feats = f_ref[...]                                           # (BT, D) f32

    # Self-attention over a length-1 sequence: softmax == 1 -> out_proj(V).
    v = bdot(feats, wv_ref) + bv_ref[...]
    att = bdot(v, wo_ref) + bo_ref[...]
    f = feats + att                                              # residual

    def lin_bn_relu(h, w_ref, b_ref, s_ref, t_ref):
        z = bdot(h, w_ref) + b_ref[...]
        return jnp.maximum(z * s_ref[...] + t_ref[...], 0.0)

    h = lin_bn_relu(f, wl1_ref, bl1_ref, sl1_ref, tl1_ref)       # compressor[0]
    lat = lin_bn_relu(h, wl2_ref, bl2_ref, sl2_ref, tl2_ref)     # compressor[1]
    # At torch scale latent_dim//2 = 256 is lane-aligned; the toy L2=32 store
    # is a masked partial vst (accepted for the toy shape).
    lat_ref[...] = lat                                           # (BT, LAT//2)

    d = lin_bn_relu(lat, wd1_ref, bd1_ref, sd1_ref, td1_ref)     # decoder[0]
    d = lin_bn_relu(d, wd2_ref, bd2_ref, sd2_ref, td2_ref)       # decoder[1]
    img_ref[...] = jax.nn.sigmoid(bdot(d, wd3_ref) + bd3_ref[...])


# ------------------------------- pallas wrappers --------------------------------
def _const_spec(a):
    # Weight held resident across the grid: constant index map (fetched once)
    # and single-buffered so it does not get pointless 2-deep buffering.
    zeros = (0,) * a.ndim
    return pl.BlockSpec(a.shape, lambda i, z=zeros: z,
                        pipeline_mode=pl.Buffered(1))


def _encoder_call(x_im2col, enc):
    B, CHK, T = x_im2col.shape
    C3 = enc[6].shape[0]          # w3f: (C3, K*C2)
    PW = enc[9].shape[1]          # pool: (T, PW)
    return pl.pallas_call(
        encoder_kernel,
        grid=(B,),
        in_specs=[pl.BlockSpec((1, CHK, T), lambda b: (b, 0, 0))]
                 + [_const_spec(a) for a in enc],
        out_specs=pl.BlockSpec((1, C3, PW), lambda b: (b, 0, 0)),
        out_shape=jax.ShapeDtypeStruct((B, C3, PW), jnp.float32),
        compiler_params=pltpu.CompilerParams(
            dimension_semantics=("parallel",),
            vmem_limit_bytes=VMEM_LIMIT),
    )(x_im2col, *enc)


def _dense_call(feats, dense, bt):
    B, D = feats.shape
    L2 = dense[8].shape[1]        # wl2: (LAT, LAT//2)
    IMG = dense[20].shape[1]      # wd3: (DEC2, 784)
    # NOTE (v7x / torch scale): at D=4096 the attention weights alone are
    # 2 x 32 MiB bf16 and cannot stay resident in 64 MiB of VMEM; they would
    # have to be streamed as (K, N) weight tiles over an extra grid axis with a
    # VMEM f32 accumulator (init/finalize via pl.when), keeping only bias/BN
    # vectors resident.  At this scale the full dense weight set is ~2.1 MiB
    # and stays resident, single-buffered.
    return pl.pallas_call(
        dense_kernel,
        grid=(B // bt,),
        in_specs=[pl.BlockSpec((bt, D), lambda i: (i, 0))]
                 + [_const_spec(a) for a in dense],
        out_specs=(pl.BlockSpec((bt, IMG), lambda i: (i, 0)),
                   pl.BlockSpec((bt, L2), lambda i: (i, 0))),
        out_shape=(jax.ShapeDtypeStruct((B, IMG), jnp.float32),
                   jax.ShapeDtypeStruct((B, L2), jnp.float32)),
        compiler_params=pltpu.CompilerParams(
            # One batch block per grid step; with several blocks the parallel
            # axis puts one block per TensorCore on megacore parts (each core
            # then keeps its own resident weight copy — intended layout).
            dimension_semantics=("parallel",),
            vmem_limit_bytes=VMEM_LIMIT),
    )(feats, *dense)


# ----------------------------- parameter init -----------------------------------
def init_params(key, cfg):
    CH, T = cfg["CH"], cfg["T"]
    C1, C2, C3, K, PW = cfg["C1"], cfg["C2"], cfg["C3"], cfg["K"], cfg["PW"]
    D = C3 * PW
    LAT, L2 = cfg["LAT"], cfg["LAT"] // 2
    DEC1, DEC2, IMG = cfg["DEC1"], cfg["DEC2"], cfg["IMG"]

    keys = iter(jax.random.split(key, 64))
    bf16 = jnp.bfloat16

    def w(shape, fan_in):
        return (jax.random.normal(next(keys), shape, jnp.float32)
                / jnp.sqrt(float(fan_in)))

    def vec(shape, scale=0.05):
        return scale * jax.random.normal(next(keys), shape, jnp.float32)

    inv = 1.0 / jnp.sqrt(1.0 + BN_EPS)   # BN eval scale with running stats (0,1)

    # conv1: torch conv1.weight[j,0,0,k] == w1[j,k].  Init-time block-diagonal
    # repack so conv1 over all EEG channels is a single matmul on the
    # wrapper-built (CH*K, T) im2col.
    w1 = w((C1, K), K)
    w1bd = jnp.kron(jnp.eye(CH, dtype=jnp.float32), w1).astype(bf16)  # (CH*C1, CH*K)
    b1 = vec((C1, 1)); g1, be1 = 1.0 + vec((C1, 1)), vec((C1, 1))
    s1 = jnp.tile(g1 * inv, (CH, 1))                          # (CH*C1, 1)
    t1 = jnp.tile(b1 * (g1 * inv) + be1, (CH, 1))             # conv bias folded in

    # conv2.weight flattened over (eeg_channel, conv1_channel):
    #   w2f[o, c*C1 + j] == torch conv2.weight[o, j, c, 0]
    w2f = w((C2, CH * C1), C1 * CH).astype(bf16)
    b2 = vec((C2, 1)); g2, be2 = 1.0 + vec((C2, 1)), vec((C2, 1))
    s2, t2 = g2 * inv, b2 * (g2 * inv) + be2

    # conv3.weight flattened over (tap, conv2_channel):
    #   w3f[o, k*C2 + c2] == torch conv3.weight[o, c2, 0, k]
    w3f = w((C3, K * C2), C2 * K).astype(bf16)
    b3 = vec((C3, 1)); g3, be3 = 1.0 + vec((C3, 1)), vec((C3, 1))
    s3, t3 = g3 * inv, b3 * (g3 * inv) + be3

    win = T // PW   # adaptive pool windows are uniform because T % PW == 0
    pool = (jnp.repeat(jnp.eye(PW, dtype=jnp.float32), win, axis=0)
            / float(win)).astype(bf16)                        # (T, PW)

    enc = (w1bd, s1, t1, w2f, s2, t2, w3f, s3, t3, pool)

    # attention: only V-projection and out-projection matter for seq_len == 1.
    wv, bv = w((D, D), D).astype(bf16), vec((1, D))
    wo, bo = w((D, D), D).astype(bf16), vec((1, D))

    def lin_bn(din, dout):
        wl = w((din, dout), din).astype(bf16)
        bl = vec((1, dout))
        g, be = 1.0 + vec((1, dout)), vec((1, dout))
        return wl, bl, g * inv, be

    wl1, bl1, sl1, tl1 = lin_bn(D, LAT)
    wl2, bl2, sl2, tl2 = lin_bn(LAT, L2)
    wd1, bd1, sd1, td1 = lin_bn(L2, DEC1)
    wd2, bd2, sd2, td2 = lin_bn(DEC1, DEC2)
    wd3, bd3 = w((DEC2, IMG), DEC2).astype(bf16), vec((1, IMG))

    dense = (wv, bv, wo, bo, wl1, bl1, sl1, tl1, wl2, bl2, sl2, tl2,
             wd1, bd1, sd1, td1, wd2, bd2, sd2, td2, wd3, bd3)
    return enc, dense


# --------------------------------- forward --------------------------------------
def forward(params, eeg):
    enc, dense = params
    B, CH, T = eeg.shape
    K = enc[0].shape[1] // CH            # w1bd: (CH*C1, CH*K)
    p = (K - 1) // 2

    # Glue (layout plumbing): time padding + conv1 im2col,
    #   X[b, c*K + k, t] = x_pad[b, c, t + k].
    x_pad = jnp.pad(eeg, ((0, 0), (0, 0), (p, p)))
    X = jnp.stack([x_pad[:, :, k:k + T] for k in range(K)], axis=2)
    X = X.reshape(B, CH * K, T)

    feats = _encoder_call(X, enc)                        # (B, C3, PW)
    F = feats.reshape(B, -1)                             # Flatten(): c-major, glue

    bt = min(B, 128)                                     # batch block for dense M
    assert B % bt == 0
    img_flat, latent = _dense_call(F, dense, bt)         # (B, 784), (B, LAT//2)
    image = img_flat.reshape(B, 1, 28, 28)               # glue: view
    return image, latent


# ----------------------------- pure-JAX reference --------------------------------
def reference_forward(params, eeg):
    enc, dense = params
    (w1bd, s1, t1, w2f, s2, t2, w3f, s3, t3, pool) = enc
    B, CH, T = eeg.shape
    K = w1bd.shape[1] // CH
    p = (K - 1) // 2
    f32, bf16 = jnp.float32, jnp.bfloat16

    def ldot(w_, a):     # weight (bf16) @ activation (cast to bf16), f32 acc
        return jnp.dot(w_, a.astype(bf16), preferred_element_type=f32)

    def bdot(a, w_):
        return jnp.dot(a.astype(bf16), w_, preferred_element_type=f32)

    x_pad = jnp.pad(eeg, ((0, 0), (0, 0), (p, p)))
    X = jnp.stack([x_pad[:, :, k:k + T] for k in range(K)], axis=2)
    X = X.reshape(B, CH * K, T)

    def encode_one(Xb):                                   # (CH*K, T)
        h1 = jnp.maximum(ldot(w1bd, Xb) * s1 + t1, 0.0)
        h2 = jnp.maximum(ldot(w2f, h1) * s2 + t2, 0.0)
        h2p = jnp.pad(h2, ((0, 0), (p, p)))
        cols = jnp.concatenate([h2p[:, k:k + T] for k in range(K)], axis=0)
        h3 = jnp.maximum(ldot(w3f, cols) * s3 + t3, 0.0)
        feat = jnp.dot(h3.astype(bf16), pool, preferred_element_type=f32)
        return feat.reshape(-1)                           # c-major flatten

    F = jnp.stack([encode_one(X[b]) for b in range(B)], axis=0)   # (B, D)

    (wv, bv, wo, bo, wl1, bl1, sl1, tl1, wl2, bl2, sl2, tl2,
     wd1, bd1, sd1, td1, wd2, bd2, sd2, td2, wd3, bd3) = dense

    att = bdot(bdot(F, wv) + bv, wo) + bo
    f = F + att
    lbr = lambda h, w_, b_, s_, t_: jnp.maximum((bdot(h, w_) + b_) * s_ + t_, 0.0)
    h = lbr(f, wl1, bl1, sl1, tl1)
    lat = lbr(h, wl2, bl2, sl2, tl2)
    d = lbr(lat, wd1, bd1, sd1, td1)
    d = lbr(d, wd2, bd2, sd2, td2)
    img = jax.nn.sigmoid(bdot(d, wd3) + bd3)
    return img.reshape(B, 1, 28, 28), lat


# TODO(synk): training-mode Dropout / batch-statistic BatchNorm are not
# implemented (eval-mode semantics used, matching module.eval()).

if __name__ == "__main__":
    key = jax.random.PRNGKey(0)
    kp, kx = jax.random.split(key)
    params = init_params(kp, CFG)
    eeg = jax.random.normal(kx, (CFG["B"], CFG["CH"], CFG["T"]), dtype=jnp.float32)

    image, latent = jax.jit(forward)(params, eeg)
    jax.block_until_ready((image, latent))

    assert image.shape == (CFG["B"], 1, 28, 28)
    assert latent.shape == (CFG["B"], CFG["LAT"] // 2)
    assert bool(jnp.all(jnp.isfinite(image))) and bool(jnp.all(jnp.isfinite(latent)))

    ref_img, ref_lat = reference_forward(params, eeg)
    assert jnp.allclose(image, ref_img, atol=2e-2, rtol=2e-2)
    assert jnp.allclose(latent, ref_lat, atol=2e-2, rtol=2e-2)

    print("KERNEL_OK")
</pallas_src>

<mosaic_0001>
module attributes {stable_mosaic.version = 11 : i64} {
  func.func @encoder_kernel(%arg0: i32, %arg1: memref<1x28x32xf32, #tpu.memory_space<vmem>>, %arg2: memref<32x28xbf16, #tpu.memory_space<vmem>>, %arg3: memref<32x1xf32, #tpu.memory_space<vmem>>, %arg4: memref<32x1xf32, #tpu.memory_space<vmem>>, %arg5: memref<16x32xbf16, #tpu.memory_space<vmem>>, %arg6: memref<16x1xf32, #tpu.memory_space<vmem>>, %arg7: memref<16x1xf32, #tpu.memory_space<vmem>>, %arg8: memref<32x112xbf16, #tpu.memory_space<vmem>>, %arg9: memref<32x1xf32, #tpu.memory_space<vmem>>, %arg10: memref<32x1xf32, #tpu.memory_space<vmem>>, %arg11: memref<32x16xbf16, #tpu.memory_space<vmem>>, %arg12: memref<1x32x16xf32, #tpu.memory_space<vmem>>) attributes {dimension_semantics = [#tpu.dimension_semantics<parallel>], iteration_bounds = array<i64: 8>, scalar_prefetch = 0 : i64, scratch_operands = 0 : i64, tpu.core_type = #tpu.core_type<tc>, window_params = [{transform_indices = @transform_0, window_bounds = array<i64: 1, 28, 32>}, {pipeline_mode = #tpu.pipeline_mode<synchronous>, transform_indices = @transform_1, window_bounds = array<i64: 32, 28>}, {pipeline_mode = #tpu.pipeline_mode<synchronous>, transform_indices = @transform_2, window_bounds = array<i64: 32, 1>}, {pipeline_mode = #tpu.pipeline_mode<synchronous>, transform_indices = @transform_3, window_bounds = array<i64: 32, 1>}, {pipeline_mode = #tpu.pipeline_mode<synchronous>, transform_indices = @transform_4, window_bounds = array<i64: 16, 32>}, {pipeline_mode = #tpu.pipeline_mode<synchronous>, transform_indices = @transform_5, window_bounds = array<i64: 16, 1>}, {pipeline_mode = #tpu.pipeline_mode<synchronous>, transform_indices = @transform_6, window_bounds = array<i64: 16, 1>}, {pipeline_mode = #tpu.pipeline_mode<synchronous>, transform_indices = @transform_7, window_bounds = array<i64: 32, 112>}, {pipeline_mode = #tpu.pipeline_mode<synchronous>, transform_indices = @transform_8, window_bounds = array<i64: 32, 1>}, {pipeline_mode = #tpu.pipeline_mode<synchronous>, transform_indices = @transform_9, window_bounds = array<i64: 32, 1>}, {pipeline_mode = #tpu.pipeline_mode<synchronous>, transform_indices = @transform_10, window_bounds = array<i64: 32, 16>}, {transform_indices = @transform_11, window_bounds = array<i64: 1, 32, 16>}]} {
    %c0 = arith.constant 0 : index
    %c0_0 = arith.constant 0 : index
    %c0_1 = arith.constant 0 : index
    %0 = vector.load %arg1[%c0, %c0_0, %c0_1] : memref<1x28x32xf32, #tpu.memory_space<vmem>>, vector<1x28x32xf32>
    %1 = vector.shape_cast %0 : vector<1x28x32xf32> to vector<28x32xf32>
    %2 = arith.truncf %1 : vector<28x32xf32> to vector<28x32xbf16>
    %c0_2 = arith.constant 0 : index
    %c0_3 = arith.constant 0 : index
    %3 = vector.load %arg2[%c0_2, %c0_3] : memref<32x28xbf16, #tpu.memory_space<vmem>>, vector<32x28xbf16>
    %cst = arith.constant dense<0.000000e+00> : vector<32x32xf32>
    %4 = tpu.matmul %3, %2, %cst {dimension_numbers = #tpu.dot_dimension_numbers<[1], [0], [0], [1], [0, 0, 1, 1], [], []>} : vector<32x28xbf16>, vector<28x32xbf16>, vector<32x32xf32> -> vector<32x32xf32>
    %c0_4 = arith.constant 0 : index
    %c0_5 = arith.constant 0 : index
    %5 = vector.load %arg3[%c0_4, %c0_5] : memref<32x1xf32, #tpu.memory_space<vmem>>, vector<32x1xf32>
    %6 = vector.broadcast %5 : vector<32x1xf32> to vector<32x32xf32>
    %7 = arith.mulf %4, %6 : vector<32x32xf32>
    %c0_6 = arith.constant 0 : index
    %c0_7 = arith.constant 0 : index
    %8 = vector.load %arg4[%c0_6, %c0_7] : memref<32x1xf32, #tpu.memory_space<vmem>>, vector<32x1xf32>
    %9 = vector.broadcast %8 : vector<32x1xf32> to vector<32x32xf32>
    %10 = arith.addf %7, %9 : vector<32x32xf32>
    %cst_8 = arith.constant 0.000000e+00 : f32
    %11 = vector.broadcast %cst_8 : f32 to vector<32x32xf32>
    %12 = arith.maximumf %10, %11 : vector<32x32xf32>
    %c0_9 = arith.constant 0 : index
    %c0_10 = arith.constant 0 : index
    %13 = vector.load %arg5[%c0_9, %c0_10] : memref<16x32xbf16, #tpu.memory_space<vmem>>, vector<16x32xbf16>
    %14 = arith.truncf %12 : vector<32x32xf32> to vector<32x32xbf16>
    %cst_11 = arith.constant dense<0.000000e+00> : vector<16x32xf32>
    %15 = tpu.matmul %13, %14, %cst_11 {dimension_numbers = #tpu.dot_dimension_numbers<[1], [0], [0], [1], [0, 0, 1, 1], [], []>} : vector<16x32xbf16>, vector<32x32xbf16>, vector<16x32xf32> -> vector<16x32xf32>
    %c0_12 = arith.constant 0 : index
    %c0_13 = arith.constant 0 : index
    %16 = vector.load %arg6[%c0_12, %c0_13] : memref<16x1xf32, #tpu.memory_space<vmem>>, vector<16x1xf32>
    %17 = vector.broadcast %16 : vector<16x1xf32> to vector<16x32xf32>
    %18 = arith.mulf %15, %17 : vector<16x32xf32>
    %c0_14 = arith.constant 0 : index
    %c0_15 = arith.constant 0 : index
    %19 = vector.load %arg7[%c0_14, %c0_15] : memref<16x1xf32, #tpu.memory_space<vmem>>, vector<16x1xf32>
    %20 = vector.broadcast %19 : vector<16x1xf32> to vector<16x32xf32>
    %21 = arith.addf %18, %20 : vector<16x32xf32>
    %cst_16 = arith.constant 0.000000e+00 : f32
    %22 = vector.broadcast %cst_16 : f32 to vector<16x32xf32>
    %23 = arith.maximumf %21, %22 : vector<16x32xf32>
    %cst_17 = arith.constant 0.000000e+00 : f32
    %24 = vector.broadcast %cst_17 : f32 to vector<16x3xf32>
    %25 = tpu.concatenate %24, %23, %24 in 1 : vector<16x3xf32>, vector<16x32xf32>, vector<16x3xf32> -> vector<16x38xf32>
    %26 = vector.extract_strided_slice %25 {offsets = [0, 0], sizes = [16, 32], strides = [1, 1]} : vector<16x38xf32> to vector<16x32xf32>
    %27 = vector.extract_strided_slice %25 {offsets = [0, 1], sizes = [16, 32], strides = [1, 1]} : vector<16x38xf32> to vector<16x32xf32>
    %28 = vector.extract_strided_slice %25 {offsets = [0, 2], sizes = [16, 32], strides = [1, 1]} : vector<16x38xf32> to vector<16x32xf32>
    %29 = vector.extract_strided_slice %25 {offsets = [0, 3], sizes = [16, 32], strides = [1, 1]} : vector<16x38xf32> to vector<16x32xf32>
    %30 = vector.extract_strided_slice %25 {offsets = [0, 4], sizes = [16, 32], strides = [1, 1]} : vector<16x38xf32> to vector<16x32xf32>
    %31 = vector.extract_strided_slice %25 {offsets = [0, 5], sizes = [16, 32], strides = [1, 1]} : vector<16x38xf32> to vector<16x32xf32>
    %32 = vector.extract_strided_slice %25 {offsets = [0, 6], sizes = [16, 32], strides = [1, 1]} : vector<16x38xf32> to vector<16x32xf32>
    %33 = tpu.concatenate %26, %27, %28, %29, %30, %31, %32 in 0 : vector<16x32xf32>, vector<16x32xf32>, vector<16x32xf32>, vector<16x32xf32>, vector<16x32xf32>, vector<16x32xf32>, vector<16x32xf32> -> vector<112x32xf32>
    %c0_18 = arith.constant 0 : index
    %c0_19 = arith.constant 0 : index
    %34 = vector.load %arg8[%c0_18, %c0_19] : memref<32x112xbf16, #tpu.memory_space<vmem>>, vector<32x112xbf16>
    %35 = arith.truncf %33 : vector<112x32xf32> to vector<112x32xbf16>
    %cst_20 = arith.constant dense<0.000000e+00> : vector<32x32xf32>
    %36 = tpu.matmul %34, %35, %cst_20 {dimension_numbers = #tpu.dot_dimension_numbers<[1], [0], [0], [1], [0, 0, 1, 1], [], []>} : vector<32x112xbf16>, vector<112x32xbf16>, vector<32x32xf32> -> vector<32x32xf32>
    %c0_21 = arith.constant 0 : index
    %c0_22 = arith.constant 0 : index
    %37 = vector.load %arg9[%c0_21, %c0_22] : memref<32x1xf32, #tpu.memory_space<vmem>>, vector<32x1xf32>
    %38 = vector.broadcast %37 : vector<32x1xf32> to vector<32x32xf32>
    %39 = arith.mulf %36, %38 : vector<32x32xf32>
    %c0_23 = arith.constant 0 : index
    %c0_24 = arith.constant 0 : index
    %40 = vector.load %arg10[%c0_23, %c0_24] : memref<32x1xf32, #tpu.memory_space<vmem>>, vector<32x1xf32>
    %41 = vector.broadcast %40 : vector<32x1xf32> to vector<32x32xf32>
    %42 = arith.addf %39, %41 : vector<32x32xf32>
    %cst_25 = arith.constant 0.000000e+00 : f32
    %43 = vector.broadcast %cst_25 : f32 to vector<32x32xf32>
    %44 = arith.maximumf %42, %43 : vector<32x32xf32>
    %45 = arith.truncf %44 : vector<32x32xf32> to vector<32x32xbf16>
    %c0_26 = arith.constant 0 : index
    %c0_27 = arith.constant 0 : index
    %46 = vector.load %arg11[%c0_26, %c0_27] : memref<32x16xbf16, #tpu.memory_space<vmem>>, vector<32x16xbf16>
    %cst_28 = arith.constant dense<0.000000e+00> : vector<32x16xf32>
    %47 = tpu.matmul %45, %46, %cst_28 {dimension_numbers = #tpu.dot_dimension_numbers<[1], [0], [0], [1], [0, 0, 1, 1], [], []>} : vector<32x32xbf16>, vector<32x16xbf16>, vector<32x16xf32> -> vector<32x16xf32>
    %c0_29 = arith.constant 0 : index
    %c0_30 = arith.constant 0 : index
    %c0_31 = arith.constant 0 : index
    %48 = vector.load %arg12[%c0_29, %c0_30, %c0_31] : memref<1x32x16xf32, #tpu.memory_space<vmem>>, vector<1x32x16xf32>
    %49 = vector.shape_cast %48 : vector<1x32x16xf32> to vector<32x16xf32>
    %50 = vector.shape_cast %47 : vector<32x16xf32> to vector<1x32x16xf32>
    tpu.vector_store %arg12[%c0_29, %c0_30, %c0_31], %50 {strides = array<i32>} : memref<1x32x16xf32, #tpu.memory_space<vmem>>, vector<1x32x16xf32>,
    return
  }
  func.func @transform_0(%arg0: i32) -> (i32, i32, i32) {
    %c0_i32 = arith.constant 0 : i32
    %c0_i32_0 = arith.constant 0 : i32
    %c0_i32_1 = arith.constant 0 : i32
    return %arg0, %c0_i32, %c0_i32_0 : i32, i32, i32
  }
  func.func @transform_1(%arg0: i32) -> (i32, i32) {
    %c0_i32 = arith.constant 0 : i32
    %c0_i32_0 = arith.constant 0 : i32
    %c0_i32_1 = arith.constant 0 : i32
    return %c0_i32, %c0_i32_0 : i32, i32
  }
  func.func @transform_2(%arg0: i32) -> (i32, i32) {
    %c0_i32 = arith.constant 0 : i32
    %c0_i32_0 = arith.constant 0 : i32
    %c0_i32_1 = arith.constant 0 : i32
    return %c0_i32, %c0_i32_0 : i32, i32
  }
  func.func @transform_3(%arg0: i32) -> (i32, i32) {
    %c0_i32 = arith.constant 0 : i32
    %c0_i32_0 = arith.constant 0 : i32
    %c0_i32_1 = arith.constant 0 : i32
    return %c0_i32, %c0_i32_0 : i32, i32
  }
  func.func @transform_4(%arg0: i32) -> (i32, i32) {
    %c0_i32 = arith.constant 0 : i32
    %c0_i32_0 = arith.constant 0 : i32
    %c0_i32_1 = arith.constant 0 : i32
    return %c0_i32, %c0_i32_0 : i32, i32
  }
  func.func @transform_5(%arg0: i32) -> (i32, i32) {
    %c0_i32 = arith.constant 0 : i32
    %c0_i32_0 = arith.constant 0 : i32
    %c0_i32_1 = arith.constant 0 : i32
    return %c0_i32, %c0_i32_0 : i32, i32
  }
  func.func @transform_6(%arg0: i32) -> (i32, i32) {
    %c0_i32 = arith.constant 0 : i32
    %c0_i32_0 = arith.constant 0 : i32
    %c0_i32_1 = arith.constant 0 : i32
    return %c0_i32, %c0_i32_0 : i32, i32
  }
  func.func @transform_7(%arg0: i32) -> (i32, i32) {
    %c0_i32 = arith.constant 0 : i32
    %c0_i32_0 = arith.constant 0 : i32
    %c0_i32_1 = arith.constant 0 : i32
    return %c0_i32, %c0_i32_0 : i32, i32
  }
  func.func @transform_8(%arg0: i32) -> (i32, i32) {
    %c0_i32 = arith.constant 0 : i32
    %c0_i32_0 = arith.constant 0 : i32
    %c0_i32_1 = arith.constant 0 : i32
    return %c0_i32, %c0_i32_0 : i32, i32
  }
  func.func @transform_9(%arg0: i32) -> (i32, i32) {
    %c0_i32 = arith.constant 0 : i32
    %c0_i32_0 = arith.constant 0 : i32
    %c0_i32_1 = arith.constant 0 : i32
    return %c0_i32, %c0_i32_0 : i32, i32
  }
  func.func @transform_10(%arg0: i32) -> (i32, i32) {
    %c0_i32 = arith.constant 0 : i32
    %c0_i32_0 = arith.constant 0 : i32
    %c0_i32_1 = arith.constant 0 : i32
    return %c0_i32, %c0_i32_0 : i32, i32
  }
  func.func @transform_11(%arg0: i32) -> (i32, i32, i32) {
    %c0_i32 = arith.constant 0 : i32
    %c0_i32_0 = arith.constant 0 : i32
    %c0_i32_1 = arith.constant 0 : i32
    return %arg0, %c0_i32, %c0_i32_0 : i32, i32, i32
  }
}

module attributes {stable_mosaic.version = 11 : i64} {
  func.func @dense_kernel(%arg0: i32, %arg1: memref<8x512xf32, #tpu.memory_space<vmem>>, %arg2: memref<512x512xbf16, #tpu.memory_space<vmem>>, %arg3: memref<1x512xf32, #tpu.memory_space<vmem>>, %arg4: memref<512x512xbf16, #tpu.memory_space<vmem>>, %arg5: memref<1x512xf32, #tpu.memory_space<vmem>>, %arg6: memref<512x64xbf16, #tpu.memory_space<vmem>>, %arg7: memref<1x64xf32, #tpu.memory_space<vmem>>, %arg8: memref<1x64xf32, #tpu.memory_space<vmem>>, %arg9: memref<1x64xf32, #tpu.memory_space<vmem>>, %arg10: memref<64x32xbf16, #tpu.memory_space<vmem>>, %arg11: memref<1x32xf32, #tpu.memory_space<vmem>>, %arg12: memref<1x32xf32, #tpu.memory_space<vmem>>, %arg13: memref<1x32xf32, #tpu.memory_space<vmem>>, %arg14: memref<32x256xbf16, #tpu.memory_space<vmem>>, %arg15: memref<1x256xf32, #tpu.memory_space<vmem>>, %arg16: memref<1x256xf32, #tpu.memory_space<vmem>>, %arg17: memref<1x256xf32, #tpu.memory_space<vmem>>, %arg18: memref<256x512xbf16, #tpu.memory_space<vmem>>, %arg19: memref<1x512xf32, #tpu.memory_space<vmem>>, %arg20: memref<1x512xf32, #tpu.memory_space<vmem>>, %arg21: memref<1x512xf32, #tpu.memory_space<vmem>>, %arg22: memref<512x784xbf16, #tpu.memory_space<vmem>>, %arg23: memref<1x784xf32, #tpu.memory_space<vmem>>, %arg24: memref<8x784xf32, #tpu.memory_space<vmem>>, %arg25: memref<8x32xf32, #tpu.memory_space<vmem>>) attributes {dimension_semantics = [#tpu.dimension_semantics<parallel>], iteration_bounds = array<i64: 1>, scalar_prefetch = 0 : i64, scratch_operands = 0 : i64, tpu.core_type = #tpu.core_type<tc>, window_params = [{transform_indices = @transform_0, window_bounds = array<i64: 8, 512>}, {pipeline_mode = #tpu.pipeline_mode<synchronous>, transform_indices = @transform_1, window_bounds = array<i64: 512, 512>}, {pipeline_mode = #tpu.pipeline_mode<synchronous>, transform_indices = @transform_2, window_bounds = array<i64: 1, 512>}, {pipeline_mode = #tpu.pipeline_mode<synchronous>, transform_indices = @transform_3, window_bounds = array<i64: 512, 512>}, {pipeline_mode = #tpu.pipeline_mode<synchronous>, transform_indices = @transform_4, window_bounds = array<i64: 1, 512>}, {pipeline_mode = #tpu.pipeline_mode<synchronous>, transform_indices = @transform_5, window_bounds = array<i64: 512, 64>}, {pipeline_mode = #tpu.pipeline_mode<synchronous>, transform_indices = @transform_6, window_bounds = array<i64: 1, 64>}, {pipeline_mode = #tpu.pipeline_mode<synchronous>, transform_indices = @transform_7, window_bounds = array<i64: 1, 64>}, {pipeline_mode = #tpu.pipeline_mode<synchronous>, transform_indices = @transform_8, window_bounds = array<i64: 1, 64>}, {pipeline_mode = #tpu.pipeline_mode<synchronous>, transform_indices = @transform_9, window_bounds = array<i64: 64, 32>}, {pipeline_mode = #tpu.pipeline_mode<synchronous>, transform_indices = @transform_10, window_bounds = array<i64: 1, 32>}, {pipeline_mode = #tpu.pipeline_mode<synchronous>, transform_indices = @transform_11, window_bounds = array<i64: 1, 32>}, {pipeline_mode = #tpu.pipeline_mode<synchronous>, transform_indices = @transform_12, window_bounds = array<i64: 1, 32>}, {pipeline_mode = #tpu.pipeline_mode<synchronous>, transform_indices = @transform_13, window_bounds = array<i64: 32, 256>}, {pipeline_mode = #tpu.pipeline_mode<synchronous>, transform_indices = @transform_14, window_bounds = array<i64: 1, 256>}, {pipeline_mode = #tpu.pipeline_mode<synchronous>, transform_indices = @transform_15, window_bounds = array<i64: 1, 256>}, {pipeline_mode = #tpu.pipeline_mode<synchronous>, transform_indices = @transform_16, window_bounds = array<i64: 1, 256>}, {pipeline_mode = #tpu.pipeline_mode<synchronous>, transform_indices = @transform_17, window_bounds = array<i64: 256, 512>}, {pipeline_mode = #tpu.pipeline_mode<synchronous>, transform_indices = @transform_18, window_bounds = array<i64: 1, 512>}, {pipeline_mode = #tpu.pipeline_mode<synchronous>, transform_indices = @transform_19, window_bounds = array<i64: 1, 512>}, {pipeline_mode = #tpu.pipeline_mode<synchronous>, transform_indices = @transform_20, window_bounds = array<i64: 1, 512>}, {pipeline_mode = #tpu.pipeline_mode<synchronous>, transform_indices = @transform_21, window_bounds = array<i64: 512, 784>}, {pipeline_mode = #tpu.pipeline_mode<synchronous>, transform_indices = @transform_22, window_bounds = array<i64: 1, 784>}, {transform_indices = @transform_23, window_bounds = array<i64: 8, 784>}, {transform_indices = @transform_24, window_bounds = array<i64: 8, 32>}]} {
    %c0 = arith.constant 0 : index
    %c0_0 = arith.constant 0 : index
    %0 = vector.load %arg1[%c0, %c0_0] : memref<8x512xf32, #tpu.memory_space<vmem>>, vector<8x512xf32>
    %1 = arith.truncf %0 : vector<8x512xf32> to vector<8x512xbf16>
    %c0_1 = arith.constant 0 : index
    %c0_2 = arith.constant 0 : index
    %2 = vector.load %arg2[%c0_1, %c0_2] : memref<512x512xbf16, #tpu.memory_space<vmem>>, vector<512x512xbf16>
    %cst = arith.constant dense<0.000000e+00> : vector<8x512xf32>
    %3 = tpu.matmul %1, %2, %cst {dimension_numbers = #tpu.dot_dimension_numbers<[1], [0], [0], [1], [0, 0, 1, 1], [], []>} : vector<8x512xbf16>, vector<512x512xbf16>, vector<8x512xf32> -> vector<8x512xf32>
    %c0_3 = arith.constant 0 : index
    %c0_4 = arith.constant 0 : index
    %4 = vector.load %arg3[%c0_3, %c0_4] : memref<1x512xf32, #tpu.memory_space<vmem>>, vector<1x512xf32>
    %5 = vector.broadcast %4 : vector<1x512xf32> to vector<8x512xf32>
    %6 = arith.addf %3, %5 : vector<8x512xf32>
    %7 = arith.truncf %6 : vector<8x512xf32> to vector<8x512xbf16>
    %c0_5 = arith.constant 0 : index
    %c0_6 = arith.constant 0 : index
    %8 = vector.load %arg4[%c0_5, %c0_6] : memref<512x512xbf16, #tpu.memory_space<vmem>>, vector<512x512xbf16>
    %cst_7 = arith.constant dense<0.000000e+00> : vector<8x512xf32>
    %9 = tpu.matmul %7, %8, %cst_7 {dimension_numbers = #tpu.dot_dimension_numbers<[1], [0], [0], [1], [0, 0, 1, 1], [], []>} : vector<8x512xbf16>, vector<512x512xbf16>, vector<8x512xf32> -> vector<8x512xf32>
    %c0_8 = arith.constant 0 : index
    %c0_9 = arith.constant 0 : index
    %10 = vector.load %arg5[%c0_8, %c0_9] : memref<1x512xf32, #tpu.memory_space<vmem>>, vector<1x512xf32>
    %11 = vector.broadcast %10 : vector<1x512xf32> to vector<8x512xf32>
    %12 = arith.addf %9, %11 : vector<8x512xf32>
    %13 = arith.addf %0, %12 : vector<8x512xf32>
    %14 = arith.truncf %13 : vector<8x512xf32> to vector<8x512xbf16>
    %c0_10 = arith.constant 0 : index
    %c0_11 = arith.constant 0 : index
    %15 = vector.load %arg6[%c0_10, %c0_11] : memref<512x64xbf16, #tpu.memory_space<vmem>>, vector<512x64xbf16>
    %cst_12 = arith.constant dense<0.000000e+00> : vector<8x64xf32>
    %16 = tpu.matmul %14, %15, %cst_12 {dimension_numbers = #tpu.dot_dimension_numbers<[1], [0], [0], [1], [0, 0, 1, 1], [], []>} : vector<8x512xbf16>, vector<512x64xbf16>, vector<8x64xf32> -> vector<8x64xf32>
    %c0_13 = arith.constant 0 : index
    %c0_14 = arith.constant 0 : index
    %17 = vector.load %arg7[%c0_13, %c0_14] : memref<1x64xf32, #tpu.memory_space<vmem>>, vector<1x64xf32>
    %18 = vector.broadcast %17 : vector<1x64xf32> to vector<8x64xf32>
    %19 = arith.addf %16, %18 : vector<8x64xf32>
    %c0_15 = arith.constant 0 : index
    %c0_16 = arith.constant 0 : index
    %20 = vector.load %arg8[%c0_15, %c0_16] : memref<1x64xf32, #tpu.memory_space<vmem>>, vector<1x64xf32>
    %21 = vector.broadcast %20 : vector<1x64xf32> to vector<8x64xf32>
    %22 = arith.mulf %19, %21 : vector<8x64xf32>
    %c0_17 = arith.constant 0 : index
    %c0_18 = arith.constant 0 : index
    %23 = vector.load %arg9[%c0_17, %c0_18] : memref<1x64xf32, #tpu.memory_space<vmem>>, vector<1x64xf32>
    %24 = vector.broadcast %23 : vector<1x64xf32> to vector<8x64xf32>
    %25 = arith.addf %22, %24 : vector<8x64xf32>
    %cst_19 = arith.constant 0.000000e+00 : f32
    %26 = vector.broadcast %cst_19 : f32 to vector<8x64xf32>
    %27 = arith.maximumf %25, %26 : vector<8x64xf32>
    %28 = arith.truncf %27 : vector<8x64xf32> to vector<8x64xbf16>
    %c0_20 = arith.constant 0 : index
    %c0_21 = arith.constant 0 : index
    %29 = vector.load %arg10[%c0_20, %c0_21] : memref<64x32xbf16, #tpu.memory_space<vmem>>, vector<64x32xbf16>
    %cst_22 = arith.constant dense<0.000000e+00> : vector<8x32xf32>
    %30 = tpu.matmul %28, %29, %cst_22 {dimension_numbers = #tpu.dot_dimension_numbers<[1], [0], [0], [1], [0, 0, 1, 1], [], []>} : vector<8x64xbf16>, vector<64x32xbf16>, vector<8x32xf32> -> vector<8x32xf32>
    %c0_23 = arith.constant 0 : index
    %c0_24 = arith.constant 0 : index
    %31 = vector.load %arg11[%c0_23, %c0_24] : memref<1x32xf32, #tpu.memory_space<vmem>>, vector<1x32xf32>
    %32 = vector.broadcast %31 : vector<1x32xf32> to vector<8x32xf32>
    %33 = arith.addf %30, %32 : vector<8x32xf32>
    %c0_25 = arith.constant 0 : index
    %c0_26 = arith.constant 0 : index
    %34 = vector.load %arg12[%c0_25, %c0_26] : memref<1x32xf32, #tpu.memory_space<vmem>>, vector<1x32xf32>
    %35 = vector.broadcast %34 : vector<1x32xf32> to vector<8x32xf32>
    %36 = arith.mulf %33, %35 : vector<8x32xf32>
    %c0_27 = arith.constant 0 : index
    %c0_28 = arith.constant 0 : index
    %37 = vector.load %arg13[%c0_27, %c0_28] : memref<1x32xf32, #tpu.memory_space<vmem>>, vector<1x32xf32>
    %38 = vector.broadcast %37 : vector<1x32xf32> to vector<8x32xf32>
    %39 = arith.addf %36, %38 : vector<8x32xf32>
    %cst_29 = arith.constant 0.000000e+00 : f32
    %40 = vector.broadcast %cst_29 : f32 to vector<8x32xf32>
    %41 = arith.maximumf %39, %40 : vector<8x32xf32>
    %c0_30 = arith.constant 0 : index
    %c0_31 = arith.constant 0 : index
    %42 = vector.load %arg25[%c0_30, %c0_31] : memref<8x32xf32, #tpu.memory_space<vmem>>, vector<8x32xf32>
    tpu.vector_store %arg25[%c0_30, %c0_31], %41 {strides = array<i32>} : memref<8x32xf32, #tpu.memory_space<vmem>>, vector<8x32xf32>,
    %43 = arith.truncf %41 : vector<8x32xf32> to vector<8x32xbf16>
    %c0_32 = arith.constant 0 : index
    %c0_33 = arith.constant 0 : index
    %44 = vector.load %arg14[%c0_32, %c0_33] : memref<32x256xbf16, #tpu.memory_space<vmem>>, vector<32x256xbf16>
    %cst_34 = arith.constant dense<0.000000e+00> : vector<8x256xf32>
    %45 = tpu.matmul %43, %44, %cst_34 {dimension_numbers = #tpu.dot_dimension_numbers<[1], [0], [0], [1], [0, 0, 1, 1], [], []>} : vector<8x32xbf16>, vector<32x256xbf16>, vector<8x256xf32> -> vector<8x256xf32>
    %c0_35 = arith.constant 0 : index
    %c0_36 = arith.constant 0 : index
    %46 = vector.load %arg15[%c0_35, %c0_36] : memref<1x256xf32, #tpu.memory_space<vmem>>, vector<1x256xf32>
    %47 = vector.broadcast %46 : vector<1x256xf32> to vector<8x256xf32>
    %48 = arith.addf %45, %47 : vector<8x256xf32>
    %c0_37 = arith.constant 0 : index
    %c0_38 = arith.constant 0 : index
    %49 = vector.load %arg16[%c0_37, %c0_38] : memref<1x256xf32, #tpu.memory_space<vmem>>, vector<1x256xf32>
    %50 = vector.broadcast %49 : vector<1x256xf32> to vector<8x256xf32>
    %51 = arith.mulf %48, %50 : vector<8x256xf32>
    %c0_39 = arith.constant 0 : index
    %c0_40 = arith.constant 0 : index
    %52 = vector.load %arg17[%c0_39, %c0_40] : memref<1x256xf32, #tpu.memory_space<vmem>>, vector<1x256xf32>
    %53 = vector.broadcast %52 : vector<1x256xf32> to vector<8x256xf32>
    %54 = arith.addf %51, %53 : vector<8x256xf32>
    %cst_41 = arith.constant 0.000000e+00 : f32
    %55 = vector.broadcast %cst_41 : f32 to vector<8x256xf32>
    %56 = arith.maximumf %54, %55 : vector<8x256xf32>
    %57 = arith.truncf %56 : vector<8x256xf32> to vector<8x256xbf16>
    %c0_42 = arith.constant 0 : index
    %c0_43 = arith.constant 0 : index
    %58 = vector.load %arg18[%c0_42, %c0_43] : memref<256x512xbf16, #tpu.memory_space<vmem>>, vector<256x512xbf16>
    %cst_44 = arith.constant dense<0.000000e+00> : vector<8x512xf32>
    %59 = tpu.matmul %57, %58, %cst_44 {dimension_numbers = #tpu.dot_dimension_numbers<[1], [0], [0], [1], [0, 0, 1, 1], [], []>} : vector<8x256xbf16>, vector<256x512xbf16>, vector<8x512xf32> -> vector<8x512xf32>
    %c0_45 = arith.constant 0 : index
    %c0_46 = arith.constant 0 : index
    %60 = vector.load %arg19[%c0_45, %c0_46] : memref<1x512xf32, #tpu.memory_space<vmem>>, vector<1x512xf32>
    %61 = vector.broadcast %60 : vector<1x512xf32> to vector<8x512xf32>
    %62 = arith.addf %59, %61 : vector<8x512xf32>
    %c0_47 = arith.constant 0 : index
    %c0_48 = arith.constant 0 : index
    %63 = vector.load %arg20[%c0_47, %c0_48] : memref<1x512xf32, #tpu.memory_space<vmem>>, vector<1x512xf32>
    %64 = vector.broadcast %63 : vector<1x512xf32> to vector<8x512xf32>
    %65 = arith.mulf %62, %64 : vector<8x512xf32>
    %c0_49 = arith.constant 0 : index
    %c0_50 = arith.constant 0 : index
    %66 = vector.load %arg21[%c0_49, %c0_50] : memref<1x512xf32, #tpu.memory_space<vmem>>, vector<1x512xf32>
    %67 = vector.broadcast %66 : vector<1x512xf32> to vector<8x512xf32>
    %68 = arith.addf %65, %67 : vector<8x512xf32>
    %cst_51 = arith.constant 0.000000e+00 : f32
    %69 = vector.broadcast %cst_51 : f32 to vector<8x512xf32>
    %70 = arith.maximumf %68, %69 : vector<8x512xf32>
    %71 = arith.truncf %70 : vector<8x512xf32> to vector<8x512xbf16>
    %c0_52 = arith.constant 0 : index
    %c0_53 = arith.constant 0 : index
    %72 = vector.load %arg22[%c0_52, %c0_53] : memref<512x784xbf16, #tpu.memory_space<vmem>>, vector<512x784xbf16>
    %cst_54 = arith.constant dense<0.000000e+00> : vector<8x784xf32>
    %73 = tpu.matmul %71, %72, %cst_54 {dimension_numbers = #tpu.dot_dimension_numbers<[1], [0], [0], [1], [0, 0, 1, 1], [], []>} : vector<8x512xbf16>, vector<512x784xbf16>, vector<8x784xf32> -> vector<8x784xf32>
    %c0_55 = arith.constant 0 : index
    %c0_56 = arith.constant 0 : index
    %74 = vector.load %arg23[%c0_55, %c0_56] : memref<1x784xf32, #tpu.memory_space<vmem>>, vector<1x784xf32>
    %75 = vector.broadcast %74 : vector<1x784xf32> to vector<8x784xf32>
    %76 = arith.addf %73, %75 : vector<8x784xf32>
    %77 = arith.negf %76 : vector<8x784xf32>
    %78 = math.exp %77 : vector<8x784xf32>
    %cst_57 = arith.constant 1.000000e+00 : f32
    %79 = vector.broadcast %cst_57 : f32 to vector<8x784xf32>
    %80 = arith.addf %79, %78 : vector<8x784xf32>
    %81 = arith.divf %79, %80 : vector<8x784xf32>
    %c0_58 = arith.constant 0 : index
    %c0_59 = arith.constant 0 : index
    %82 = vector.load %arg24[%c0_58, %c0_59] : memref<8x784xf32, #tpu.memory_space<vmem>>, vector<8x784xf32>
    tpu.vector_store %arg24[%c0_58, %c0_59], %81 {strides = array<i32>} : memref<8x784xf32, #tpu.memory_space<vmem>>, vector<8x784xf32>,
    return
  }
  func.func @transform_0(%arg0: i32) -> (i32, i32) {
    %c0_i32 = arith.constant 0 : i32
    %c0_i32_0 = arith.constant 0 : i32
    return %arg0, %c0_i32 : i32, i32
  }
  func.func @transform_1(%arg0: i32) -> (i32, i32) {
    %c0_i32 = arith.constant 0 : i32
    %c0_i32_0 = arith.constant 0 : i32
    %c0_i32_1 = arith.constant 0 : i32
    return %c0_i32, %c0_i32_0 : i32, i32
  }
  func.func @transform_2(%arg0: i32) -> (i32, i32) {
    %c0_i32 = arith.constant 0 : i32
    %c0_i32_0 = arith.constant 0 : i32
    %c0_i32_1 = arith.constant 0 : i32
    return %c0_i32, %c0_i32_0 : i32, i32
  }
  func.func @transform_3(%arg0: i32) -> (i32, i32) {
    %c0_i32 = arith.constant 0 : i32
    %c0_i32_0 = arith.constant 0 : i32
    %c0_i32_1 = arith.constant 0 : i32
    return %c0_i32, %c0_i32_0 : i32, i32
  }
  func.func @transform_4(%arg0: i32) -> (i32, i32) {
    %c0_i32 = arith.constant 0 : i32
    %c0_i32_0 = arith.constant 0 : i32
    %c0_i32_1 = arith.constant 0 : i32
    return %c0_i32, %c0_i32_0 : i32, i32
  }
  func.func @transform_5(%arg0: i32) -> (i32, i32) {
    %c0_i32 = arith.constant 0 : i32
    %c0_i32_0 = arith.constant 0 : i32
    %c0_i32_1 = arith.constant 0 : i32
    return %c0_i32, %c0_i32_0 : i32, i32
  }
  func.func @transform_6(%arg0: i32) -> (i32, i32) {
    %c0_i32 = arith.constant 0 : i32
    %c0_i32_0 = arith.constant 0 : i32
    %c0_i32_1 = arith.constant 0 : i32
    return %c0_i32, %c0_i32_0 : i32, i32
  }
  func.func @transform_7(%arg0: i32) -> (i32, i32) {
    %c0_i32 = arith.constant 0 : i32
    %c0_i32_0 = arith.constant 0 : i32
    %c0_i32_1 = arith.constant 0 : i32
    return %c0_i32, %c0_i32_0 : i32, i32
  }
  func.func @transform_8(%arg0: i32) -> (i32, i32) {
    %c0_i32 = arith.constant 0 : i32
    %c0_i32_0 = arith.constant 0 : i32
    %c0_i32_1 = arith.constant 0 : i32
    return %c0_i32, %c0_i32_0 : i32, i32
  }
  func.func @transform_9(%arg0: i32) -> (i32, i32) {
    %c0_i32 = arith.constant 0 : i32
    %c0_i32_0 = arith.constant 0 : i32
    %c0_i32_1 = arith.constant 0 : i32
    return %c0_i32, %c0_i32_0 : i32, i32
  }
  func.func @transform_10(%arg0: i32) -> (i32, i32) {
    %c0_i32 = arith.constant 0 : i32
    %c0_i32_0 = arith.constant 0 : i32
    %c0_i32_1 = arith.constant 0 : i32
    return %c0_i32, %c0_i32_0 : i32, i32
  }
  func.func @transform_11(%arg0: i32) -> (i32, i32) {
    %c0_i32 = arith.constant 0 : i32
    %c0_i32_0 = arith.constant 0 : i32
    %c0_i32_1 = arith.constant 0 : i32
    return %c0_i32, %c0_i32_0 : i32, i32
  }
  func.func @transform_12(%arg0: i32) -> (i32, i32) {
    %c0_i32 = arith.constant 0 : i32
    %c0_i32_0 = arith.constant 0 : i32
    %c0_i32_1 = arith.constant 0 : i32
    return %c0_i32, %c0_i32_0 : i32, i32
  }
  func.func @transform_13(%arg0: i32) -> (i32, i32) {
    %c0_i32 = arith.constant 0 : i32
    %c0_i32_0 = arith.constant 0 : i32
    %c0_i32_1 = arith.constant 0 : i32
    return %c0_i32, %c0_i32_0 : i32, i32
  }
  func.func @transform_14(%arg0: i32) -> (i32, i32) {
    %c0_i32 = arith.constant 0 : i32
    %c0_i32_0 = arith.constant 0 : i32
    %c0_i32_1 = arith.constant 0 : i32
    return %c0_i32, %c0_i32_0 : i32, i32
  }
  func.func @transform_15(%arg0: i32) -> (i32, i32) {
    %c0_i32 = arith.constant 0 : i32
    %c0_i32_0 = arith.constant 0 : i32
    %c0_i32_1 = arith.constant 0 : i32
    return %c0_i32, %c0_i32_0 : i32, i32
  }
  func.func @transform_16(%arg0: i32) -> (i32, i32) {
    %c0_i32 = arith.constant 0 : i32
    %c0_i32_0 = arith.constant 0 : i32
    %c0_i32_1 = arith.constant 0 : i32
    return %c0_i32, %c0_i32_0 : i32, i32
  }
  func.func @transform_17(%arg0: i32) -> (i32, i32) {
    %c0_i32 = arith.constant 0 : i32
    %c0_i32_0 = arith.constant 0 : i32
    %c0_i32_1 = arith.constant 0 : i32
    return %c0_i32, %c0_i32_0 : i32, i32
  }
  func.func @transform_18(%arg0: i32) -> (i32, i32) {
    %c0_i32 = arith.constant 0 : i32
    %c0_i32_0 = arith.constant 0 : i32
    %c0_i32_1 = arith.constant 0 : i32
    return %c0_i32, %c0_i32_0 : i32, i32
  }
  func.func @transform_19(%arg0: i32) -> (i32, i32) {
    %c0_i32 = arith.constant 0 : i32
    %c0_i32_0 = arith.constant 0 : i32
    %c0_i32_1 = arith.constant 0 : i32
    return %c0_i32, %c0_i32_0 : i32, i32
  }
  func.func @transform_20(%arg0: i32) -> (i32, i32) {
    %c0_i32 = arith.constant 0 : i32
    %c0_i32_0 = arith.constant 0 : i32
    %c0_i32_1 = arith.constant 0 : i32
    return %c0_i32, %c0_i32_0 : i32, i32
  }
  func.func @transform_21(%arg0: i32) -> (i32, i32) {
    %c0_i32 = arith.constant 0 : i32
    %c0_i32_0 = arith.constant 0 : i32
    %c0_i32_1 = arith.constant 0 : i32
    return %c0_i32, %c0_i32_0 : i32, i32
  }
  func.func @transform_22(%arg0: i32) -> (i32, i32) {
    %c0_i32 = arith.constant 0 : i32
    %c0_i32_0 = arith.constant 0 : i32
    %c0_i32_1 = arith.constant 0 : i32
    return %c0_i32, %c0_i32_0 : i32, i32
  }
  func.func @transform_23(%arg0: i32) -> (i32, i32) {
    %c0_i32 = arith.constant 0 : i32
    %c0_i32_0 = arith.constant 0 : i32
    return %arg0, %c0_i32 : i32, i32
  }
  func.func @transform_24(%arg0: i32) -> (i32, i32) {
    %c0_i32 = arith.constant 0 : i32
    %c0_i32_0 = arith.constant 0 : i32
    return %arg0, %c0_i32 : i32, i32
  }
}

</mosaic_0001>

<bundles_post_ra>
// kernel: forward.2
= control target key start
LH: loop header
LB: loop body
LE: loop exit
PB: predicated region body
PF: predicated region fallthrough
CT: control target
= control target key end

     0   :  { %16 = vsyncpa [#allocation3], 0  ;;  %s1537_s0 = inlined_call_operand.vmem [shape: f32[8,28,32], index: 0, kind: input, shape index: {}]   ;;  %s1538_s1 = inlined_call_operand.hbm [shape: bf16[32,28], index: 1, kind: input, shape index: {}]   ;;  %s1539_s2 = inlined_call_operand.vmem [shape: f32[32,1], index: 2, kind: input, shape index: {}]   ;;  %s1540_s3 = inlined_call_operand.vmem [shape: f32[32,1], index: 3, kind: input, shape index: {}]   ;;  %s1541_s4 = inlined_call_operand.hbm [shape: bf16[16,32], index: 4, kind: input, shape index: {}]   ;;  %s1542_s5 = inlined_call_operand.vmem [shape: f32[16,1], index: 5, kind: input, shape index: {}]   ;;  %s1543_s6 = inlined_call_operand.vmem [shape: f32[16,1], index: 6, kind: input, shape index: {}]   ;;  %s1544_s7 = inlined_call_operand.hbm [shape: bf16[32,112], index: 7, kind: input, shape index: {}]   ;;  %s1545_s8 = inlined_call_operand.vmem [shape: f32[32,1], index: 8, kind: input, shape index: {}]   ;;  %s1546_s9 = inlined_call_operand.vmem [shape: f32[32,1], index: 9, kind: input, shape index: {}]   ;;  %s1547_s10 = inlined_call_operand.vmem [shape: bf16[32,16], index: 10, kind: input, shape index: {}]   ;;  %s1548_s11 = inlined_call_operand.vmem [shape: f32[8,32,16], index: 11, kind: output, shape index: {}]  }
   0x1   :  { %17 = vsyncpa [#allocation5], 0  ;;  %s1372_s17 = smov 0  }
   0x2 LB: > { %s1378_s18 = sadd.s32 4294967295, %s1295_s17   ;;  %p1011_p0 = scmp.ge.s32.totalorder %s1295_s17, 1  ;;  %s1295_s17 = sphi %s1372_s17, %s23_s17  }
   0x3   : > { %p290_p1 = scmp.lt.s32.totalorder %s1295_s17, 9  ;;  %p1130_p2 = scmp.eq.s32.totalorder %s1378_s18, 0 }
   0x4   : > { %s1297_s20 = smov [#allocation4]   ;;  %s1298_s22 = smov [#allocation2]  }
   0x5   : > { %p1383_p3 = pnand %p1011_p0, %p290_p1  ;;  %s321_s21 = sshll.u32 %s1297_s20, 4  ;;  %s322_s21 = int_to_ptr.vmem [resolvable:$true] %s321_s21 }
   0x6   : > { %s302_s23 = sshll.u32 %s1298_s22, 4  ;;  %s1299_s25 = smov [#allocation6]   ;;  %s303_s23 = int_to_ptr.vmem [resolvable:$true] %s302_s23 }
   0x7   : > { %p1120_p4 = pneg %p1383_p3  ;;  %s340_s26 = sshll.u32 %s1299_s25, 4  ;;  %s1395_s26 = int_to_ptr.vmem [resolvable:$true] %s340_s26 }
   0x8   : > { %s1214_s27 = scalar_lea.vmem %s322_s21, 128  ;;  %p1222_p10 = scmp.lt.s32.totalorder %s322_s21, %s322_s21 }
   0x9   : > { %p1391_p5 = pnand %p1130_p2, %p1120_p4  ;;  %p1215_p7 = scmp.ne.s32.totalorder %s322_s21, %s1214_s27 }
   0xa   : > { %p1223_p11 = scmp.lt.s32.totalorder %s1214_s27, %s1214_s27 }
   0xb   : > { %p1205_p6 = pneg %p1391_p5 }
   0xc   : > { %p1224_p12 = por %p1223_p11, %p1222_p10 }
   0xd   : > { %p1217_p8 = pnand %p1215_p7, %p1205_p6 }
   0xf   : > { %p1218_p9 = pneg %p1217_p8 }
  0x11   : > { %p1225_p13 = pnand %p1224_p12, %p1218_p9 }
  0x13   : > { %1228 = shalt.err (!%p1225_p13)
}
  0x14   : > { %s1300_s28 = smov 64   ;;  %s1301_s29 = smov 4  }
  0x15   : > { %1126 = dma.hbm_to_vmem [thread:$0]  (!%p1391_p5), %s1541_s4, 128, %s322_s21, [#allocation5], %s1300_s28, %s1300_s28, %s1301_s29  }
  0x16   : > { %s1240_s13 = scalar_lea.vmem %s303_s23, 256  ;;  %p1248_p7 = scmp.lt.s32.totalorder %s303_s23, %s303_s23 }
  0x17   : > { %p1241_p0 = scmp.ne.s32.totalorder %s303_s23, %s1240_s13  ;;  %p1249_p8 = scmp.lt.s32.totalorder %s1240_s13, %s1240_s13 }
  0x19   : > { %p1243_p1 = pnand %p1241_p0, %p1205_p6  ;;  %p1250_p10 = por %p1249_p8, %p1248_p7 }
  0x1b   : > { %p1244_p4 = pneg %p1243_p1 }
  0x1d   : > { %p1251_p9 = pnand %p1250_p10, %p1244_p4 }
  0x1f   : > { %1254 = shalt.err (!%p1251_p9)
}
  0x20   : > { %1123 = dma.hbm_to_vmem [thread:$0]  (!%p1391_p5), %s1538_s1, 256, %s303_s23, [#allocation3], %s1300_s28, %s1300_s28, %s1301_s29  }
  0x21   : > { %s1266_s16 = scalar_lea.vmem %s1395_s26, 256  ;;  %p1274_p0 = scmp.lt.s32.totalorder %s1395_s26, %s1395_s26 }
  0x22   : > { %p1267_p11 = scmp.ne.s32.totalorder %s1395_s26, %s1266_s16  ;;  %p1275_p1 = scmp.lt.s32.totalorder %s1266_s16, %s1266_s16 }
  0x24   : > { %p1269_p12 = pnand %p1267_p11, %p1205_p6  ;;  %p1276_p4 = por %p1275_p1, %p1274_p0 }
  0x26   : > { %p1270_p13 = pneg %p1269_p12 }
  0x28   : > { %p1277_p7 = pnand %p1276_p4, %p1270_p13 }
  0x2a   : > { %1280 = shalt.err (!%p1277_p7)
}
  0x2b   : > { %1129 = dma.hbm_to_vmem [thread:$0]  (!%p1391_p5), %s1544_s7, 256, %s1395_s26, [#allocation5], %s1300_s28, %s1300_s28, %s1301_s29  }
  0x2c   : > { %373 = sbr.rel (%p1383_p3) target bundleno = 1161 (0x489), region = 64 }
  0x31   : > { %1286 = dma.done.wait (%p1130_p2), [#allocation3], 256  }
  0x32   : > { %1288 = vsyncadd (%p1130_p2), [#allocation3], 4294967040 }
  0x33   : > { %1290 = dma.done.wait (%p1130_p2), [#allocation5], 384  }
  0x34   : > { %1292 = vsyncadd (%p1130_p2), [#allocation5], 4294966912  ;;  %p421_p6 = scmp.lt.s32.totalorder %s1378_s18, 7  ;;  %v1302_v0 = vmov 0   ;;  %vm459_vm0 = vcmask 1045504   ;;  %vm452_vm1 = vcmask 228352  }
  0x35   : > { %1160 = vset.pattern.permute.xlu1 %v1302_v0  ;;  %1159 = vset.pattern.permute.xlu0 %v1302_v0  ;;  %v1196_v7 = vld [vmem:[#allocation2] sm:$0xff]   ;;  %v542_v9 = vld [vmem:[%s1540_s3 + $0x10] sm:$0xff]  ;;  %v1197_v11 = vld [vmem:[#allocation2 + $0x8] sm:$0xff]   ;;  %v1303_v22 = vmov 0.0   ;;  %vm1304_vm2 = vmmov 0   ;;  %vm581_vm3 = vcmask 261120  }
  0x36   : > { %s1552_s18 = smov (!%p421_p6, %s1378_s18), 7  ;;  %v514_v10 = vld [vmem:[%s1539_s2 + $0x10] sm:$0xff]  ;;  %1069 = vmatprep.mubr.msk.bf16.mxu1 %vm452_vm1, %v1196_v7  ;;  %556 = vperm.xlu1 %1160, %v542_v9   ;;  %v543_v12 = vld [vmem:[%s1540_s3 + $0x18] sm:$0xff]  ;;  %v513_v14 = vld [vmem:[%s1539_s2 + $0x8] sm:$0xff]  ;;  %s1305_s14 = smov 3   ;;  %vm664_vm4 = vcmask 23552  }
  0x37   : > { %s1043_s19 = sshll.u32 %s1552_s18, 5  ;;  %528 = vperm.xlu0 %1159, %v514_v10   ;;  %v515_v13 = vld [vmem:[%s1539_s2 + $0x18] sm:$0xff]  ;;  %v512_v15 = vld [vmem:[%s1539_s2] sm:$0xff]  ;;  %v541_v16 = vld [vmem:[%s1540_s3 + $0x8] sm:$0xff]  ;;  %vm667_vm5 = vcmask 285696   ;;  %s1306_s15 = smov 123  }
  0x38   : > { %s425_s24 = scalar_lea.vmem %s1537_s0, %s1043_s19  ;;  %v540_v17 = vld [vmem:[%s1540_s3] sm:$0xff]  ;;  %v627_v18 = vld [vmem:[%s1542_s5 + $0x8] sm:$0xff]  ;;  %v1198_v49 = vld [vmem:[#allocation4] sm:$0xff]   ;;  %s1307_s16 = smov 122   ;;  %vm729_vm6 = vcmask 916480   ;;  %vm918_vm8 = vcmask 130048  }
  0x39   : > { %v434_v1 = vld [vmem:[%s425_s24 + $0x10] sm:$0xff]  ;;  %v435_v2 = vld [vmem:[%s425_s24 + $0x18] sm:$0xf]  ;;  %v432_v3 = vld [vmem:[%s425_s24] sm:$0xff]  ;;  %s1308_s20 = smov 125   ;;  %s1309_s21 = smov 124  }
  0x3a   : > { %v437_v4 = vpack.c.bf16 %v435_v2, %v434_v1  ;;  %v433_v5 = vld [vmem:[%s425_s24 + $0x8] sm:$0xff]  ;;  %561 = vperm.xlu1 %1160, %v543_v12   ;;  %v626_v19 = vld [vmem:[%s1542_s5] sm:$0xff]  ;;  %s1310_s22 = smov 127   ;;  %s1311_s23 = smov 126   ;;  %v788_v12 = vld [vmem:[%s1545_s8 + $0x18] sm:$0xff] }
  0x3b   : > { %v436_v6 = vpack.c.bf16 %v433_v5, %v432_v3  ;;  %533 = vperm.xlu0 %1159, %v515_v13   ;;  %v641_v20 = vld [vmem:[%s1543_s6 + $0x8] sm:$0xff]  ;;  %v640_v21 = vld [vmem:[%s1543_s6] sm:$0xff]  ;;  %v787_v13 = vld [vmem:[%s1545_s8 + $0x10] sm:$0xff]  ;;  %s430_s30 = scalar_lea.vmem %s1548_s11, %s1043_s19 }
  0x3c   : > { %1107 = vmatprep.subr.msk.bf16.mxu1 %vm459_vm0, %v437_v4  ;;  %v461_v8 = vsel %vm459_vm0, %v437_v4, 0  ;;  %v786_v10 = vld [vmem:[%s1545_s8 + $0x8] sm:$0xff]  ;;  %vm1032_vm7 = vmpackc.low %vm667_vm5, %vm667_vm5 }
  0x3d   : > { %1066 = vmatpush3.bf16.msra.mxu1 %v461_v8 }
  0x3e   : > { %1067 = vmatprep.subr.bf16.mxu1 %v436_v6  ;;  %523 = vperm.xlu1 %1160, %v513_v14   ;;  %v1199_v14 = vld [vmem:[#allocation6] sm:$0xff]  }
  0x3f   : > { %518 = vperm.xlu0 %1159, %v512_v15   ;;  %v814_v15 = vld [vmem:[%s1546_s9 + $0x8] sm:$0xff]  ;;  %1095 = vmatprep.mubr.msk.bf16.mxu0 %vm729_vm6, %v1199_v14 }
  0x41   : > { %1068 = vmatpush3.bf16.msra.mxu1 %v436_v6 }
  0x42   : > { %551 = vperm.xlu1 %1160, %v541_v16   ;;  %1073 = vmatprep.subr.bf16.mxu1 %v1303_v22  ;;  %v813_v16 = vld [vmem:[%s1546_s9] sm:$0xff] }
  0x43   : > { %546 = vperm.xlu0 %1159, %v540_v17   ;;  %v816_v17 = vld [vmem:[%s1546_s9 + $0x18] sm:$0xff] }
  0x44   : > { %1070 = vmatmul.mubr.msk.bf16.vlgmr.msra.gmra.mxu1 %vm452_vm1, %v1197_v11  ;;  %v785_v11 = vld [vmem:[%s1545_s8] sm:$0xff] }
  0x45   : > { %1077 = vmatprep.mubr.msk.bf16.mxu1 %vm1304_vm2, %v1303_v22 }
  0x46   : > { %635 = vperm.xlu1 %1160, %v627_v18   ;;  %v815_v18 = vld [vmem:[%s1546_s9 + $0x10] sm:$0xff] }
  0x47   : > { %630 = vperm.xlu0 %1159, %v626_v19  }
  0x4a   : > { %649 = vperm.xlu1 %1160, %v641_v20  }
  0x4b   : > { %644 = vperm.xlu0 %1159, %v640_v21  }
  0xb1   : > { %v557_v23 = vpop.permute.xlu1 %556 }
  0xb2   : > { %v529_v24 = vpop.permute.xlu0 %528 }
  0xb5   : > { %v562_v25 = vpop.permute.xlu1 %561 }
  0xb6   : > { %v534_v26 = vpop.permute.xlu0 %533 }
  0xb9   : > { %v524_v28 = vpop.permute.xlu1 %523 }
  0xba   : > { %v519_v30 = vpop.permute.xlu0 %518 }
  0xbd   : > { %v552_v39 = vpop.permute.xlu1 %551 }
  0xbe   : > { %v547_v40 = vpop.permute.xlu0 %546 }
  0xc1   : > { %v636_v51 = vpop.permute.xlu1 %635 }
  0xc2   : > { %v631_v50 = vpop.permute.xlu0 %630 }
  0xc5   : > { %v650_v59 = vpop.permute.xlu1 %649 }
  0xc6   : > { %v645_v55 = vpop.permute.xlu0 %644 }
 0x104   : > { %v1071_v27 = vpop.f32.mrf.mxu1 }
 0x105   : > { %v538_v29 = vmul.f32 %v1071_v27, %v529_v24 }
 0x106   : > { %v497_v31 = vpop.f32.mrf.mxu1 }
 0x107   : > { %v566_v33 = vadd.f32 %v557_v23, %v538_v29  ;;  %v536_v34 = vmul.f32 %v519_v30, %v497_v31 }
 0x108   : > { %v1072_v32 = vpop.f32.mrf.mxu1 }
 0x109   : > { %v539_v35 = vmul.f32 %v1072_v32, %v534_v26  ;;  %v570_v41 = vmax.f32 %v566_v33, 0.0  ;;  %v564_v42 = vadd.f32 %v547_v40, %v536_v34 }
 0x10a   : > { %v500_v36 = vpop.f32.mrf.mxu1 }
 0x10b   : > { %v567_v37 = vadd.f32 %v562_v25, %v539_v35  ;;  %v537_v38 = vmul.f32 %v524_v28, %v500_v36  ;;  %v568_v47 = vmax.f32 %v564_v42, 0.0 }
 0x10d   : > { %v571_v43 = vmax.f32 %v567_v37, 0.0  ;;  %v565_v44 = vadd.f32 %v552_v39, %v537_v38 }
 0x10f   : > { %v575_v45 = vpack.c.bf16 %v571_v43, %v570_v41  ;;  %v569_v46 = vmax.f32 %v565_v44, 0.0  ;;  %v1200_v43 = vld [vmem:[#allocation6 + $0x8] sm:$0xff]   ;;  %v1201_v44 = vld [vmem:[%s1547_s10 + $0x8] sm:$0xff]  }
 0x111   : > { %1074 = vmatpush3.bf16.msra.mxu1 %v575_v45  ;;  %v574_v48 = vpack.c.bf16 %v569_v46, %v568_v47  ;;  %v1202_v45 = vld [vmem:[%s1547_s10] sm:$0xff]  }
 0x112   : > { %1075 = vmatprep.subr.bf16.mxu1 %v1303_v22 }
 0x115   : > { %1076 = vmatpush3.bf16.msra.mxu1 %v574_v48 }
 0x116   : > { %1099 = vmatprep.subr.bf16.mxu1 %v1201_v44 }
 0x118   : > { %1078 = vmatmul.mubr.msk.bf16.vlgmr.msra.gmra.mxu1 %vm581_vm3, %v1198_v49 }
 0x119   : > { %1100 = vmatpush3.bf16.msra.mxu1 %v1201_v44 }
 0x11a   : > { %1101 = vmatprep.subr.bf16.mxu1 %v1202_v45 }
 0x11d   : > { %1102 = vmatpush3.bf16.msra.mxu1 %v1202_v45 }
 0x1d8   : > { %v619_v52 = vpop.f32.mrf.mxu1 }
 0x1d9   : > { %v638_v53 = vmul.f32 %v631_v50, %v619_v52 }
 0x1da   : > { %v1079_v54 = vpop.f32.mrf.mxu1 }
 0x1db   : > { %v652_v57 = vadd.f32 %v645_v55, %v638_v53 }
 0x1dc   : > { %v622_v56 = vpop.f32.mrf.mxu1 }
 0x1dd   : > { %v639_v58 = vmul.f32 %v636_v51, %v622_v56  ;;  %v654_v62 = vmax.f32 %v652_v57, 0.0 }
 0x1de   : > { %v1080_v60 = vpop.f32.mrf.mxu1 }
 0x1df   : > { %v653_v61 = vadd.f32 %v650_v59, %v639_v58 }
 0x1e1   : > { %v655_v63 = vmax.f32 %v653_v61, 0.0 }
 0x1e3   : > { %v1161_v0 = vpack.i.bf16 %v655_v63, %v654_v62 }
 0x1e5   : > { %1162 = vrot.lane.b32.xlu0 %v1161_v0, %s1305_s14 }
 0x257   : > { %v1163_v1 = vpop.permute.xlu0 %1162 }
 0x258   : > { %v1165_v2 = vunpack.i.h.bf16 %v1163_v1  ;;  %v1164_v3 = vunpack.i.l.bf16 %v1163_v1 }
 0x25a   : > { %v666_v4 = vsel %vm664_vm4, 0.0, %v1165_v2  ;;  %v665_v5 = vsel %vm664_vm4, 0.0, %v1164_v3 }
 0x25b   : > { %v669_v6 = vsel %vm667_vm5, %v666_v4, 0.0  ;;  %v668_v7 = vsel %vm667_vm5, %v665_v5, 0.0  ;;  %v1489_v8 = vpack.c.bf16 %v666_v4, %v665_v5 }
 0x25c   : > { %v1171_v9 = vpack.i.bf16 %v669_v6, %v668_v7 }
 0x25e   : > { %1172 = vrot.lane.b32.xlu0 %v1171_v9, %s1306_s15  ;;  %1167 = vrot.lane.b32.xlu1 %v1171_v9, %s1307_s16 }
 0x262   : > { %1182 = vrot.lane.b32.xlu0 %v1171_v9, %s1308_s20  ;;  %1177 = vrot.lane.b32.xlu1 %v1171_v9, %s1309_s21 }
 0x266   : > { %1192 = vrot.lane.b32.xlu0 %v1171_v9, %s1310_s22  ;;  %1187 = vrot.lane.b32.xlu1 %v1171_v9, %s1311_s23 }
 0x26a   : > { %796 = vperm.xlu0 %1159, %v786_v10   ;;  %791 = vperm.xlu1 %1160, %v785_v11  }
 0x26e   : > { %806 = vperm.xlu0 %1159, %v788_v12   ;;  %801 = vperm.xlu1 %1160, %v787_v13  }
 0x272   : > { %824 = vperm.xlu0 %1159, %v814_v15   ;;  %819 = vperm.xlu1 %1160, %v813_v16  }
 0x276   : > { %834 = vperm.xlu0 %1159, %v816_v17   ;;  %829 = vperm.xlu1 %1160, %v815_v18  }
 0x2d0   : > { %v1173_v19 = vpop.permute.xlu0 %1172  ;;  %v1168_v20 = vpop.permute.xlu1 %1167 }
 0x2d1   : > { %v1175_v21 = vunpack.i.h.bf16 %v1173_v19  ;;  %v1174_v22 = vunpack.i.l.bf16 %v1173_v19  ;;  %v1170_v23 = vunpack.i.h.bf16 %v1168_v20  ;;  %v1169_v24 = vunpack.i.l.bf16 %v1168_v20 }
 0x2d3   : > { %v718_v25 = vpack.c.bf16 %v1170_v23, %v1169_v24  ;;  %v717_v27 = vpack.c.bf16 %v1175_v21, %v1174_v22 }
 0x2d4   : > { %v1178_v26 = vpop.permute.xlu1 %1177  ;;  %v1183_v30 = vpop.permute.xlu0 %1182 }
 0x2d5   : > { %v1180_v28 = vunpack.i.h.bf16 %v1178_v26  ;;  %v1179_v29 = vunpack.i.l.bf16 %v1178_v26  ;;  %1081 = vmatprep.subr.bf16.mxu0 %v718_v25  ;;  %v1185_v31 = vunpack.i.h.bf16 %v1183_v30  ;;  %v1184_v32 = vunpack.i.l.bf16 %v1183_v30 }
 0x2d6   : > { %1082 = vmatpush3.bf16.msra.mxu0 %v718_v25 }
 0x2d7   : > { %1083 = vmatprep.subr.bf16.mxu0 %v717_v27  ;;  %v716_v33 = vpack.c.bf16 %v1180_v28, %v1179_v29  ;;  %v715_v35 = vpack.c.bf16 %v1185_v31, %v1184_v32 }
 0x2d8   : > { %v1188_v34 = vpop.permute.xlu1 %1187  ;;  %v1193_v38 = vpop.permute.xlu0 %1192 }
 0x2d9   : > { %v1190_v36 = vunpack.i.h.bf16 %v1188_v34  ;;  %v1189_v37 = vunpack.i.l.bf16 %v1188_v34  ;;  %v1195_v39 = vunpack.i.h.bf16 %v1193_v38  ;;  %v1194_v40 = vunpack.i.l.bf16 %v1193_v38 }
 0x2da   : > { %1084 = vmatpush3.bf16.msra.mxu0 %v717_v27 }
 0x2db   : > { %1085 = vmatprep.subr.bf16.mxu0 %v716_v33  ;;  %v714_v41 = vpack.c.bf16 %v1190_v36, %v1189_v37  ;;  %v713_v42 = vpack.c.bf16 %v1195_v39, %v1194_v40 }
 0x2de   : > { %1086 = vmatpush3.bf16.msra.mxu0 %v716_v33 }
 0x2df   : > { %1087 = vmatprep.subr.bf16.mxu0 %v715_v35 }
 0x2e2   : > { %1088 = vmatpush3.bf16.msra.mxu0 %v715_v35 }
 0x2e3   : > { %1089 = vmatprep.subr.bf16.mxu0 %v714_v41 }
 0x2e5   : > { %v797_v46 = vpop.permute.xlu0 %796  ;;  %v792_v47 = vpop.permute.xlu1 %791 }
 0x2e6   : > { %1090 = vmatpush3.bf16.msra.mxu0 %v714_v41 }
 0x2e7   : > { %1091 = vmatprep.subr.bf16.mxu0 %v713_v42 }
 0x2e9   : > { %v807_v48 = vpop.permute.xlu0 %806  ;;  %v802_v49 = vpop.permute.xlu1 %801 }
 0x2ea   : > { %1092 = vmatpush3.bf16.msra.mxu0 %v713_v42 }
 0x2eb   : > { %1093 = vmatprep.subr.msk.bf16.mxu0 %vm1032_vm7, %v1489_v8 }
 0x2ed   : > { %v825_v50 = vpop.permute.xlu0 %824  ;;  %v820_v52 = vpop.permute.xlu1 %819 }
 0x2ee   : > { %1094 = vmatpush3.bf16.msk.msra.mxu0 %vm1032_vm7, %v1489_v8 }
 0x2f1   : > { %1096 = vmatmul.mubr.msk.bf16.vlgmr.msra.gmra.mxu0 %vm729_vm6, %v1200_v43  ;;  %v835_v58 = vpop.permute.xlu0 %834  ;;  %v830_v60 = vpop.permute.xlu1 %829 }
 0x3b1   : > { %v1097_v51 = vpop.f32.mrf.mxu0 }
 0x3b2   : > { %v811_v55 = vmul.f32 %v1097_v51, %v802_v49 }
 0x3b3   : > { %v770_v53 = vpop.f32.mrf.mxu0 }
 0x3b4   : > { %v809_v54 = vmul.f32 %v792_v47, %v770_v53  ;;  %v839_v0 = vadd.f32 %v830_v60, %v811_v55 }
 0x3b5   : > { %v1098_v56 = vpop.f32.mrf.mxu0 }
 0x3b6   : > { %v812_v57 = vmul.f32 %v1098_v56, %v807_v48  ;;  %v837_v61 = vadd.f32 %v820_v52, %v809_v54  ;;  %v843_v5 = vmax.f32 %v839_v0, 0.0 }
 0x3b7   : > { %v773_v59 = vpop.f32.mrf.mxu0 }
 0x3b8   : > { %v840_v62 = vadd.f32 %v835_v58, %v812_v57  ;;  %v810_v63 = vmul.f32 %v797_v46, %v773_v59  ;;  %v841_v3 = vmax.f32 %v837_v61, 0.0 }
 0x3ba   : > { %v838_v1 = vadd.f32 %v825_v50, %v810_v63  ;;  %v844_v2 = vmax.f32 %v840_v62, 0.0 }
 0x3bc   : > { %v842_v4 = vmax.f32 %v838_v1, 0.0  ;;  %v846_v7 = vpack.c.bf16 %v844_v2, %v843_v5 }
 0x3be   : > { %v845_v6 = vpack.c.bf16 %v842_v4, %v841_v3 }
 0x3c0   : > { %1103 = vmatprep.mubr.msk.bf16.mxu1 %vm581_vm3, %v845_v6 }
 0x3c1   : > { %1104 = vmatmul.mubr.msk.bf16.vlgmr.msra.gmra.mxu1 %vm581_vm3, %v846_v7 }
 0x481   : > { %v1105_v8 = vpop.f32.mrf.mxu1 }
 0x482   : > { %921 = vst.msk [vmem:[%s430_s30 + $0x10] sm:$0xff] %vm918_vm8, %v1105_v8 }
 0x483   : > { %v903_v9 = vpop.f32.mrf.mxu1 }
 0x484   : > { %919 = vst.msk [vmem:[%s430_s30] sm:$0xff] %vm918_vm8, %v903_v9 }
 0x485   : > { %v1106_v10 = vpop.f32.mrf.mxu1 }
 0x486   : > { %922 = vst.msk [vmem:[%s430_s30 + $0x18] sm:$0xff] %vm918_vm8, %v1106_v10 }
 0x487   : > { %v906_v11 = vpop.f32.mrf.mxu1 }
 0x488   : > { %920 = vst.msk [vmem:[%s430_s30 + $0x8] sm:$0xff] %vm918_vm8, %v906_v11 }
 0x489 PF: > { %s23_s17 = sadd.s32 1, %s1295_s17  }
 0x48a   : > { %p20_p2 = scmp.ge.s32.totalorder %s23_s17, 10  }
 0x48c   :  { %22 = sbr.rel (!%p20_p2) target bundleno = 2 (0x2), region = 107 }
 0x491   :  { %944 = vsyncpa [#allocation3], 1 }
 0x492   :  { %946 = vsyncpa [#allocation3 + $0x1], 1 }
 0x493   :  { %947 = vsyncpa [#allocation5], 1 }

// kernel: forward.3
= control target key start
LH: loop header
LB: loop body
LE: loop exit
PB: predicated region body
PF: predicated region fallthrough
CT: control target
= control target key end

     0   :  { %s8653_s0 = inlined_call_operand.vmem [shape: f32[8,512], index: 0, kind: input, shape index: {}]   ;;  %s8654_s1 = inlined_call_operand.vmem [shape: bf16[512,512], index: 1, kind: input, shape index: {}]   ;;  %s8655_s2 = inlined_call_operand.vmem [shape: f32[1,512], index: 2, kind: input, shape index: {}]   ;;  %s8656_s3 = inlined_call_operand.vmem [shape: bf16[512,512], index: 3, kind: input, shape index: {}]   ;;  %s8657_s4 = inlined_call_operand.vmem [shape: f32[1,512], index: 4, kind: input, shape index: {}]   ;;  %s8658_s5 = inlined_call_operand.vmem [shape: bf16[512,64], index: 5, kind: input, shape index: {}]   ;;  %s8659_s6 = inlined_call_operand.vmem [shape: f32[1,64], index: 6, kind: input, shape index: {}]   ;;  %s8660_s7 = inlined_call_operand.vmem [shape: f32[1,64], index: 7, kind: input, shape index: {}]   ;;  %s8661_s8 = inlined_call_operand.vmem [shape: f32[1,64], index: 8, kind: input, shape index: {}]   ;;  %s8662_s9 = inlined_call_operand.vmem [shape: bf16[64,32], index: 9, kind: input, shape index: {}]   ;;  %s8663_s10 = inlined_call_operand.vmem [shape: f32[1,32], index: 10, kind: input, shape index: {}]   ;;  %s8664_s11 = inlined_call_operand.vmem [shape: f32[1,32], index: 11, kind: input, shape index: {}]   ;;  %s8665_s12 = inlined_call_operand.vmem [shape: f32[1,32], index: 12, kind: input, shape index: {}]   ;;  %s8666_s13 = inlined_call_operand.vmem [shape: bf16[32,256], index: 13, kind: input, shape index: {}]   ;;  %s8667_s14 = inlined_call_operand.vmem [shape: f32[1,256], index: 14, kind: input, shape index: {}]   ;;  %s8668_s15 = inlined_call_operand.vmem [shape: f32[1,256], index: 15, kind: input, shape index: {}]   ;;  %s8669_s16 = inlined_call_operand.vmem [shape: f32[1,256], index: 16, kind: input, shape index: {}]   ;;  %s8670_s17 = inlined_call_operand.vmem [shape: bf16[256,512], index: 17, kind: input, shape index: {}]   ;;  %s8671_s18 = inlined_call_operand.vmem [shape: f32[1,512], index: 18, kind: input, shape index: {}]   ;;  %s8672_s19 = inlined_call_operand.vmem [shape: f32[1,512], index: 19, kind: input, shape index: {}]   ;;  %s8673_s20 = inlined_call_operand.vmem [shape: f32[1,512], index: 20, kind: input, shape index: {}]   ;;  %s8674_s21 = inlined_call_operand.vmem [shape: bf16[512,784], index: 21, kind: input, shape index: {}]   ;;  %s8675_s22 = inlined_call_operand.vmem [shape: f32[1,784], index: 22, kind: input, shape index: {}]   ;;  %s8676_s23 = inlined_call_operand.vmem [shape: f32[8,784], index: 23, kind: output, shape index: {0}]   ;;  %s8677_s24 = inlined_call_operand.hbm [shape: f32[8,32], index: 24, kind: output, shape index: {1}]  }
   0x1   :  { %8682 = sst [smem:[#allocation5_spill]] %s8653_s0 }
   0x2   :  { %8683 = sst [smem:[#allocation6_spill]] %s8654_s1 }
   0x3   :  { %8684 = sst [smem:[#allocation7_spill]] %s8655_s2 }
   0x4   :  { %8685 = sst [smem:[#allocation8_spill]] %s8656_s3 }
   0x5   :  { %8686 = sst [smem:[#allocation9_spill]] %s8657_s4 }
   0x6   :  { %8687 = sst [smem:[#allocation10_spill]] %s8658_s5 }
   0x7   :  { %8688 = sst [smem:[#allocation11_spill]] %s8659_s6 }
   0x8   :  { %8689 = sst [smem:[#allocation12_spill]] %s8660_s7 }
   0x9   :  { %8690 = sst [smem:[#allocation13_spill]] %s8661_s8 }
   0xa   :  { %s8691_s27 = sld [smem:[#allocation6_spill]] }
   0xb   :  { %s8692_s25 = sld [smem:[#allocation5_spill]] }
   0xc   :  { %s8693_s5 = sld [smem:[#allocation8_spill]] }
   0xd   :  { %s8694_s6 = sld [smem:[#allocation7_spill]] }
  0x10   :  { %v5677_v0 = vld [vmem:[%s8691_s27 + $0xe4] ss:$16 sps:$4 sm:$0xff]   ;;  %v5681_v2 = vld [vmem:[%s8691_s27 + $0xe0] ss:$16 sps:$4 sm:$0xff]  }
  0x11   :  { %v5679_v1 = vld [vmem:[%s8691_s27 + $0x2e4] ss:$16 sps:$4 sm:$0xff]   ;;  %876 = vmatprep.subr.bf16.mxu0 %v5677_v0  ;;  %v5682_v3 = vld [vmem:[%s8691_s27 + $0x2e0] ss:$16 sps:$4 sm:$0xff]   ;;  %v79_v46 = vld [vmem:[%s8692_s25 + $0x8] sm:$0xff] }
  0x12   :  { %917 = vmatprep.subr.bf16.mxu1 %v5679_v1  ;;  %v5683_v4 = vld [vmem:[%s8691_s27 + $0xc4] ss:$16 sps:$4 sm:$0xff]   ;;  %877 = vmatpush1.bf16.msra.mxu0 %v5681_v2  ;;  %v5687_v6 = vld [vmem:[%s8691_s27 + $0xc0] ss:$16 sps:$4 sm:$0xff]   ;;  %v6849_v49 = vpack.c.bf16 %v79_v46, %v79_v46  ;;  %v81_v50 = vld [vmem:[%s8692_s25 + $0x18] sm:$0xff] }
  0x13   :  { %918 = vmatpush1.bf16.msra.mxu1 %v5682_v3  ;;  %v5685_v5 = vld [vmem:[%s8691_s27 + $0x2c4] ss:$16 sps:$4 sm:$0xff]   ;;  %878 = vmatprep.subr.bf16.mxu0 %v5683_v4  ;;  %v5688_v7 = vld [vmem:[%s8691_s27 + $0x2c0] ss:$16 sps:$4 sm:$0xff]   ;;  %v85_v52 = vpack.c.bf16 %v81_v50, %v81_v50  ;;  %v5827_v46 = vld [vmem:[%s8691_s27 + $0x1c8] ss:$16 sps:$4 sm:$0xff]  }
  0x14   :  { %919 = vmatprep.subr.bf16.mxu1 %v5685_v5  ;;  %v5689_v8 = vld [vmem:[%s8691_s27 + $0xa4] ss:$16 sps:$4 sm:$0xff]   ;;  %v5693_v10 = vld [vmem:[%s8691_s27 + $0xa0] ss:$16 sps:$4 sm:$0xff]   ;;  %908 = vmatprep.mubr.bf16.mxu0 %v6849_v49  ;;  %v5833_v50 = vld [vmem:[%s8691_s27 + $0x1a8] ss:$16 sps:$4 sm:$0xff]  }
  0x15   :  { %v5691_v9 = vld [vmem:[%s8691_s27 + $0x2a4] ss:$16 sps:$4 sm:$0xff]   ;;  %v5694_v11 = vld [vmem:[%s8691_s27 + $0x2a0] ss:$16 sps:$4 sm:$0xff]   ;;  %949 = vmatprep.mubr.bf16.mxu1 %v85_v52 }
  0x16   :  { %879 = vmatpush1.bf16.msra.mxu0 %v5687_v6  ;;  %v5695_v12 = vld [vmem:[%s8691_s27 + $0x84] ss:$16 sps:$4 sm:$0xff]   ;;  %v5699_v14 = vld [vmem:[%s8691_s27 + $0x80] ss:$16 sps:$4 sm:$0xff]   ;;  %v5775_v6 = vld [vmem:[%s8691_s27 + $0xec] ss:$16 sps:$4 sm:$0xff]  }
  0x17   :  { %920 = vmatpush1.bf16.msra.mxu1 %v5688_v7  ;;  %880 = vmatprep.subr.bf16.mxu0 %v5689_v8  ;;  %v5697_v13 = vld [vmem:[%s8691_s27 + $0x284] ss:$16 sps:$4 sm:$0xff]   ;;  %v5700_v15 = vld [vmem:[%s8691_s27 + $0x280] ss:$16 sps:$4 sm:$0xff]   ;;  %v5778_v7 = vld [vmem:[%s8691_s27 + $0x2ec] ss:$16 sps:$4 sm:$0xff]  }
  0x18   :  { %921 = vmatprep.subr.bf16.mxu1 %v5691_v9  ;;  %v5701_v16 = vld [vmem:[%s8691_s27 + $0x64] ss:$16 sps:$4 sm:$0xff]   ;;  %v5705_v18 = vld [vmem:[%s8691_s27 + $0x60] ss:$16 sps:$4 sm:$0xff]  }
  0x19   :  { %v5703_v17 = vld [vmem:[%s8691_s27 + $0x264] ss:$16 sps:$4 sm:$0xff]   ;;  %v5706_v19 = vld [vmem:[%s8691_s27 + $0x260] ss:$16 sps:$4 sm:$0xff]  }
  0x1a   :  { %881 = vmatpush1.bf16.msra.mxu0 %v5693_v10  ;;  %v5707_v20 = vld [vmem:[%s8691_s27 + $0x44] ss:$16 sps:$4 sm:$0xff]   ;;  %v5711_v22 = vld [vmem:[%s8691_s27 + $0x40] ss:$16 sps:$4 sm:$0xff]   ;;  %v5773_v10 = vld [vmem:[%s8691_s27 + $0xe8] ss:$16 sps:$4 sm:$0xff]  }
  0x1b   :  { %922 = vmatpush1.bf16.msra.mxu1 %v5694_v11  ;;  %882 = vmatprep.subr.bf16.mxu0 %v5695_v12  ;;  %v5709_v21 = vld [vmem:[%s8691_s27 + $0x244] ss:$16 sps:$4 sm:$0xff]   ;;  %v5712_v23 = vld [vmem:[%s8691_s27 + $0x240] ss:$16 sps:$4 sm:$0xff]   ;;  %v5776_v11 = vld [vmem:[%s8691_s27 + $0x2e8] ss:$16 sps:$4 sm:$0xff]  }
  0x1c   :  { %923 = vmatprep.subr.bf16.mxu1 %v5697_v13  ;;  %v5713_v24 = vld [vmem:[%s8691_s27 + $0x24] ss:$16 sps:$4 sm:$0xff]   ;;  %v5717_v26 = vld [vmem:[%s8691_s27 + $0x20] ss:$16 sps:$4 sm:$0xff]   ;;  %v5781_v12 = vld [vmem:[%s8691_s27 + $0xcc] ss:$16 sps:$4 sm:$0xff]  }
  0x1d   :  { %v5715_v25 = vld [vmem:[%s8691_s27 + $0x224] ss:$16 sps:$4 sm:$0xff]   ;;  %v5718_v27 = vld [vmem:[%s8691_s27 + $0x220] ss:$16 sps:$4 sm:$0xff]   ;;  %v5784_v13 = vld [vmem:[%s8691_s27 + $0x2cc] ss:$16 sps:$4 sm:$0xff]  }
  0x1e   :  { %883 = vmatpush1.bf16.msra.mxu0 %v5699_v14  ;;  %v5719_v28 = vld [vmem:[%s8691_s27 + $0x4] ss:$16 sps:$4 sm:$0xff]   ;;  %v5723_v30 = vld [vmem:[%s8691_s27] ss:$16 sps:$4 sm:$0xff]   ;;  %v5779_v14 = vld [vmem:[%s8691_s27 + $0xc8] ss:$16 sps:$4 sm:$0xff]  }
  0x1f   :  { %924 = vmatpush1.bf16.msra.mxu1 %v5700_v15  ;;  %884 = vmatprep.subr.bf16.mxu0 %v5701_v16  ;;  %v5721_v29 = vld [vmem:[%s8691_s27 + $0x204] ss:$16 sps:$4 sm:$0xff]   ;;  %v5724_v31 = vld [vmem:[%s8691_s27 + $0x200] ss:$16 sps:$4 sm:$0xff]   ;;  %v5782_v15 = vld [vmem:[%s8691_s27 + $0x2c8] ss:$16 sps:$4 sm:$0xff]  }
  0x20   :  { %925 = vmatprep.subr.bf16.mxu1 %v5703_v17  ;;  %v5725_v32 = vld [vmem:[%s8691_s27 + $0x1e4] ss:$16 sps:$4 sm:$0xff]   ;;  %v5729_v34 = vld [vmem:[%s8691_s27 + $0x1e0] ss:$16 sps:$4 sm:$0xff]   ;;  %v5787_v16 = vld [vmem:[%s8691_s27 + $0xac] ss:$16 sps:$4 sm:$0xff]  }
  0x21   :  { %v5727_v33 = vld [vmem:[%s8691_s27 + $0x3e4] ss:$16 sps:$4 sm:$0xff]   ;;  %v5730_v35 = vld [vmem:[%s8691_s27 + $0x3e0] ss:$16 sps:$4 sm:$0xff]   ;;  %v5790_v17 = vld [vmem:[%s8691_s27 + $0x2ac] ss:$16 sps:$4 sm:$0xff]  }
  0x22   :  { %885 = vmatpush1.bf16.msra.mxu0 %v5705_v18  ;;  %v5731_v36 = vld [vmem:[%s8691_s27 + $0x1c4] ss:$16 sps:$4 sm:$0xff]   ;;  %v5735_v38 = vld [vmem:[%s8691_s27 + $0x1c0] ss:$16 sps:$4 sm:$0xff]   ;;  %v5785_v18 = vld [vmem:[%s8691_s27 + $0xa8] ss:$16 sps:$4 sm:$0xff]  }
  0x23   :  { %926 = vmatpush1.bf16.msra.mxu1 %v5706_v19  ;;  %886 = vmatprep.subr.bf16.mxu0 %v5707_v20  ;;  %v5733_v37 = vld [vmem:[%s8691_s27 + $0x3c4] ss:$16 sps:$4 sm:$0xff]   ;;  %v5736_v39 = vld [vmem:[%s8691_s27 + $0x3c0] ss:$16 sps:$4 sm:$0xff]   ;;  %v5788_v19 = vld [vmem:[%s8691_s27 + $0x2a8] ss:$16 sps:$4 sm:$0xff]  }
  0x24   :  { %927 = vmatprep.subr.bf16.mxu1 %v5709_v21  ;;  %v5737_v40 = vld [vmem:[%s8691_s27 + $0x1a4] ss:$16 sps:$4 sm:$0xff]   ;;  %v5741_v42 = vld [vmem:[%s8691_s27 + $0x1a0] ss:$16 sps:$4 sm:$0xff]   ;;  %v5793_v20 = vld [vmem:[%s8691_s27 + $0x8c] ss:$16 sps:$4 sm:$0xff]  }
  0x25   :  { %v5739_v41 = vld [vmem:[%s8691_s27 + $0x3a4] ss:$16 sps:$4 sm:$0xff]   ;;  %v5742_v43 = vld [vmem:[%s8691_s27 + $0x3a0] ss:$16 sps:$4 sm:$0xff]   ;;  %v5796_v21 = vld [vmem:[%s8691_s27 + $0x28c] ss:$16 sps:$4 sm:$0xff]  }
  0x26   :  { %887 = vmatpush1.bf16.msra.mxu0 %v5711_v22  ;;  %v5743_v44 = vld [vmem:[%s8691_s27 + $0x184] ss:$16 sps:$4 sm:$0xff]   ;;  %v5747_v47 = vld [vmem:[%s8691_s27 + $0x180] ss:$16 sps:$4 sm:$0xff]   ;;  %v5791_v22 = vld [vmem:[%s8691_s27 + $0x88] ss:$16 sps:$4 sm:$0xff]  }
  0x27   :  { %928 = vmatpush1.bf16.msra.mxu1 %v5712_v23  ;;  %888 = vmatprep.subr.bf16.mxu0 %v5713_v24  ;;  %v5745_v45 = vld [vmem:[%s8691_s27 + $0x384] ss:$16 sps:$4 sm:$0xff]   ;;  %v5748_v48 = vld [vmem:[%s8691_s27 + $0x380] ss:$16 sps:$4 sm:$0xff]   ;;  %v5794_v23 = vld [vmem:[%s8691_s27 + $0x288] ss:$16 sps:$4 sm:$0xff]  }
  0x28   :  { %929 = vmatprep.subr.bf16.mxu1 %v5715_v25  ;;  %v5749_v51 = vld [vmem:[%s8691_s27 + $0x164] ss:$16 sps:$4 sm:$0xff]   ;;  %v5753_v54 = vld [vmem:[%s8691_s27 + $0x160] ss:$16 sps:$4 sm:$0xff]   ;;  %v5799_v24 = vld [vmem:[%s8691_s27 + $0x6c] ss:$16 sps:$4 sm:$0xff]  }
  0x29   :  { %v5751_v53 = vld [vmem:[%s8691_s27 + $0x364] ss:$16 sps:$4 sm:$0xff]   ;;  %v5754_v55 = vld [vmem:[%s8691_s27 + $0x360] ss:$16 sps:$4 sm:$0xff]   ;;  %v5802_v25 = vld [vmem:[%s8691_s27 + $0x26c] ss:$16 sps:$4 sm:$0xff]  }
  0x2a   :  { %889 = vmatpush1.bf16.msra.mxu0 %v5717_v26  ;;  %v5755_v56 = vld [vmem:[%s8691_s27 + $0x144] ss:$16 sps:$4 sm:$0xff]   ;;  %v5759_v58 = vld [vmem:[%s8691_s27 + $0x140] ss:$16 sps:$4 sm:$0xff]   ;;  %v5797_v26 = vld [vmem:[%s8691_s27 + $0x68] ss:$16 sps:$4 sm:$0xff]  }
  0x2b   :  { %930 = vmatpush1.bf16.msra.mxu1 %v5718_v27  ;;  %890 = vmatprep.subr.bf16.mxu0 %v5719_v28  ;;  %v5757_v57 = vld [vmem:[%s8691_s27 + $0x344] ss:$16 sps:$4 sm:$0xff]   ;;  %v5760_v59 = vld [vmem:[%s8691_s27 + $0x340] ss:$16 sps:$4 sm:$0xff]   ;;  %v5800_v27 = vld [vmem:[%s8691_s27 + $0x268] ss:$16 sps:$4 sm:$0xff]  }
  0x2c   :  { %931 = vmatprep.subr.bf16.mxu1 %v5721_v29  ;;  %v5761_v60 = vld [vmem:[%s8691_s27 + $0x124] ss:$16 sps:$4 sm:$0xff]   ;;  %v5765_v62 = vld [vmem:[%s8691_s27 + $0x120] ss:$16 sps:$4 sm:$0xff]   ;;  %v5805_v28 = vld [vmem:[%s8691_s27 + $0x4c] ss:$16 sps:$4 sm:$0xff]  }
  0x2d   :  { %v5763_v61 = vld [vmem:[%s8691_s27 + $0x324] ss:$16 sps:$4 sm:$0xff]   ;;  %v5766_v63 = vld [vmem:[%s8691_s27 + $0x320] ss:$16 sps:$4 sm:$0xff]   ;;  %v5808_v29 = vld [vmem:[%s8691_s27 + $0x24c] ss:$16 sps:$4 sm:$0xff]  }
  0x2e   :  { %891 = vmatpush1.bf16.msra.mxu0 %v5723_v30  ;;  %v5767_v0 = vld [vmem:[%s8691_s27 + $0x104] ss:$16 sps:$4 sm:$0xff]   ;;  %v5771_v2 = vld [vmem:[%s8691_s27 + $0x100] ss:$16 sps:$4 sm:$0xff]   ;;  %v5803_v30 = vld [vmem:[%s8691_s27 + $0x48] ss:$16 sps:$4 sm:$0xff]  }
  0x2f   :  { %932 = vmatpush1.bf16.msra.mxu1 %v5724_v31  ;;  %892 = vmatprep.subr.bf16.mxu0 %v5725_v32  ;;  %v5769_v1 = vld [vmem:[%s8691_s27 + $0x304] ss:$16 sps:$4 sm:$0xff]   ;;  %v5772_v3 = vld [vmem:[%s8691_s27 + $0x300] ss:$16 sps:$4 sm:$0xff]   ;;  %v5806_v31 = vld [vmem:[%s8691_s27 + $0x248] ss:$16 sps:$4 sm:$0xff]  }
  0x30   :  { %933 = vmatprep.subr.bf16.mxu1 %v5727_v33  ;;  %v78_v4 = vld [vmem:[%s8692_s25] sm:$0xff]  ;;  %v80_v5 = vld [vmem:[%s8692_s25 + $0x10] sm:$0xff]  ;;  %v5811_v32 = vld [vmem:[%s8691_s27 + $0x2c] ss:$16 sps:$4 sm:$0xff]  }
  0x31   :  { %v6915_v8 = vpack.c.bf16 %v78_v4, %v78_v4  ;;  %v6917_v9 = vpack.c.bf16 %v80_v5, %v80_v5  ;;  %v5814_v33 = vld [vmem:[%s8691_s27 + $0x22c] ss:$16 sps:$4 sm:$0xff]  }
  0x32   :  { %893 = vmatpush2.bf16.msra.mxu0 %v5729_v34  ;;  %v5809_v34 = vld [vmem:[%s8691_s27 + $0x28] ss:$16 sps:$4 sm:$0xff]   ;;  %v5865_v4 = vld [vmem:[%s8691_s27 + $0x10c] ss:$16 sps:$4 sm:$0xff]  }
  0x33   :  { %934 = vmatpush2.bf16.msra.mxu1 %v5730_v35  ;;  %894 = vmatprep.subr.bf16.mxu0 %v5731_v36  ;;  %v5812_v35 = vld [vmem:[%s8691_s27 + $0x228] ss:$16 sps:$4 sm:$0xff]   ;;  %v5817_v36 = vld [vmem:[%s8691_s27 + $0xc] ss:$16 sps:$4 sm:$0xff]  }
  0x34   :  { %935 = vmatprep.subr.bf16.mxu1 %v5733_v37  ;;  %v5820_v37 = vld [vmem:[%s8691_s27 + $0x20c] ss:$16 sps:$4 sm:$0xff]  }
  0x35   :  { %v5868_v5 = vld [vmem:[%s8691_s27 + $0x30c] ss:$16 sps:$4 sm:$0xff]  }
  0x36   :  { %895 = vmatpush2.bf16.msra.mxu0 %v5735_v38  ;;  %v5815_v38 = vld [vmem:[%s8691_s27 + $0x8] ss:$16 sps:$4 sm:$0xff]  }
  0x37   :  { %936 = vmatpush2.bf16.msra.mxu1 %v5736_v39  ;;  %896 = vmatprep.subr.bf16.mxu0 %v5737_v40  ;;  %v5818_v39 = vld [vmem:[%s8691_s27 + $0x208] ss:$16 sps:$4 sm:$0xff]   ;;  %v5823_v40 = vld [vmem:[%s8691_s27 + $0x1ec] ss:$16 sps:$4 sm:$0xff]  }
  0x38   :  { %937 = vmatprep.subr.bf16.mxu1 %v5739_v41  ;;  %v5826_v41 = vld [vmem:[%s8691_s27 + $0x3ec] ss:$16 sps:$4 sm:$0xff]  }
  0x3a   :  { %897 = vmatpush2.bf16.msra.mxu0 %v5741_v42  ;;  %v5821_v42 = vld [vmem:[%s8691_s27 + $0x1e8] ss:$16 sps:$4 sm:$0xff]  }
  0x3b   :  { %938 = vmatpush2.bf16.msra.mxu1 %v5742_v43  ;;  %898 = vmatprep.subr.bf16.mxu0 %v5743_v44  ;;  %v5824_v43 = vld [vmem:[%s8691_s27 + $0x3e8] ss:$16 sps:$4 sm:$0xff]   ;;  %v5829_v44 = vld [vmem:[%s8691_s27 + $0x1cc] ss:$16 sps:$4 sm:$0xff]  }
  0x3c   :  { %939 = vmatprep.subr.bf16.mxu1 %v5745_v45  ;;  %v5832_v45 = vld [vmem:[%s8691_s27 + $0x3cc] ss:$16 sps:$4 sm:$0xff]  }
  0x3e   :  { %899 = vmatpush2.bf16.msra.mxu0 %v5747_v47  ;;  %v5830_v47 = vld [vmem:[%s8691_s27 + $0x3c8] ss:$16 sps:$4 sm:$0xff]  }
  0x3f   :  { %940 = vmatpush2.bf16.msra.mxu1 %v5748_v48  ;;  %900 = vmatprep.subr.bf16.mxu0 %v5749_v51  ;;  %v5835_v48 = vld [vmem:[%s8691_s27 + $0x1ac] ss:$16 sps:$4 sm:$0xff]   ;;  %v5836_v51 = vld [vmem:[%s8691_s27 + $0x3a8] ss:$16 sps:$4 sm:$0xff]  }
  0x40   :  { %941 = vmatprep.subr.bf16.mxu1 %v5751_v53  ;;  %v5844_v53 = vld [vmem:[%s8691_s27 + $0x38c] ss:$16 sps:$4 sm:$0xff]  }
  0x42   :  { %901 = vmatpush2.bf16.msra.mxu0 %v5753_v54  ;;  %v5839_v54 = vld [vmem:[%s8691_s27 + $0x188] ss:$16 sps:$4 sm:$0xff]  }
  0x43   :  { %942 = vmatpush2.bf16.msra.mxu1 %v5754_v55  ;;  %902 = vmatprep.subr.bf16.mxu0 %v5755_v56  ;;  %v5842_v55 = vld [vmem:[%s8691_s27 + $0x388] ss:$16 sps:$4 sm:$0xff]   ;;  %v5847_v56 = vld [vmem:[%s8691_s27 + $0x16c] ss:$16 sps:$4 sm:$0xff]  }
  0x44   :  { %943 = vmatprep.subr.bf16.mxu1 %v5757_v57  ;;  %v5850_v57 = vld [vmem:[%s8691_s27 + $0x36c] ss:$16 sps:$4 sm:$0xff]  }
  0x46   :  { %903 = vmatpush2.bf16.msra.mxu0 %v5759_v58  ;;  %v5845_v58 = vld [vmem:[%s8691_s27 + $0x168] ss:$16 sps:$4 sm:$0xff]  }
  0x47   :  { %944 = vmatpush2.bf16.msra.mxu1 %v5760_v59  ;;  %904 = vmatprep.subr.bf16.mxu0 %v5761_v60  ;;  %v5848_v59 = vld [vmem:[%s8691_s27 + $0x368] ss:$16 sps:$4 sm:$0xff]   ;;  %v5853_v60 = vld [vmem:[%s8691_s27 + $0x14c] ss:$16 sps:$4 sm:$0xff]  }
  0x48   :  { %945 = vmatprep.subr.bf16.mxu1 %v5763_v61  ;;  %v5856_v61 = vld [vmem:[%s8691_s27 + $0x34c] ss:$16 sps:$4 sm:$0xff]  }
  0x4a   :  { %905 = vmatpush2.bf16.msra.mxu0 %v5765_v62  ;;  %v5851_v62 = vld [vmem:[%s8691_s27 + $0x148] ss:$16 sps:$4 sm:$0xff]  }
  0x4b   :  { %946 = vmatpush2.bf16.msra.mxu1 %v5766_v63  ;;  %906 = vmatprep.subr.bf16.mxu0 %v5767_v0  ;;  %v5854_v63 = vld [vmem:[%s8691_s27 + $0x348] ss:$16 sps:$4 sm:$0xff]   ;;  %v5859_v0 = vld [vmem:[%s8691_s27 + $0x12c] ss:$16 sps:$4 sm:$0xff]  }
  0x4c   :  { %947 = vmatprep.subr.bf16.mxu1 %v5769_v1  ;;  %v5862_v1 = vld [vmem:[%s8691_s27 + $0x32c] ss:$16 sps:$4 sm:$0xff]  }
  0x4e   :  { %907 = vmatpush2.bf16.msra.mxu0 %v5771_v2  ;;  %v5857_v2 = vld [vmem:[%s8691_s27 + $0x128] ss:$16 sps:$4 sm:$0xff]  }
  0x4f   :  { %948 = vmatpush2.bf16.msra.mxu1 %v5772_v3  ;;  %958 = vmatprep.subr.bf16.mxu0 %v5775_v6  ;;  %v5860_v3 = vld [vmem:[%s8691_s27 + $0x328] ss:$16 sps:$4 sm:$0xff]  }
  0x50   :  { %999 = vmatprep.subr.bf16.mxu1 %v5778_v7  ;;  %v5863_v6 = vld [vmem:[%s8691_s27 + $0x108] ss:$16 sps:$4 sm:$0xff]  }
  0x51   :  { %909 = vmatmul.mubr.bf16.vlgmr.msra.gmra.mxu0 %v6915_v8  ;;  %v5866_v7 = vld [vmem:[%s8691_s27 + $0x308] ss:$16 sps:$4 sm:$0xff]  }
  0x52   :  { %950 = vmatmul.mubr.bf16.vlgmr.msra.gmra.mxu1 %v6917_v9  ;;  %959 = vmatpush1.bf16.msra.mxu0 %v5773_v10  ;;  %v5871_v10 = vld [vmem:[%s8693_s5 + $0xe4] ss:$16 sps:$4 sm:$0xff]  }
  0x53   :  { %1000 = vmatpush1.bf16.msra.mxu1 %v5776_v11  ;;  %960 = vmatprep.subr.bf16.mxu0 %v5781_v12  ;;  %v5869_v11 = vld [vmem:[%s8693_s5 + $0xe0] ss:$16 sps:$4 sm:$0xff]   ;;  %v5874_v12 = vld [vmem:[%s8693_s5 + $0xc4] ss:$16 sps:$4 sm:$0xff]  }
  0x54   :  { %1001 = vmatprep.subr.bf16.mxu1 %v5784_v13  ;;  %990 = vmatprep.mubr.bf16.mxu0 %v6849_v49  ;;  %v5838_v49 = vld [vmem:[%s8691_s27 + $0x3ac] ss:$16 sps:$4 sm:$0xff]   ;;  %v5872_v13 = vld [vmem:[%s8693_s5 + $0xc0] ss:$16 sps:$4 sm:$0xff]  }
  0x55   :  { %1031 = vmatprep.mubr.bf16.mxu1 %v85_v52  ;;  %v5841_v52 = vld [vmem:[%s8691_s27 + $0x18c] ss:$16 sps:$4 sm:$0xff]  }
  0x56   :  { %961 = vmatpush1.bf16.msra.mxu0 %v5779_v14  ;;  %v5877_v14 = vld [vmem:[%s8693_s5 + $0xa4] ss:$16 sps:$4 sm:$0xff]  }
  0x57   :  { %1002 = vmatpush1.bf16.msra.mxu1 %v5782_v15  ;;  %962 = vmatprep.subr.bf16.mxu0 %v5787_v16  ;;  %v5875_v15 = vld [vmem:[%s8693_s5 + $0xa0] ss:$16 sps:$4 sm:$0xff]   ;;  %v5880_v16 = vld [vmem:[%s8693_s5 + $0x84] ss:$16 sps:$4 sm:$0xff]  }
  0x58   :  { %1003 = vmatprep.subr.bf16.mxu1 %v5790_v17  ;;  %v5883_v17 = vld [vmem:[%s8693_s5 + $0x64] ss:$16 sps:$4 sm:$0xff]  }
  0x5a   :  { %963 = vmatpush1.bf16.msra.mxu0 %v5785_v18  ;;  %v5917_v18 = vld [vmem:[%s8693_s5 + $0x2e0] ss:$16 sps:$4 sm:$0xff]  }
  0x5b   :  { %1004 = vmatpush1.bf16.msra.mxu1 %v5788_v19  ;;  %964 = vmatprep.subr.bf16.mxu0 %v5793_v20  ;;  %v5881_v19 = vld [vmem:[%s8693_s5 + $0x60] ss:$16 sps:$4 sm:$0xff]  }
  0x5c   :  { %1005 = vmatprep.subr.bf16.mxu1 %v5796_v21  ;;  %v5923_v20 = vld [vmem:[%s8693_s5 + $0x2c0] ss:$16 sps:$4 sm:$0xff]   ;;  %v5925_v21 = vld [vmem:[%s8693_s5 + $0x2c4] ss:$16 sps:$4 sm:$0xff]  }
  0x5e   :  { %965 = vmatpush1.bf16.msra.mxu0 %v5791_v22  ;;  %v5886_v22 = vld [vmem:[%s8693_s5 + $0x44] ss:$16 sps:$4 sm:$0xff]  }
  0x5f   :  { %1006 = vmatpush1.bf16.msra.mxu1 %v5794_v23  ;;  %966 = vmatprep.subr.bf16.mxu0 %v5799_v24  ;;  %v5884_v23 = vld [vmem:[%s8693_s5 + $0x40] ss:$16 sps:$4 sm:$0xff]  }
  0x60   :  { %1007 = vmatprep.subr.bf16.mxu1 %v5802_v25  ;;  %v5929_v24 = vld [vmem:[%s8693_s5 + $0x2a0] ss:$16 sps:$4 sm:$0xff]   ;;  %v5931_v25 = vld [vmem:[%s8693_s5 + $0x2a4] ss:$16 sps:$4 sm:$0xff]  }
  0x62   :  { %967 = vmatpush1.bf16.msra.mxu0 %v5797_v26  ;;  %v5889_v26 = vld [vmem:[%s8693_s5 + $0x24] ss:$16 sps:$4 sm:$0xff]  }
  0x63   :  { %1008 = vmatpush1.bf16.msra.mxu1 %v5800_v27  ;;  %968 = vmatprep.subr.bf16.mxu0 %v5805_v28  ;;  %v5887_v27 = vld [vmem:[%s8693_s5 + $0x20] ss:$16 sps:$4 sm:$0xff]  }
  0x64   :  { %1009 = vmatprep.subr.bf16.mxu1 %v5808_v29  ;;  %v5935_v28 = vld [vmem:[%s8693_s5 + $0x280] ss:$16 sps:$4 sm:$0xff]   ;;  %v5937_v29 = vld [vmem:[%s8693_s5 + $0x284] ss:$16 sps:$4 sm:$0xff]  }
  0x66   :  { %969 = vmatpush1.bf16.msra.mxu0 %v5803_v30  ;;  %v5892_v30 = vld [vmem:[%s8693_s5 + $0x4] ss:$16 sps:$4 sm:$0xff]  }
  0x67   :  { %1010 = vmatpush1.bf16.msra.mxu1 %v5806_v31  ;;  %970 = vmatprep.subr.bf16.mxu0 %v5811_v32  ;;  %v5890_v31 = vld [vmem:[%s8693_s5] ss:$16 sps:$4 sm:$0xff]  }
  0x68   :  { %1011 = vmatprep.subr.bf16.mxu1 %v5814_v33  ;;  %v5941_v32 = vld [vmem:[%s8693_s5 + $0x260] ss:$16 sps:$4 sm:$0xff]   ;;  %v5943_v33 = vld [vmem:[%s8693_s5 + $0x264] ss:$16 sps:$4 sm:$0xff]  }
  0x6a   :  { %971 = vmatpush1.bf16.msra.mxu0 %v5809_v34  ;;  %v5895_v34 = vld [vmem:[%s8693_s5 + $0x1e4] ss:$16 sps:$4 sm:$0xff]  }
  0x6b   :  { %1012 = vmatpush1.bf16.msra.mxu1 %v5812_v35  ;;  %972 = vmatprep.subr.bf16.mxu0 %v5817_v36  ;;  %v5893_v35 = vld [vmem:[%s8693_s5 + $0x1e0] ss:$16 sps:$4 sm:$0xff]  }
  0x6c   :  { %1013 = vmatprep.subr.bf16.mxu1 %v5820_v37  ;;  %v5947_v36 = vld [vmem:[%s8693_s5 + $0x240] ss:$16 sps:$4 sm:$0xff]   ;;  %v5949_v37 = vld [vmem:[%s8693_s5 + $0x244] ss:$16 sps:$4 sm:$0xff]  }
  0x6e   :  { %973 = vmatpush1.bf16.msra.mxu0 %v5815_v38  ;;  %v5898_v38 = vld [vmem:[%s8693_s5 + $0x1c4] ss:$16 sps:$4 sm:$0xff]  }
  0x6f   :  { %1014 = vmatpush1.bf16.msra.mxu1 %v5818_v39  ;;  %974 = vmatprep.subr.bf16.mxu0 %v5823_v40  ;;  %v5896_v39 = vld [vmem:[%s8693_s5 + $0x1c0] ss:$16 sps:$4 sm:$0xff]  }
  0x70   :  { %1015 = vmatprep.subr.bf16.mxu1 %v5826_v41  ;;  %v5953_v40 = vld [vmem:[%s8693_s5 + $0x220] ss:$16 sps:$4 sm:$0xff]   ;;  %v5955_v41 = vld [vmem:[%s8693_s5 + $0x224] ss:$16 sps:$4 sm:$0xff]  }
  0x72   :  { %975 = vmatpush2.bf16.msra.mxu0 %v5821_v42  ;;  %v5901_v42 = vld [vmem:[%s8693_s5 + $0x1a4] ss:$16 sps:$4 sm:$0xff]  }
  0x73   :  { %1016 = vmatpush2.bf16.msra.mxu1 %v5824_v43  ;;  %976 = vmatprep.subr.bf16.mxu0 %v5829_v44  ;;  %v5899_v43 = vld [vmem:[%s8693_s5 + $0x1a0] ss:$16 sps:$4 sm:$0xff]  }
  0x74   :  { %1017 = vmatprep.subr.bf16.mxu1 %v5832_v45  ;;  %v5959_v44 = vld [vmem:[%s8693_s5 + $0x200] ss:$16 sps:$4 sm:$0xff]   ;;  %v5961_v45 = vld [vmem:[%s8693_s5 + $0x204] ss:$16 sps:$4 sm:$0xff]  }
  0x76   :  { %977 = vmatpush2.bf16.msra.mxu0 %v5827_v46  ;;  %v5904_v46 = vld [vmem:[%s8693_s5 + $0x184] ss:$16 sps:$4 sm:$0xff]  }
  0x77   :  { %1018 = vmatpush2.bf16.msra.mxu1 %v5830_v47  ;;  %978 = vmatprep.subr.bf16.mxu0 %v5835_v48  ;;  %v5902_v47 = vld [vmem:[%s8693_s5 + $0x180] ss:$16 sps:$4 sm:$0xff]  }
  0x78   :  { %1019 = vmatprep.subr.bf16.mxu1 %v5838_v49  ;;  %v5965_v48 = vld [vmem:[%s8693_s5 + $0x3e0] ss:$16 sps:$4 sm:$0xff]   ;;  %v5967_v49 = vld [vmem:[%s8693_s5 + $0x3e4] ss:$16 sps:$4 sm:$0xff]  }
  0x7a   :  { %979 = vmatpush2.bf16.msra.mxu0 %v5833_v50  ;;  %v5907_v50 = vld [vmem:[%s8693_s5 + $0x164] ss:$16 sps:$4 sm:$0xff]  }
  0x7b   :  { %1020 = vmatpush2.bf16.msra.mxu1 %v5836_v51  ;;  %980 = vmatprep.subr.bf16.mxu0 %v5841_v52  ;;  %v5905_v51 = vld [vmem:[%s8693_s5 + $0x160] ss:$16 sps:$4 sm:$0xff]  }
  0x7c   :  { %1021 = vmatprep.subr.bf16.mxu1 %v5844_v53  ;;  %v5971_v52 = vld [vmem:[%s8693_s5 + $0x3c0] ss:$16 sps:$4 sm:$0xff]   ;;  %v5973_v53 = vld [vmem:[%s8693_s5 + $0x3c4] ss:$16 sps:$4 sm:$0xff]  }
  0x7e   :  { %981 = vmatpush2.bf16.msra.mxu0 %v5839_v54  ;;  %v5910_v54 = vld [vmem:[%s8693_s5 + $0x144] ss:$16 sps:$4 sm:$0xff]  }
  0x7f   :  { %1022 = vmatpush2.bf16.msra.mxu1 %v5842_v55  ;;  %982 = vmatprep.subr.bf16.mxu0 %v5847_v56  ;;  %v5908_v55 = vld [vmem:[%s8693_s5 + $0x140] ss:$16 sps:$4 sm:$0xff]  }
  0x80   :  { %1023 = vmatprep.subr.bf16.mxu1 %v5850_v57  ;;  %v5977_v56 = vld [vmem:[%s8693_s5 + $0x3a0] ss:$16 sps:$4 sm:$0xff]   ;;  %v5979_v57 = vld [vmem:[%s8693_s5 + $0x3a4] ss:$16 sps:$4 sm:$0xff]  }
  0x82   :  { %983 = vmatpush2.bf16.msra.mxu0 %v5845_v58  ;;  %v5913_v58 = vld [vmem:[%s8693_s5 + $0x124] ss:$16 sps:$4 sm:$0xff]  }
  0x83   :  { %1024 = vmatpush2.bf16.msra.mxu1 %v5848_v59  ;;  %984 = vmatprep.subr.bf16.mxu0 %v5853_v60  ;;  %v5911_v59 = vld [vmem:[%s8693_s5 + $0x120] ss:$16 sps:$4 sm:$0xff]  }
  0x84   :  { %1025 = vmatprep.subr.bf16.mxu1 %v5856_v61  ;;  %v5983_v60 = vld [vmem:[%s8693_s5 + $0x380] ss:$16 sps:$4 sm:$0xff]   ;;  %v5985_v61 = vld [vmem:[%s8693_s5 + $0x384] ss:$16 sps:$4 sm:$0xff]  }
  0x86   :  { %985 = vmatpush2.bf16.msra.mxu0 %v5851_v62  ;;  %v5916_v62 = vld [vmem:[%s8693_s5 + $0x104] ss:$16 sps:$4 sm:$0xff]  }
  0x87   :  { %1026 = vmatpush2.bf16.msra.mxu1 %v5854_v63  ;;  %986 = vmatprep.subr.bf16.mxu0 %v5859_v0  ;;  %v5914_v63 = vld [vmem:[%s8693_s5 + $0x100] ss:$16 sps:$4 sm:$0xff]  }
  0x88   :  { %1027 = vmatprep.subr.bf16.mxu1 %v5862_v1  ;;  %v5989_v0 = vld [vmem:[%s8693_s5 + $0x360] ss:$16 sps:$4 sm:$0xff]   ;;  %v5991_v1 = vld [vmem:[%s8693_s5 + $0x364] ss:$16 sps:$4 sm:$0xff]  }
  0x8a   :  { %987 = vmatpush2.bf16.msra.mxu0 %v5857_v2  ;;  %v5922_v2 = vld [vmem:[%s8693_s5 + $0xec] ss:$16 sps:$4 sm:$0xff]  }
  0x8b   :  { %1028 = vmatpush2.bf16.msra.mxu1 %v5860_v3  ;;  %988 = vmatprep.subr.bf16.mxu0 %v5865_v4  ;;  %v5995_v3 = vld [vmem:[%s8693_s5 + $0x340] ss:$16 sps:$4 sm:$0xff]   ;;  %v5997_v4 = vld [vmem:[%s8693_s5 + $0x344] ss:$16 sps:$4 sm:$0xff]  }
  0x8c   :  { %1029 = vmatprep.subr.bf16.mxu1 %v5868_v5  ;;  %v6003_v5 = vld [vmem:[%s8693_s5 + $0x324] ss:$16 sps:$4 sm:$0xff]  }
  0x8e   :  { %989 = vmatpush2.bf16.msra.mxu0 %v5863_v6  ;;  %v6001_v6 = vld [vmem:[%s8693_s5 + $0x320] ss:$16 sps:$4 sm:$0xff]  }
  0x8f   :  { %1030 = vmatpush2.bf16.msra.mxu1 %v5866_v7  ;;  %1834 = vmatprep.subr.bf16.mxu0 %v5871_v10  ;;  %v6009_v7 = vld [vmem:[%s8693_s5 + $0x304] ss:$16 sps:$4 sm:$0xff]   ;;  %v6007_v10 = vld [vmem:[%s8693_s5 + $0x300] ss:$16 sps:$4 sm:$0xff]  }
  0x91   :  { %991 = vmatmul.mubr.bf16.vlgmr.msra.gmra.mxu0 %v6915_v8  ;;  %v5878_v8 = vld [vmem:[%s8693_s5 + $0x80] ss:$16 sps:$4 sm:$0xff]  }
  0x92   :  { %1032 = vmatmul.mubr.bf16.vlgmr.msra.gmra.mxu1 %v6917_v9  ;;  %1835 = vmatpush1.bf16.msra.mxu0 %v5869_v11  ;;  %v5919_v9 = vld [vmem:[%s8693_s5 + $0x2e4] ss:$16 sps:$4 sm:$0xff]   ;;  %v6015_v11 = vld [vmem:[%s8693_s5 + $0x2ec] ss:$16 sps:$4 sm:$0xff]  }
  0x93   :  { %1836 = vmatprep.subr.bf16.mxu0 %v5874_v12  ;;  %1875 = vmatprep.subr.bf16.mxu1 %v5919_v9  ;;  %v216_v12 = vlaneseq }
  0x94   :  { %1876 = vmatpush1.bf16.msra.mxu1 %v5917_v18 }
  0x95   :  { %1877 = vmatprep.subr.bf16.mxu1 %v5925_v21 }
  0x96   :  { %1837 = vmatpush1.bf16.msra.mxu0 %v5872_v13  ;;  %v7308_v13 = vshrl.u32 %v216_v12, 7 }
  0x97   :  { %1838 = vmatprep.subr.bf16.mxu0 %v5877_v14  ;;  %v7313_v14 = vld [vmem:[%s8694_s6] sm:$0xf] }
  0x98   :  { %1878 = vmatpush1.bf16.msra.mxu1 %v5923_v20 }
  0x99   :  { %1879 = vmatprep.subr.bf16.mxu1 %v5931_v25 }
  0x9a   :  { %1839 = vmatpush1.bf16.msra.mxu0 %v5875_v15  ;;  %v7316_v15 = vsub.s32 0, %v7308_v13 }
  0x9b   :  { %1840 = vmatprep.subr.bf16.mxu0 %v5880_v16  ;;  %v7319_v16 = vsub.s32 1, %v7308_v13 }
  0x9c   :  { %1880 = vmatpush1.bf16.msra.mxu1 %v5929_v24 }
  0x9d   :  { %1881 = vmatprep.subr.bf16.mxu1 %v5937_v29  ;;  %v223_v9 = vrot.slane %v7313_v14, %v7319_v16 }
  0x9e   :  { %1841 = vmatpush1.bf16.msra.mxu0 %v5878_v8  ;;  %v219_v8 = vrot.slane %v7313_v14, %v7316_v15 }
  0x9f   :  { %1842 = vmatprep.subr.bf16.mxu0 %v5883_v17 }
  0xa0   :  { %1882 = vmatpush1.bf16.msra.mxu1 %v5935_v28 }
  0xa1   :  { %1883 = vmatprep.subr.bf16.mxu1 %v5943_v33  ;;  %v5926_v33 = vld [vmem:[%s8693_s5 + $0xc8] ss:$16 sps:$4 sm:$0xff]  }
  0xa2   :  { %1843 = vmatpush1.bf16.msra.mxu0 %v5881_v19 }
  0xa3   :  { %1844 = vmatprep.subr.bf16.mxu0 %v5886_v22 }
  0xa4   :  { %1884 = vmatpush1.bf16.msra.mxu1 %v5941_v32 }
  0xa5   :  { %1885 = vmatprep.subr.bf16.mxu1 %v5949_v37  ;;  %v5938_v37 = vld [vmem:[%s8693_s5 + $0x88] ss:$16 sps:$4 sm:$0xff]  }
  0xa6   :  { %1845 = vmatpush1.bf16.msra.mxu0 %v5884_v23 }
  0xa7   :  { %1846 = vmatprep.subr.bf16.mxu0 %v5889_v26 }
  0xa8   :  { %1886 = vmatpush1.bf16.msra.mxu1 %v5947_v36  ;;  %v5940_v36 = vld [vmem:[%s8693_s5 + $0x8c] ss:$16 sps:$4 sm:$0xff]  }
  0xa9   :  { %1887 = vmatprep.subr.bf16.mxu1 %v5955_v41  ;;  %v5950_v41 = vld [vmem:[%s8693_s5 + $0x48] ss:$16 sps:$4 sm:$0xff]  }
  0xaa   :  { %1847 = vmatpush1.bf16.msra.mxu0 %v5887_v27  ;;  %v5920_v27 = vld [vmem:[%s8693_s5 + $0xe8] ss:$16 sps:$4 sm:$0xff]  }
  0xab   :  { %1848 = vmatprep.subr.bf16.mxu0 %v5892_v30  ;;  %v5928_v30 = vld [vmem:[%s8693_s5 + $0xcc] ss:$16 sps:$4 sm:$0xff]  }
  0xac   :  { %1888 = vmatpush1.bf16.msra.mxu1 %v5953_v40  ;;  %v5952_v40 = vld [vmem:[%s8693_s5 + $0x4c] ss:$16 sps:$4 sm:$0xff]  }
  0xad   :  { %1889 = vmatprep.subr.bf16.mxu1 %v5961_v45  ;;  %v5962_v45 = vld [vmem:[%s8693_s5 + $0x8] ss:$16 sps:$4 sm:$0xff]  }
  0xae   :  { %1849 = vmatpush1.bf16.msra.mxu0 %v5890_v31 }
  0xaf   :  { %1850 = vmatprep.subr.bf16.mxu0 %v5895_v34  ;;  %v5934_v34 = vld [vmem:[%s8693_s5 + $0xac] ss:$16 sps:$4 sm:$0xff]  }
  0xb0   :  { %1890 = vmatpush1.bf16.msra.mxu1 %v5959_v44  ;;  %v5964_v44 = vld [vmem:[%s8693_s5 + $0xc] ss:$16 sps:$4 sm:$0xff]  }
  0xb1   :  { %1891 = vmatprep.subr.bf16.mxu1 %v5967_v49  ;;  %v5974_v49 = vld [vmem:[%s8693_s5 + $0x1c8] ss:$16 sps:$4 sm:$0xff]  }
  0xb2   :  { %1851 = vmatpush2.bf16.msra.mxu0 %v5893_v35  ;;  %v5932_v35 = vld [vmem:[%s8693_s5 + $0xa8] ss:$16 sps:$4 sm:$0xff]  }
  0xb3   :  { %1852 = vmatprep.subr.bf16.mxu0 %v5898_v38  ;;  %v5946_v38 = vld [vmem:[%s8693_s5 + $0x6c] ss:$16 sps:$4 sm:$0xff]  }
  0xb4   :  { %1892 = vmatpush2.bf16.msra.mxu1 %v5965_v48  ;;  %v5976_v48 = vld [vmem:[%s8693_s5 + $0x1cc] ss:$16 sps:$4 sm:$0xff]  }
  0xb5   :  { %1893 = vmatprep.subr.bf16.mxu1 %v5973_v53 }
  0xb6   :  { %1853 = vmatpush2.bf16.msra.mxu0 %v5896_v39  ;;  %v5944_v39 = vld [vmem:[%s8693_s5 + $0x68] ss:$16 sps:$4 sm:$0xff]  }
  0xb7   :  { %1854 = vmatprep.subr.bf16.mxu0 %v5901_v42  ;;  %v5958_v42 = vld [vmem:[%s8693_s5 + $0x2c] ss:$16 sps:$4 sm:$0xff]  }
  0xb8   :  { %1894 = vmatpush2.bf16.msra.mxu1 %v5971_v52 }
  0xb9   :  { %1895 = vmatprep.subr.bf16.mxu1 %v5979_v57 }
  0xba   :  { %1855 = vmatpush2.bf16.msra.mxu0 %v5899_v43  ;;  %v5956_v43 = vld [vmem:[%s8693_s5 + $0x28] ss:$16 sps:$4 sm:$0xff]  }
  0xbb   :  { %1856 = vmatprep.subr.bf16.mxu0 %v5904_v46  ;;  %v5970_v46 = vld [vmem:[%s8693_s5 + $0x1ec] ss:$16 sps:$4 sm:$0xff]  }
  0xbc   :  { %1896 = vmatpush2.bf16.msra.mxu1 %v5977_v56 }
  0xbd   :  { %1897 = vmatprep.subr.bf16.mxu1 %v5985_v61 }
  0xbe   :  { %1857 = vmatpush2.bf16.msra.mxu0 %v5902_v47  ;;  %v5968_v47 = vld [vmem:[%s8693_s5 + $0x1e8] ss:$16 sps:$4 sm:$0xff]  }
  0xbf   :  { %1858 = vmatprep.subr.bf16.mxu0 %v5907_v50  ;;  %v5982_v50 = vld [vmem:[%s8693_s5 + $0x1ac] ss:$16 sps:$4 sm:$0xff]  }
  0xc0   :  { %1898 = vmatpush2.bf16.msra.mxu1 %v5983_v60 }
  0xc1   :  { %1899 = vmatprep.subr.bf16.mxu1 %v5991_v1 }
  0xc2   :  { %1859 = vmatpush2.bf16.msra.mxu0 %v5905_v51 }
  0xc3   :  { %1860 = vmatprep.subr.bf16.mxu0 %v5910_v54 }
  0xc4   :  { %1900 = vmatpush2.bf16.msra.mxu1 %v5989_v0 }
  0xc5   :  { %1901 = vmatprep.subr.bf16.mxu1 %v5997_v4 }
  0xc6   :  { %1861 = vmatpush2.bf16.msra.mxu0 %v5908_v55 }
  0xc7   :  { %1862 = vmatprep.subr.bf16.mxu0 %v5913_v58 }
  0xc8   :  { %1902 = vmatpush2.bf16.msra.mxu1 %v5995_v3 }
  0xc9   :  { %1903 = vmatprep.subr.bf16.mxu1 %v6003_v5 }
  0xca   :  { %1863 = vmatpush2.bf16.msra.mxu0 %v5911_v59 }
  0xcb   :  { %1864 = vmatprep.subr.bf16.mxu0 %v5916_v62 }
  0xcc   :  { %1904 = vmatpush2.bf16.msra.mxu1 %v6001_v6 }
  0xcd   :  { %1905 = vmatprep.subr.bf16.mxu1 %v6009_v7 }
  0xce   :  { %1865 = vmatpush2.bf16.msra.mxu0 %v5914_v63 }
  0xcf   :  { %1916 = vmatprep.subr.bf16.mxu0 %v5922_v2 }
  0xd0   :  { %1906 = vmatpush2.bf16.msra.mxu1 %v6007_v10 }
  0xd1   :  { %1957 = vmatprep.subr.bf16.mxu1 %v6015_v11 }
 0x111   :  { %v910_v17 = vpop.f32.mrf.mxu0 }
 0x112   :  { %v951_v18 = vpop.f32.mrf.mxu1  ;;  %v911_v19 = vadd.f32 %v910_v17, %v219_v8 }
 0x113   :  { %v912_v20 = vpop.f32.mrf.mxu0 }
 0x114   :  { %v953_v21 = vpop.f32.mrf.mxu1  ;;  %v913_v22 = vadd.f32 %v912_v20, %v223_v9  ;;  %v952_v23 = vadd.f32 %v951_v18, %v911_v19 }
 0x115   :  { %v914_v24 = vpop.f32.mrf.mxu0 }
 0x116   :  { %v955_v25 = vpop.f32.mrf.mxu1  ;;  %v954_v26 = vadd.f32 %v953_v21, %v913_v22  ;;  %v7331_v32 = vpack.c.bf16 %v952_v23, %v952_v23 }
 0x117   :  { %v915_v28 = vpop.f32.mrf.mxu0 }
 0x118   :  { %v956_v29 = vpop.f32.mrf.mxu1  ;;  %v1041_v31 = vpack.c.bf16 %v954_v26, %v954_v26 }
 0x11a   :  { %1866 = vmatprep.mubr.bf16.mxu0 %v1041_v31 }
 0x11b   :  { %1867 = vmatmul.mubr.bf16.vlgmr.msra.gmra.mxu0 %v7331_v32 }
 0x11c   :  { %1917 = vmatpush1.bf16.msra.mxu0 %v5920_v27  ;;  %1948 = vmatprep.mubr.bf16.mxu0 %v1041_v31 }
 0x11d   :  { %1918 = vmatprep.subr.bf16.mxu0 %v5928_v30 }
 0x120   :  { %1919 = vmatpush1.bf16.msra.mxu0 %v5926_v33 }
 0x121   :  { %1920 = vmatprep.subr.bf16.mxu0 %v5934_v34 }
 0x124   :  { %1921 = vmatpush1.bf16.msra.mxu0 %v5932_v35 }
 0x125   :  { %1922 = vmatprep.subr.bf16.mxu0 %v5940_v36 }
 0x128   :  { %1923 = vmatpush1.bf16.msra.mxu0 %v5938_v37 }
 0x129   :  { %1924 = vmatprep.subr.bf16.mxu0 %v5946_v38 }
 0x12c   :  { %1925 = vmatpush1.bf16.msra.mxu0 %v5944_v39 }
 0x12d   :  { %1926 = vmatprep.subr.bf16.mxu0 %v5952_v40 }
 0x130   :  { %1927 = vmatpush1.bf16.msra.mxu0 %v5950_v41 }
 0x131   :  { %1928 = vmatprep.subr.bf16.mxu0 %v5958_v42 }
 0x134   :  { %1929 = vmatpush1.bf16.msra.mxu0 %v5956_v43 }
 0x135   :  { %1930 = vmatprep.subr.bf16.mxu0 %v5964_v44 }
 0x138   :  { %1931 = vmatpush1.bf16.msra.mxu0 %v5962_v45 }
 0x139   :  { %1932 = vmatprep.subr.bf16.mxu0 %v5970_v46 }
 0x13c   :  { %1933 = vmatpush2.bf16.msra.mxu0 %v5968_v47 }
 0x13d   :  { %1934 = vmatprep.subr.bf16.mxu0 %v5976_v48 }
 0x13e   :  { %30 = vsyncpa [#allocation3], 0  ;;  %v5980_v51 = vld [vmem:[%s8693_s5 + $0x1a8] ss:$16 sps:$4 sm:$0xff]   ;;  %v5988_v52 = vld [vmem:[%s8693_s5 + $0x18c] ss:$16 sps:$4 sm:$0xff]  }
 0x13f   :  { %v5986_v53 = vld [vmem:[%s8693_s5 + $0x188] ss:$16 sps:$4 sm:$0xff]   ;;  %v5994_v54 = vld [vmem:[%s8693_s5 + $0x16c] ss:$16 sps:$4 sm:$0xff]   ;;  %v7407_v57 = vsub.s32 2, %v7308_v13  ;;  %v7413_v59 = vsub.s32 3, %v7308_v13 }
 0x140   :  { %1935 = vmatpush2.bf16.msra.mxu0 %v5974_v49  ;;  %v5992_v55 = vld [vmem:[%s8693_s5 + $0x168] ss:$16 sps:$4 sm:$0xff]   ;;  %v6000_v56 = vld [vmem:[%s8693_s5 + $0x14c] ss:$16 sps:$4 sm:$0xff]   ;;  %s8695_s28 = sld [smem:[#allocation10_spill]]  ;;  %vm6574_vm0 = vmmov 0  }
 0x141   :  { %1936 = vmatprep.subr.bf16.mxu0 %v5982_v50  ;;  %v5998_v58 = vld [vmem:[%s8693_s5 + $0x148] ss:$16 sps:$4 sm:$0xff]   ;;  %v6006_v60 = vld [vmem:[%s8693_s5 + $0x12c] ss:$16 sps:$4 sm:$0xff]   ;;  %v227_v61 = vrot.slane %v7313_v14, %v7407_v57  ;;  %v231_v63 = vrot.slane %v7313_v14, %v7413_v59  ;;  %s8696_s29 = sld [smem:[#allocation9_spill]]  ;;  %vm2406_vm1 = vcmask 523264  }
 0x142   :  { %v6004_v62 = vld [vmem:[%s8693_s5 + $0x128] ss:$16 sps:$4 sm:$0xff]   ;;  %v6012_v2 = vld [vmem:[%s8693_s5 + $0x10c] ss:$16 sps:$4 sm:$0xff]   ;;  %s8697_s7 = sld [smem:[#allocation11_spill]]  ;;  %vm2467_vm2 = vcmask 261120  }
 0x143   :  { %v6010_v7 = vld [vmem:[%s8693_s5 + $0x108] ss:$16 sps:$4 sm:$0xff]   ;;  %v6018_v20 = vld [vmem:[%s8693_s5 + $0x2cc] ss:$16 sps:$4 sm:$0xff]   ;;  %s8698_s8 = sld [smem:[#allocation12_spill]] }
 0x144   :  { %1937 = vmatpush2.bf16.msra.mxu0 %v5980_v51  ;;  %v6013_v18 = vld [vmem:[%s8693_s5 + $0x2e8] ss:$16 sps:$4 sm:$0xff]   ;;  %v6021_v22 = vld [vmem:[%s8693_s5 + $0x2ac] ss:$16 sps:$4 sm:$0xff]   ;;  %s8699_s1 = sld [smem:[#allocation13_spill]] }
 0x145   :  { %1938 = vmatprep.subr.bf16.mxu0 %v5988_v52  ;;  %v6016_v21 = vld [vmem:[%s8693_s5 + $0x2c8] ss:$16 sps:$4 sm:$0xff]   ;;  %v6024_v24 = vld [vmem:[%s8693_s5 + $0x28c] ss:$16 sps:$4 sm:$0xff]  }
 0x146   :  { %v6019_v23 = vld [vmem:[%s8693_s5 + $0x2a8] ss:$16 sps:$4 sm:$0xff]   ;;  %v6063_v27 = vld [vmem:[%s8695_s28 + $0x70] sm:$0xff]   ;;  %v6027_v30 = vld [vmem:[%s8693_s5 + $0x26c] ss:$16 sps:$4 sm:$0xff]  }
 0x147   :  { %v6061_v25 = vld [vmem:[%s8695_s28 + $0x78] sm:$0xff]   ;;  %v6064_v29 = vld [vmem:[%s8695_s28 + $0x30] sm:$0xff]   ;;  %v6065_v31 = vld [vmem:[%s8695_s28 + $0x68] sm:$0xff]  }
 0x148   :  { %1939 = vmatpush2.bf16.msra.mxu0 %v5986_v53  ;;  %v6062_v26 = vld [vmem:[%s8695_s28 + $0x38] sm:$0xff]   ;;  %v6066_v33 = vld [vmem:[%s8695_s28 + $0x28] sm:$0xff]   ;;  %v6067_v35 = vld [vmem:[%s8695_s28 + $0x60] sm:$0xff]  }
 0x149   :  { %1940 = vmatprep.subr.bf16.mxu0 %v5994_v54  ;;  %v6022_v28 = vld [vmem:[%s8693_s5 + $0x288] ss:$16 sps:$4 sm:$0xff]   ;;  %v6030_v34 = vld [vmem:[%s8693_s5 + $0x24c] ss:$16 sps:$4 sm:$0xff]   ;;  %v6068_v37 = vld [vmem:[%s8695_s28 + $0x20] sm:$0xff]  }
 0x14a   :  { %v6028_v36 = vld [vmem:[%s8693_s5 + $0x248] ss:$16 sps:$4 sm:$0xff]   ;;  %v6033_v38 = vld [vmem:[%s8693_s5 + $0x22c] ss:$16 sps:$4 sm:$0xff]   ;;  %v6071_v43 = vld [vmem:[%s8695_s28 + $0x50] sm:$0xff]  }
 0x14b   :  { %v6069_v39 = vld [vmem:[%s8695_s28 + $0x58] sm:$0xff]  }
 0x14c   :  { %1941 = vmatpush2.bf16.msra.mxu0 %v5992_v55  ;;  %v6031_v40 = vld [vmem:[%s8693_s5 + $0x228] ss:$16 sps:$4 sm:$0xff]   ;;  %v6036_v42 = vld [vmem:[%s8693_s5 + $0x20c] ss:$16 sps:$4 sm:$0xff]  }
 0x14d   :  { %1942 = vmatprep.subr.bf16.mxu0 %v6000_v56  ;;  %v6070_v41 = vld [vmem:[%s8695_s28 + $0x18] sm:$0xff]  }
 0x14e   :  { %v6034_v44 = vld [vmem:[%s8693_s5 + $0x208] ss:$16 sps:$4 sm:$0xff]   ;;  %v6039_v45 = vld [vmem:[%s8693_s5 + $0x3ec] ss:$16 sps:$4 sm:$0xff]  }
 0x14f   :  { %v6037_v46 = vld [vmem:[%s8693_s5 + $0x3e8] ss:$16 sps:$4 sm:$0xff]   ;;  %v6042_v47 = vld [vmem:[%s8693_s5 + $0x3cc] ss:$16 sps:$4 sm:$0xff]  }
 0x150   :  { %1943 = vmatpush2.bf16.msra.mxu0 %v5998_v58  ;;  %v6040_v48 = vld [vmem:[%s8693_s5 + $0x3c8] ss:$16 sps:$4 sm:$0xff]   ;;  %v6045_v49 = vld [vmem:[%s8693_s5 + $0x3ac] ss:$16 sps:$4 sm:$0xff]  }
 0x151   :  { %v992_v0 = vpop.f32.mrf.mxu0  ;;  %1944 = vmatprep.subr.bf16.mxu0 %v6006_v60  ;;  %v6043_v50 = vld [vmem:[%s8693_s5 + $0x3a8] ss:$16 sps:$4 sm:$0xff]   ;;  %v6048_v51 = vld [vmem:[%s8693_s5 + $0x38c] ss:$16 sps:$4 sm:$0xff]  }
 0x152   :  { %v1033_v1 = vpop.f32.mrf.mxu1  ;;  %v993_v3 = vadd.f32 %v992_v0, %v227_v61  ;;  %v6046_v52 = vld [vmem:[%s8693_s5 + $0x388] ss:$16 sps:$4 sm:$0xff]   ;;  %v6051_v53 = vld [vmem:[%s8693_s5 + $0x36c] ss:$16 sps:$4 sm:$0xff]  }
 0x153   :  { %v994_v4 = vpop.f32.mrf.mxu0  ;;  %v6049_v54 = vld [vmem:[%s8693_s5 + $0x368] ss:$16 sps:$4 sm:$0xff]   ;;  %v6054_v55 = vld [vmem:[%s8693_s5 + $0x34c] ss:$16 sps:$4 sm:$0xff]  }
 0x154   :  { %v1035_v5 = vpop.f32.mrf.mxu1  ;;  %v995_v6 = vadd.f32 %v994_v4, %v231_v63  ;;  %1945 = vmatpush2.bf16.msra.mxu0 %v6004_v62  ;;  %v1034_v10 = vadd.f32 %v1033_v1, %v993_v3  ;;  %v6052_v56 = vld [vmem:[%s8693_s5 + $0x348] ss:$16 sps:$4 sm:$0xff]   ;;  %v6057_v58 = vld [vmem:[%s8693_s5 + $0x32c] ss:$16 sps:$4 sm:$0xff]   ;;  %v6072_v63 = vld [vmem:[%s8695_s28 + $0x10] sm:$0xff]  }
 0x155   :  { %v996_v11 = vpop.f32.mrf.mxu0  ;;  %1946 = vmatprep.subr.bf16.mxu0 %v6012_v2  ;;  %v6055_v60 = vld [vmem:[%s8693_s5 + $0x328] ss:$16 sps:$4 sm:$0xff]   ;;  %v6060_v61 = vld [vmem:[%s8693_s5 + $0x30c] ss:$16 sps:$4 sm:$0xff]   ;;  %v6075_v2 = vld [vmem:[%s8695_s28 + $0x40] sm:$0xff]  }
 0x156   :  { %v1037_v12 = vpop.f32.mrf.mxu1  ;;  %v1036_v14 = vadd.f32 %v1035_v5, %v995_v6  ;;  %v7434_v19 = vpack.c.bf16 %v1034_v10, %v1034_v10  ;;  %v6058_v62 = vld [vmem:[%s8693_s5 + $0x308] ss:$16 sps:$4 sm:$0xff]   ;;  %v6076_v3 = vld [vmem:[%s8695_s28] sm:$0xff]   ;;  %v6079_v6 = vld [vmem:[%s8695_s28 + $0xf0] sm:$0xff]  }
 0x157   :  { %v997_v8 = vpop.f32.mrf.mxu0  ;;  %v6073_v0 = vld [vmem:[%s8695_s28 + $0x48] sm:$0xff]   ;;  %v6077_v4 = vld [vmem:[%s8695_s28 + $0xf8] sm:$0xff]   ;;  %v6083_v12 = vld [vmem:[%s8695_s28 + $0xe0] sm:$0xff]  }
 0x158   :  { %v1038_v9 = vpop.f32.mrf.mxu1  ;;  %v1043_v17 = vpack.c.bf16 %v1036_v14, %v1036_v14  ;;  %1947 = vmatpush2.bf16.msra.mxu0 %v6010_v7  ;;  %v6074_v1 = vld [vmem:[%s8695_s28 + $0x8] sm:$0xff]   ;;  %v6078_v5 = vld [vmem:[%s8695_s28 + $0xb8] sm:$0xff]   ;;  %v6080_v7 = vld [vmem:[%s8695_s28 + $0xb0] sm:$0xff]  }
 0x159   :  { %5568 = vmatprep.subr.bf16.mxu0 %v6061_v25  ;;  %v6081_v10 = vld [vmem:[%s8695_s28 + $0xe8] sm:$0xff]   ;;  %v6084_v14 = vld [vmem:[%s8695_s28 + $0xa0] sm:$0xff]   ;;  %v6085_v8 = vld [vmem:[%s8695_s28 + $0xd8] sm:$0xff]  }
 0x15a   :  { %1907 = vmatprep.mubr.bf16.mxu1 %v1043_v17  ;;  %v6082_v11 = vld [vmem:[%s8695_s28 + $0xa8] sm:$0xff]   ;;  %v6086_v9 = vld [vmem:[%s8695_s28 + $0x98] sm:$0xff]   ;;  %v6092_v25 = vld [vmem:[%s8695_s28 + $0x80] sm:$0xff]  }
 0x15b   :  { %1949 = vmatmul.mubr.bf16.vlgmr.msra.gmra.mxu0 %v7331_v32  ;;  %1908 = vmatmul.mubr.bf16.vlgmr.msra.gmra.mxu1 %v7434_v19  ;;  %v6025_v32 = vld [vmem:[%s8693_s5 + $0x268] ss:$16 sps:$4 sm:$0xff]   ;;  %s6576_s5 = smov [#allocation2]  }
 0x15c   :  { %1958 = vmatpush1.bf16.msra.mxu1 %v6013_v18  ;;  %1989 = vmatprep.mubr.bf16.mxu1 %v1043_v17  ;;  %v6087_v17 = vld [vmem:[%s8695_s28 + $0xd0] sm:$0xff]   ;;  %s4959_s0 = sshll.u32 %s6576_s5, 4  ;;  %s4960_s0 = int_to_ptr.vmem [resolvable:$true] %s4959_s0 }
 0x15d   :  { %1959 = vmatprep.subr.bf16.mxu1 %v6018_v20  ;;  %5569 = vmatpush3.bf16.msra.mxu0 %v6062_v26  ;;  %v6088_v18 = vld [vmem:[%s8695_s28 + $0x90] sm:$0xff]   ;;  %v6089_v20 = vld [vmem:[%s8695_s28 + $0xc8] sm:$0xff]   ;;  %p6556_p1 = scmp.lt.s32.totalorder %s4960_s0, %s4960_s0 }
 0x15e   :  { %5570 = vmatprep.subr.bf16.mxu0 %v6063_v27  ;;  %v1172_v27 = vld [vmem:[%s8696_s29] sm:$0xf] }
 0x160   :  { %1960 = vmatpush1.bf16.msra.mxu1 %v6016_v21  ;;  %v6090_v21 = vld [vmem:[%s8695_s28 + $0x88] sm:$0xff]  }
 0x161   :  { %1961 = vmatprep.subr.bf16.mxu1 %v6021_v22  ;;  %5571 = vmatpush3.bf16.msra.mxu0 %v6064_v29  ;;  %v1181_v29 = vrot.slane %v1172_v27, %v7319_v16 }
 0x162   :  { %5572 = vmatprep.subr.bf16.mxu0 %v6065_v31 }
 0x164   :  { %1962 = vmatpush1.bf16.msra.mxu1 %v6019_v23 }
 0x165   :  { %1963 = vmatprep.subr.bf16.mxu1 %v6024_v24  ;;  %5573 = vmatpush3.bf16.msra.mxu0 %v6066_v33  ;;  %v6091_v24 = vld [vmem:[%s8695_s28 + $0xc0] sm:$0xff]  }
 0x166   :  { %5574 = vmatprep.subr.bf16.mxu0 %v6067_v35 }
 0x168   :  { %1964 = vmatpush1.bf16.msra.mxu1 %v6022_v28  ;;  %v1177_v28 = vrot.slane %v1172_v27, %v7316_v15 }
 0x169   :  { %1965 = vmatprep.subr.bf16.mxu1 %v6027_v30  ;;  %5575 = vmatpush3.bf16.msra.mxu0 %v6068_v37 }
 0x16a   :  { %5576 = vmatprep.subr.bf16.mxu0 %v6069_v39 }
 0x16c   :  { %1966 = vmatpush1.bf16.msra.mxu1 %v6025_v32 }
 0x16d   :  { %1967 = vmatprep.subr.bf16.mxu1 %v6030_v34  ;;  %5577 = vmatpush3.bf16.msra.mxu0 %v6070_v41 }
 0x16e   :  { %5578 = vmatprep.subr.bf16.mxu0 %v6071_v43 }
 0x170   :  { %1968 = vmatpush1.bf16.msra.mxu1 %v6028_v36 }
 0x171   :  { %1969 = vmatprep.subr.bf16.mxu1 %v6033_v38  ;;  %5579 = vmatpush3.bf16.msra.mxu0 %v6072_v63  ;;  %v6547_v38 = vld [vmem:[%s8692_s25] sm:$0xff] }
 0x172   :  { %5580 = vmatprep.subr.bf16.mxu0 %v6073_v0 }
 0x174   :  { %1970 = vmatpush1.bf16.msra.mxu1 %v6031_v40 }
 0x175   :  { %1971 = vmatprep.subr.bf16.mxu1 %v6036_v42  ;;  %5581 = vmatpush3.bf16.msra.mxu0 %v6074_v1  ;;  %v6548_v42 = vld [vmem:[%s8692_s25 + $0x8] sm:$0xff] }
 0x176   :  { %5582 = vmatprep.subr.bf16.mxu0 %v6075_v2  ;;  %v6573_v2 = vmov 0.0  }
 0x178   :  { %1972 = vmatpush1.bf16.msra.mxu1 %v6034_v44 }
 0x179   :  { %1973 = vmatprep.subr.bf16.mxu1 %v6039_v45  ;;  %5583 = vmatpush3.bf16.msra.mxu0 %v6076_v3  ;;  %v6093_v3 = vld [vmem:[%s8662_s9 + $0x18] sm:$0xff]  }
 0x17a   :  { %5661 = vmatprep.subr.bf16.mxu0 %v6573_v2 }
 0x17c   :  { %1974 = vmatpush2.bf16.msra.mxu1 %v6037_v46 }
 0x17d   :  { %1975 = vmatprep.subr.bf16.mxu1 %v6042_v47 }
 0x180   :  { %1976 = vmatpush2.bf16.msra.mxu1 %v6040_v48  ;;  %v1185_v48 = vrot.slane %v1172_v27, %v7407_v57 }
 0x181   :  { %1977 = vmatprep.subr.bf16.mxu1 %v6045_v49  ;;  %v1189_v49 = vrot.slane %v1172_v27, %v7413_v59 }
 0x184   :  { %1978 = vmatpush2.bf16.msra.mxu1 %v6043_v50 }
 0x185   :  { %1979 = vmatprep.subr.bf16.mxu1 %v6048_v51 }
 0x188   :  { %1980 = vmatpush2.bf16.msra.mxu1 %v6046_v52 }
 0x189   :  { %1981 = vmatprep.subr.bf16.mxu1 %v6051_v53 }
 0x18c   :  { %1982 = vmatpush2.bf16.msra.mxu1 %v6049_v54 }
 0x18d   :  { %1983 = vmatprep.subr.bf16.mxu1 %v6054_v55 }
 0x190   :  { %1984 = vmatpush2.bf16.msra.mxu1 %v6052_v56  ;;  %v6549_v56 = vld [vmem:[%s8692_s25 + $0x10] sm:$0xff] }
 0x191   :  { %1985 = vmatprep.subr.bf16.mxu1 %v6057_v58 }
 0x194   :  { %1986 = vmatpush2.bf16.msra.mxu1 %v6055_v60 }
 0x195   :  { %1987 = vmatprep.subr.bf16.mxu1 %v6060_v61  ;;  %v6550_v61 = vld [vmem:[%s8692_s25 + $0x18] sm:$0xff] }
 0x198   :  { %1988 = vmatpush2.bf16.msra.mxu1 %v6058_v62 }
 0x199   :  { %5590 = vmatprep.subr.bf16.mxu1 %v6077_v4  ;;  %v6094_v4 = vld [vmem:[%s8662_s9 + $0x10] sm:$0xff]  }
 0x19b   :  { %1990 = vmatmul.mubr.bf16.vlgmr.msra.gmra.mxu1 %v7434_v19 }
 0x19c   :  { %5591 = vmatpush3.bf16.msra.mxu1 %v6078_v5  ;;  %v6095_v5 = vld [vmem:[%s8662_s9 + $0x8] sm:$0xff]  }
 0x19d   :  { %5592 = vmatprep.subr.bf16.mxu1 %v6079_v6  ;;  %v6096_v6 = vld [vmem:[%s8662_s9] sm:$0xff]  }
 0x1a0   :  { %5593 = vmatpush3.bf16.msra.mxu1 %v6080_v7 }
 0x1a1   :  { %5594 = vmatprep.subr.bf16.mxu1 %v6081_v10 }
 0x1a4   :  { %5595 = vmatpush3.bf16.msra.mxu1 %v6082_v11 }
 0x1a5   :  { %5596 = vmatprep.subr.bf16.mxu1 %v6083_v12 }
 0x1a8   :  { %5597 = vmatpush3.bf16.msra.mxu1 %v6084_v14 }
 0x1a9   :  { %5598 = vmatprep.subr.bf16.mxu1 %v6085_v8  ;;  %v5225_v8 = vld [vmem:[%s8697_s7] ss:$0 sm:$0xff]  ;;  %s6551_s7 = scalar_lea.vmem %s4960_s0, 128 }
 0x1aa   :  { %p6552_p0 = scmp.ne.s32.totalorder %s4960_s0, %s6551_s7  ;;  %p6557_p2 = scmp.lt.s32.totalorder %s6551_s7, %s6551_s7 }
 0x1ac   :  { %5599 = vmatpush3.bf16.msra.mxu1 %v6086_v9  ;;  %p6558_p3 = por %p6557_p2, %p6556_p1 }
 0x1ad   :  { %5600 = vmatprep.subr.bf16.mxu1 %v6087_v17 }
 0x1ae   :  { %p6559_p4 = pnand %p6558_p3, %p6552_p0 }
 0x1b0   :  { %5601 = vmatpush3.bf16.msra.mxu1 %v6088_v18 }
 0x1b1   :  { %5602 = vmatprep.subr.bf16.mxu1 %v6089_v20  ;;  %v5258_v20 = vld [vmem:[%s8698_s8] ss:$0 sm:$0xff] }
 0x1b4   :  { %5603 = vmatpush3.bf16.msra.mxu1 %v6090_v21 }
 0x1b5   :  { %5604 = vmatprep.subr.bf16.mxu1 %v6091_v24 }
 0x1b8   :  { %5605 = vmatpush3.bf16.msra.mxu1 %v6092_v25 }
 0x1db   :  { %v1868_v19 = vpop.f32.mrf.mxu0 }
 0x1dc   :  { %v1869_v30 = vadd.f32 %v1868_v19, %v1177_v28 }
 0x1dd   :  { %v1870_v22 = vpop.f32.mrf.mxu0 }
 0x1de   :  { %v1871_v33 = vadd.f32 %v1870_v22, %v1181_v29  ;;  %v6099_v29 = vld [vmem:[%s8666_s13 + $0x14] ss:$8 sps:$4 sm:$0xff]  }
 0x1df   :  { %v1872_v23 = vpop.f32.mrf.mxu0  ;;  %2521 = vmatprep.subr.bf16.mxu1 %v6099_v29  ;;  %v6153_v29 = vld [vmem:[%s8670_s17 + $0x1e4] ss:$16 sps:$4 sm:$0xff]  }
 0x1e0   :  { %v5259_v23 = vld [vmem:[%s8699_s1] ss:$0 sm:$0xff] }
 0x1e1   :  { %v1873_v26 = vpop.f32.mrf.mxu0 }
 0x21b   :  { %v1950_v31 = vpop.f32.mrf.mxu0  ;;  %v1909_v32 = vpop.f32.mrf.mxu1 }
 0x21c   :  { %v1910_v34 = vadd.f32 %v1909_v32, %v1869_v30  ;;  %v1951_v50 = vadd.f32 %v1950_v31, %v1185_v48  ;;  %v6097_v30 = vld [vmem:[%s8666_s13 + $0x10] ss:$8 sps:$4 sm:$0xff]   ;;  %v6102_v31 = vld [vmem:[%s8666_s13 + $0x4] ss:$8 sps:$4 sm:$0xff]   ;;  %v6100_v32 = vld [vmem:[%s8666_s13] ss:$8 sps:$4 sm:$0xff]  }
 0x21d   :  { %v1952_v35 = vpop.f32.mrf.mxu0  ;;  %v1911_v36 = vpop.f32.mrf.mxu1  ;;  %v6142_v48 = vld [vmem:[%s8670_s17 + $0x28] ss:$16 sps:$4 sm:$0xff]  }
 0x21e   :  { %v1912_v37 = vadd.f32 %v1911_v36, %v1871_v33  ;;  %v1998_v39 = vadd.f32 %v6547_v38, %v1910_v34  ;;  %v1953_v52 = vadd.f32 %v1952_v35, %v1189_v49  ;;  %v6575_v33 = vmov 0   ;;  %v6105_v34 = vld [vmem:[%s8670_s17 + $0xe4] ss:$16 sps:$4 sm:$0xff]   ;;  %v6106_v35 = vld [vmem:[%s8670_s17 + $0xe8] ss:$16 sps:$4 sm:$0xff]  }
 0x21f   :  { %v1954_v40 = vpop.f32.mrf.mxu0  ;;  %v1913_v41 = vpop.f32.mrf.mxu1  ;;  %v6108_v36 = vld [vmem:[%s8670_s17 + $0xec] ss:$16 sps:$4 sm:$0xff]   ;;  %v6112_v38 = vld [vmem:[%s8670_s17 + $0xc8] ss:$16 sps:$4 sm:$0xff]  }
 0x220   :  { %v1999_v43 = vadd.f32 %v6548_v42, %v1912_v37  ;;  %v2002_v47 = vpack.c.bf16 %v1998_v39, %v1998_v39  ;;  %v6114_v37 = vld [vmem:[%s8670_s17 + $0xcc] ss:$16 sps:$4 sm:$0xff]   ;;  %v6118_v40 = vld [vmem:[%s8670_s17 + $0xa8] ss:$16 sps:$4 sm:$0xff]  }
 0x221   :  { %v1955_v44 = vpop.f32.mrf.mxu0  ;;  %v1914_v45 = vpop.f32.mrf.mxu1  ;;  %v6120_v39 = vld [vmem:[%s8670_s17 + $0xac] ss:$16 sps:$4 sm:$0xff]   ;;  %v6124_v42 = vld [vmem:[%s8670_s17 + $0x88] ss:$16 sps:$4 sm:$0xff]  }
 0x222   :  { %v2003_v46 = vpack.c.bf16 %v1999_v43, %v1999_v43  ;;  %v6126_v41 = vld [vmem:[%s8670_s17 + $0x8c] ss:$16 sps:$4 sm:$0xff]   ;;  %v6130_v44 = vld [vmem:[%s8670_s17 + $0x68] ss:$16 sps:$4 sm:$0xff]  }
 0x223   :  { %v6132_v43 = vld [vmem:[%s8670_s17 + $0x6c] ss:$16 sps:$4 sm:$0xff]  }
 0x224   :  { %2301 = vmatprep.mubr.bf16.mxu0 %v2003_v46  ;;  %v6138_v45 = vld [vmem:[%s8670_s17 + $0x4c] ss:$16 sps:$4 sm:$0xff]   ;;  %v6136_v46 = vld [vmem:[%s8670_s17 + $0x48] ss:$16 sps:$4 sm:$0xff]  }
 0x225   :  { %2302 = vmatmul.mubr.bf16.vlgmr.msra.gmra.mxu0 %v2002_v47  ;;  %v6144_v47 = vld [vmem:[%s8670_s17 + $0x2c] ss:$16 sps:$4 sm:$0xff]  }
 0x226   :  { %5662 = vmatpush3.bf16.msra.mxu0 %v6093_v3  ;;  %5669 = vmatprep.mubr.msk.bf16.mxu0 %vm6574_vm0, %v6573_v2  ;;  %v6150_v49 = vld [vmem:[%s8670_s17 + $0xc] ss:$16 sps:$4 sm:$0xff]   ;;  %v5267_v3 = vld [vmem:[%s8665_s12] ss:$0 sm:$0xff] }
 0x227   :  { %5663 = vmatprep.subr.bf16.mxu0 %v6573_v2 }
 0x22a   :  { %5664 = vmatpush3.bf16.msra.mxu0 %v6094_v4 }
 0x22b   :  { %5665 = vmatprep.subr.bf16.mxu0 %v6573_v2 }
 0x22e   :  { %5666 = vmatpush3.bf16.msra.mxu0 %v6095_v5 }
 0x22f   :  { %5667 = vmatprep.subr.bf16.mxu0 %v6573_v2 }
 0x232   :  { %5668 = vmatpush3.bf16.msra.mxu0 %v6096_v6 }
 0x233   :  { %3029 = vmatprep.subr.bf16.mxu0 %v6108_v36  ;;  %v6169_v36 = vld [vmem:[%s8670_s17 + $0x180] ss:$16 sps:$4 sm:$0xff]  }
 0x25b   :  { %v1991_v51 = vpop.f32.mrf.mxu1 }
 0x25c   :  { %v1992_v53 = vadd.f32 %v1991_v51, %v1951_v50  ;;  %v6148_v50 = vld [vmem:[%s8670_s17 + $0x8] ss:$16 sps:$4 sm:$0xff]   ;;  %v6156_v51 = vld [vmem:[%s8670_s17 + $0x1ec] ss:$16 sps:$4 sm:$0xff]  }
 0x25d   :  { %v1993_v54 = vpop.f32.mrf.mxu1 }
 0x25e   :  { %v1994_v55 = vadd.f32 %v1993_v54, %v1953_v52  ;;  %v2000_v58 = vadd.f32 %v6549_v56, %v1992_v53  ;;  %v6154_v52 = vld [vmem:[%s8670_s17 + $0x1e8] ss:$16 sps:$4 sm:$0xff]   ;;  %v6162_v53 = vld [vmem:[%s8670_s17 + $0x1cc] ss:$16 sps:$4 sm:$0xff]  }
 0x25f   :  { %v1995_v60 = vpop.f32.mrf.mxu1  ;;  %v6160_v54 = vld [vmem:[%s8670_s17 + $0x1c8] ss:$16 sps:$4 sm:$0xff]  }
 0x260   :  { %v2001_v62 = vadd.f32 %v6550_v61, %v1994_v55  ;;  %v2004_v1 = vpack.c.bf16 %v2000_v58, %v2000_v58  ;;  %v6168_v55 = vld [vmem:[%s8670_s17 + $0x1ac] ss:$16 sps:$4 sm:$0xff]   ;;  %v6166_v56 = vld [vmem:[%s8670_s17 + $0x1a8] ss:$16 sps:$4 sm:$0xff]  }
 0x261   :  { %v1996_v63 = vpop.f32.mrf.mxu1  ;;  %v6174_v58 = vld [vmem:[%s8670_s17 + $0x18c] ss:$16 sps:$4 sm:$0xff]   ;;  %v6172_v60 = vld [vmem:[%s8670_s17 + $0x188] ss:$16 sps:$4 sm:$0xff]  }
 0x262   :  { %v2005_v0 = vpack.c.bf16 %v2001_v62, %v2001_v62  ;;  %v6180_v61 = vld [vmem:[%s8670_s17 + $0x16c] ss:$16 sps:$4 sm:$0xff]   ;;  %v6178_v62 = vld [vmem:[%s8670_s17 + $0x168] ss:$16 sps:$4 sm:$0xff]   ;;  %v5260_v63 = vld [vmem:[%s8663_s10] ss:$0 sm:$0xff] }
 0x264   :  { %2341 = vmatprep.mubr.bf16.mxu1 %v2005_v0 }
 0x265   :  { %2342 = vmatmul.mubr.bf16.vlgmr.msra.gmra.mxu1 %v2004_v1  ;;  %v5266_v1 = vld [vmem:[%s8664_s11] ss:$0 sm:$0xff] }
 0x266   :  { %2522 = vmatpush1.bf16.msra.mxu1 %v6097_v30  ;;  %2541 = vmatprep.mubr.bf16.mxu1 %v6575_v33  ;;  %v6151_v30 = vld [vmem:[%s8670_s17 + $0x1e0] ss:$16 sps:$4 sm:$0xff]   ;;  %v6165_v33 = vld [vmem:[%s8670_s17 + $0x1a4] ss:$16 sps:$4 sm:$0xff]  }
 0x267   :  { %2523 = vmatprep.subr.bf16.mxu1 %v6102_v31  ;;  %v6159_v31 = vld [vmem:[%s8670_s17 + $0x1c4] ss:$16 sps:$4 sm:$0xff]  }
 0x26a   :  { %2524 = vmatpush1.bf16.msra.mxu1 %v6100_v32  ;;  %v6157_v32 = vld [vmem:[%s8670_s17 + $0x1c0] ss:$16 sps:$4 sm:$0xff]  }
 0x26b   :  { %2988 = vmatprep.subr.bf16.mxu1 %v6105_v34  ;;  %v6163_v34 = vld [vmem:[%s8670_s17 + $0x1a0] ss:$16 sps:$4 sm:$0xff]  }
 0x2e5   :  { %v5584_v7 = vpop.f32.mrf.mxu0 }
 0x2e7   :  { %v5585_v10 = vpop.f32.mrf.mxu0 }
 0x2e8   :  { %v5586_v14 = vadd.f32 %v5585_v10, %v5584_v7 }
 0x2e9   :  { %v5587_v11 = vpop.f32.mrf.mxu0 }
 0x2ea   :  { %v2304_v18 = vadd.f32 %v5586_v14, %v5225_v8  ;;  %v6111_v8 = vld [vmem:[%s8670_s17 + $0xc4] ss:$16 sps:$4 sm:$0xff]  }
 0x2eb   :  { %v5588_v12 = vpop.f32.mrf.mxu0 }
 0x2ec   :  { %v6103_v12 = vld [vmem:[%s8670_s17 + $0xe0] ss:$16 sps:$4 sm:$0xff]  }
 0x325   :  { %v5606_v9 = vpop.f32.mrf.mxu1 }
 0x327   :  { %v5607_v17 = vpop.f32.mrf.mxu1 }
 0x328   :  { %v5608_v19 = vadd.f32 %v5607_v17, %v5606_v9  ;;  %v6109_v9 = vld [vmem:[%s8670_s17 + $0xc0] ss:$16 sps:$4 sm:$0xff]   ;;  %v6117_v17 = vld [vmem:[%s8670_s17 + $0xa4] ss:$16 sps:$4 sm:$0xff]  }
 0x329   :  { %v5609_v21 = vpop.f32.mrf.mxu1 }
 0x32a   :  { %v2344_v22 = vadd.f32 %v5608_v19, %v2304_v18  ;;  %v6115_v18 = vld [vmem:[%s8670_s17 + $0xa0] ss:$16 sps:$4 sm:$0xff]   ;;  %v6123_v19 = vld [vmem:[%s8670_s17 + $0x84] ss:$16 sps:$4 sm:$0xff]  }
 0x32b   :  { %v5610_v24 = vpop.f32.mrf.mxu1  ;;  %v6129_v21 = vld [vmem:[%s8670_s17 + $0x64] ss:$16 sps:$4 sm:$0xff]  }
 0x32c   :  { %v2356_v25 = vmul.f32 %v5258_v20, %v2344_v22  ;;  %v6121_v20 = vld [vmem:[%s8670_s17 + $0x80] ss:$16 sps:$4 sm:$0xff]  }
 0x32d   :  { %v6127_v22 = vld [vmem:[%s8670_s17 + $0x60] ss:$16 sps:$4 sm:$0xff]  }
 0x32e   :  { %v2364_v26 = vadd.f32 %v5259_v23, %v2356_v25  ;;  %v6135_v23 = vld [vmem:[%s8670_s17 + $0x44] ss:$16 sps:$4 sm:$0xff]   ;;  %v6133_v24 = vld [vmem:[%s8670_s17 + $0x40] ss:$16 sps:$4 sm:$0xff]  }
 0x32f   :  { %v6141_v25 = vld [vmem:[%s8670_s17 + $0x24] ss:$16 sps:$4 sm:$0xff]  }
 0x330   :  { %v2365_v27 = vmax.f32 %v2364_v26, 0.0  ;;  %v6139_v26 = vld [vmem:[%s8670_s17 + $0x20] ss:$16 sps:$4 sm:$0xff]  }
 0x332   :  { %v2366_v28 = vpack.c.bf16 %v2365_v27, %v2365_v27  ;;  %v6147_v27 = vld [vmem:[%s8670_s17 + $0x4] ss:$16 sps:$4 sm:$0xff]  }
 0x334   :  { %5670 = vmatmul.mubr.msk.bf16.vlgmr.msra.gmra.mxu0 %vm2406_vm1, %v2366_v28  ;;  %v6145_v28 = vld [vmem:[%s8670_s17] ss:$16 sps:$4 sm:$0xff]  }
 0x335   :  { %3030 = vmatpush1.bf16.msra.mxu0 %v6106_v35  ;;  %v6171_v35 = vld [vmem:[%s8670_s17 + $0x184] ss:$16 sps:$4 sm:$0xff]  }
 0x336   :  { %3031 = vmatprep.subr.bf16.mxu0 %v6114_v37  ;;  %v6177_v37 = vld [vmem:[%s8670_s17 + $0x164] ss:$16 sps:$4 sm:$0xff]  }
 0x339   :  { %3032 = vmatpush1.bf16.msra.mxu0 %v6112_v38  ;;  %v6175_v38 = vld [vmem:[%s8670_s17 + $0x160] ss:$16 sps:$4 sm:$0xff]  }
 0x33a   :  { %3033 = vmatprep.subr.bf16.mxu0 %v6120_v39  ;;  %v6183_v39 = vld [vmem:[%s8670_s17 + $0x144] ss:$16 sps:$4 sm:$0xff]  }
 0x33d   :  { %3034 = vmatpush1.bf16.msra.mxu0 %v6118_v40  ;;  %v6186_v40 = vld [vmem:[%s8670_s17 + $0x14c] ss:$16 sps:$4 sm:$0xff]  }
 0x33e   :  { %3035 = vmatprep.subr.bf16.mxu0 %v6126_v41  ;;  %v6181_v41 = vld [vmem:[%s8670_s17 + $0x140] ss:$16 sps:$4 sm:$0xff]  }
 0x341   :  { %3036 = vmatpush1.bf16.msra.mxu0 %v6124_v42  ;;  %v6184_v42 = vld [vmem:[%s8670_s17 + $0x148] ss:$16 sps:$4 sm:$0xff]  }
 0x342   :  { %3037 = vmatprep.subr.bf16.mxu0 %v6132_v43  ;;  %v6189_v43 = vld [vmem:[%s8670_s17 + $0x124] ss:$16 sps:$4 sm:$0xff]  }
 0x345   :  { %3038 = vmatpush1.bf16.msra.mxu0 %v6130_v44  ;;  %v6192_v44 = vld [vmem:[%s8670_s17 + $0x12c] ss:$16 sps:$4 sm:$0xff]  }
 0x346   :  { %3039 = vmatprep.subr.bf16.mxu0 %v6138_v45  ;;  %v6187_v45 = vld [vmem:[%s8670_s17 + $0x120] ss:$16 sps:$4 sm:$0xff]  }
 0x349   :  { %3040 = vmatpush1.bf16.msra.mxu0 %v6136_v46  ;;  %v6190_v46 = vld [vmem:[%s8670_s17 + $0x128] ss:$16 sps:$4 sm:$0xff]  }
 0x34a   :  { %3041 = vmatprep.subr.bf16.mxu0 %v6144_v47  ;;  %v6195_v47 = vld [vmem:[%s8670_s17 + $0x104] ss:$16 sps:$4 sm:$0xff]  }
 0x34d   :  { %3042 = vmatpush1.bf16.msra.mxu0 %v6142_v48  ;;  %v6198_v48 = vld [vmem:[%s8670_s17 + $0x10c] ss:$16 sps:$4 sm:$0xff]  }
 0x34e   :  { %3043 = vmatprep.subr.bf16.mxu0 %v6150_v49  ;;  %v6193_v49 = vld [vmem:[%s8670_s17 + $0x100] ss:$16 sps:$4 sm:$0xff]  }
 0x351   :  { %3044 = vmatpush1.bf16.msra.mxu0 %v6148_v50  ;;  %v6196_v50 = vld [vmem:[%s8670_s17 + $0x108] ss:$16 sps:$4 sm:$0xff]  }
 0x352   :  { %3045 = vmatprep.subr.bf16.mxu0 %v6156_v51  ;;  %v6201_v51 = vld [vmem:[%s8674_s21 + $0x18c] ss:$28 sps:$4 sm:$0xff]  }
 0x355   :  { %3046 = vmatpush2.bf16.msra.mxu0 %v6154_v52  ;;  %v6204_v52 = vld [vmem:[%s8674_s21 + $0x50c] ss:$28 sps:$4 sm:$0xff]  }
 0x356   :  { %3047 = vmatprep.subr.bf16.mxu0 %v6162_v53  ;;  %v2474_v53 = vld [vmem:[%s8667_s14] sm:$0x3] }
 0x359   :  { %3048 = vmatpush2.bf16.msra.mxu0 %v6160_v54  ;;  %v2550_v54 = vld [vmem:[%s8668_s15] sm:$0x3] }
 0x35a   :  { %3049 = vmatprep.subr.bf16.mxu0 %v6168_v55  ;;  %v2479_v55 = vrot.slane %v2474_v53, %v7316_v15 }
 0x35d   :  { %3050 = vmatpush2.bf16.msra.mxu0 %v6166_v56  ;;  %v2564_v56 = vld [vmem:[%s8669_s16] sm:$0x3] }
 0x35e   :  { %3051 = vmatprep.subr.bf16.mxu0 %v6174_v58  ;;  %v2555_v58 = vrot.slane %v2550_v54, %v7316_v15 }
 0x361   :  { %3052 = vmatpush2.bf16.msra.mxu0 %v6172_v60  ;;  %v2483_v60 = vrot.slane %v2474_v53, %v7319_v16  ;;  %v6253_v53 = vld [vmem:[%s8674_s21 + $0x310] ss:$28 sps:$4 sm:$0xff]  }
 0x362   :  { %3053 = vmatprep.subr.bf16.mxu0 %v6180_v61 }
 0x365   :  { %3054 = vmatpush2.bf16.msra.mxu0 %v6178_v62 }
 0x366   :  { %3055 = vmatprep.subr.bf16.mxu0 %v6186_v40  ;;  %v6240_v40 = vld [vmem:[%s8674_s21 + $0x3bc] ss:$28 sps:$4 sm:$0xff]  }
 0x369   :  { %3056 = vmatpush2.bf16.msra.mxu0 %v6184_v42  ;;  %v6238_v42 = vld [vmem:[%s8674_s21 + $0x3b8] ss:$28 sps:$4 sm:$0xff]  }
 0x36a   :  { %3057 = vmatprep.subr.bf16.mxu0 %v6192_v44  ;;  %v6246_v44 = vld [vmem:[%s8674_s21 + $0x384] ss:$28 sps:$4 sm:$0xff]  }
 0x36d   :  { %3058 = vmatpush2.bf16.msra.mxu0 %v6190_v46  ;;  %v6244_v46 = vld [vmem:[%s8674_s21 + $0x380] ss:$28 sps:$4 sm:$0xff]  }
 0x36e   :  { %3059 = vmatprep.subr.bf16.mxu0 %v6198_v48  ;;  %v6252_v48 = vld [vmem:[%s8674_s21 + $0x6cc] ss:$28 sps:$4 sm:$0xff]  }
 0x371   :  { %3060 = vmatpush2.bf16.msra.mxu0 %v6196_v50  ;;  %v6250_v50 = vld [vmem:[%s8674_s21 + $0x6c8] ss:$28 sps:$4 sm:$0xff]  }
 0x372   :  { %4616 = vmatprep.subr.bf16.mxu0 %v6204_v52  ;;  %v6258_v52 = vld [vmem:[%s8674_s21 + $0x694] ss:$28 sps:$4 sm:$0xff]  }
 0x3f4   :  { %v2444_v0 = vpop.f32.mrf.mxu0 }
 0x3f5   :  { %v2445_v2 = vadd.f32 %v5260_v63, %v2444_v0  ;;  %v2569_v63 = vrot.slane %v2564_v56, %v7316_v15  ;;  %v2559_v0 = vrot.slane %v2550_v54, %v7319_v16  ;;  %v6256_v54 = vld [vmem:[%s8674_s21 + $0x690] ss:$28 sps:$4 sm:$0xff]  }
 0x3f6   :  { %v5671_v4 = vpop.f32.mrf.mxu0 }
 0x3f7   :  { %v2457_v5 = vmul.f32 %v5266_v1, %v2445_v2  ;;  %v2573_v4 = vrot.slane %v2564_v56, %v7319_v16  ;;  %v6264_v56 = vld [vmem:[%s8674_s21 + $0x65c] ss:$28 sps:$4 sm:$0xff]  }
 0x3f8   :  { %v2447_v6 = vpop.f32.mrf.mxu0 }
 0x3f9   :  { %v2465_v7 = vadd.f32 %v5267_v3, %v2457_v5 }
 0x3fa   :  { %v5672_v10 = vpop.f32.mrf.mxu0 }
 0x3fb   :  { %v2466_v11 = vmax.f32 %v2465_v7, 0.0 }
 0x3fd   :  { %v2469_v14 = vpack.c.bf16 %v2466_v11, %v2466_v11  ;;  %2468 = vst.msk [vmem:[#allocation2] sm:$0xff] %vm2467_vm2, %v2466_v11 }
 0x3ff   :  { %5272 = vmatmul.mubr.msk.bf16.vlgmr.msra.gmra.mxu1 %vm2467_vm2, %v2469_v14 }
 0x400   :  { %2989 = vmatpush1.bf16.msra.mxu1 %v6103_v12 }
 0x401   :  { %2990 = vmatprep.subr.bf16.mxu1 %v6111_v8 }
 0x404   :  { %2991 = vmatpush1.bf16.msra.mxu1 %v6109_v9  ;;  %v6199_v9 = vld [vmem:[%s8674_s21 + $0x188] ss:$28 sps:$4 sm:$0xff]  }
 0x405   :  { %2992 = vmatprep.subr.bf16.mxu1 %v6117_v17  ;;  %v6202_v17 = vld [vmem:[%s8674_s21 + $0x508] ss:$28 sps:$4 sm:$0xff]  }
 0x408   :  { %2993 = vmatpush1.bf16.msra.mxu1 %v6115_v18 }
 0x409   :  { %2994 = vmatprep.subr.bf16.mxu1 %v6123_v19  ;;  %v6207_v19 = vld [vmem:[%s8674_s21 + $0x154] ss:$28 sps:$4 sm:$0xff]  }
 0x40c   :  { %2995 = vmatpush1.bf16.msra.mxu1 %v6121_v20  ;;  %v6210_v20 = vld [vmem:[%s8674_s21 + $0x4d4] ss:$28 sps:$4 sm:$0xff]  }
 0x40d   :  { %2996 = vmatprep.subr.bf16.mxu1 %v6129_v21  ;;  %v6205_v21 = vld [vmem:[%s8674_s21 + $0x150] ss:$28 sps:$4 sm:$0xff]  }
 0x410   :  { %2997 = vmatpush1.bf16.msra.mxu1 %v6127_v22  ;;  %v6208_v22 = vld [vmem:[%s8674_s21 + $0x4d0] ss:$28 sps:$4 sm:$0xff]  }
 0x411   :  { %2998 = vmatprep.subr.bf16.mxu1 %v6135_v23  ;;  %v6213_v23 = vld [vmem:[%s8674_s21 + $0x11c] ss:$28 sps:$4 sm:$0xff]  }
 0x414   :  { %2999 = vmatpush1.bf16.msra.mxu1 %v6133_v24  ;;  %v6216_v24 = vld [vmem:[%s8674_s21 + $0x49c] ss:$28 sps:$4 sm:$0xff]  }
 0x415   :  { %3000 = vmatprep.subr.bf16.mxu1 %v6141_v25  ;;  %v6211_v25 = vld [vmem:[%s8674_s21 + $0x118] ss:$28 sps:$4 sm:$0xff]  }
 0x418   :  { %3001 = vmatpush1.bf16.msra.mxu1 %v6139_v26  ;;  %v6214_v26 = vld [vmem:[%s8674_s21 + $0x498] ss:$28 sps:$4 sm:$0xff]  }
 0x419   :  { %3002 = vmatprep.subr.bf16.mxu1 %v6147_v27  ;;  %v6219_v27 = vld [vmem:[%s8674_s21 + $0xe4] ss:$28 sps:$4 sm:$0xff]  }
 0x41c   :  { %3003 = vmatpush1.bf16.msra.mxu1 %v6145_v28  ;;  %v6222_v28 = vld [vmem:[%s8674_s21 + $0x464] ss:$28 sps:$4 sm:$0xff]  }
 0x41d   :  { %3004 = vmatprep.subr.bf16.mxu1 %v6153_v29  ;;  %v6217_v29 = vld [vmem:[%s8674_s21 + $0xe0] ss:$28 sps:$4 sm:$0xff]  }
 0x420   :  { %3005 = vmatpush2.bf16.msra.mxu1 %v6151_v30  ;;  %v6220_v30 = vld [vmem:[%s8674_s21 + $0x460] ss:$28 sps:$4 sm:$0xff]  }
 0x421   :  { %3006 = vmatprep.subr.bf16.mxu1 %v6159_v31  ;;  %v6225_v31 = vld [vmem:[%s8674_s21 + $0xac] ss:$28 sps:$4 sm:$0xff]  }
 0x424   :  { %3007 = vmatpush2.bf16.msra.mxu1 %v6157_v32  ;;  %v6228_v32 = vld [vmem:[%s8674_s21 + $0x42c] ss:$28 sps:$4 sm:$0xff]  }
 0x425   :  { %3008 = vmatprep.subr.bf16.mxu1 %v6165_v33  ;;  %v6223_v33 = vld [vmem:[%s8674_s21 + $0xa8] ss:$28 sps:$4 sm:$0xff]  }
 0x428   :  { %3009 = vmatpush2.bf16.msra.mxu1 %v6163_v34  ;;  %v6226_v34 = vld [vmem:[%s8674_s21 + $0x428] ss:$28 sps:$4 sm:$0xff]  }
 0x429   :  { %3010 = vmatprep.subr.bf16.mxu1 %v6171_v35  ;;  %v6231_v35 = vld [vmem:[%s8674_s21 + $0x74] ss:$28 sps:$4 sm:$0xff]  }
 0x42c   :  { %3011 = vmatpush2.bf16.msra.mxu1 %v6169_v36  ;;  %v6234_v36 = vld [vmem:[%s8674_s21 + $0x3f4] ss:$28 sps:$4 sm:$0xff]  }
 0x42d   :  { %3012 = vmatprep.subr.bf16.mxu1 %v6177_v37  ;;  %v6229_v37 = vld [vmem:[%s8674_s21 + $0x70] ss:$28 sps:$4 sm:$0xff]  }
 0x430   :  { %3013 = vmatpush2.bf16.msra.mxu1 %v6175_v38  ;;  %v6232_v38 = vld [vmem:[%s8674_s21 + $0x3f0] ss:$28 sps:$4 sm:$0xff]  }
 0x431   :  { %3014 = vmatprep.subr.bf16.mxu1 %v6183_v39  ;;  %v6237_v39 = vld [vmem:[%s8674_s21 + $0x3c] ss:$28 sps:$4 sm:$0xff]  }
 0x434   :  { %3015 = vmatpush2.bf16.msra.mxu1 %v6181_v41  ;;  %v6235_v41 = vld [vmem:[%s8674_s21 + $0x38] ss:$28 sps:$4 sm:$0xff]  }
 0x435   :  { %3016 = vmatprep.subr.bf16.mxu1 %v6189_v43  ;;  %v6243_v43 = vld [vmem:[%s8674_s21 + $0x4] ss:$28 sps:$4 sm:$0xff]  }
 0x438   :  { %3017 = vmatpush2.bf16.msra.mxu1 %v6187_v45  ;;  %v6241_v45 = vld [vmem:[%s8674_s21] ss:$28 sps:$4 sm:$0xff]  }
 0x439   :  { %3018 = vmatprep.subr.bf16.mxu1 %v6195_v47  ;;  %v6249_v47 = vld [vmem:[%s8674_s21 + $0x34c] ss:$28 sps:$4 sm:$0xff]  }
 0x43c   :  { %3019 = vmatpush2.bf16.msra.mxu1 %v6193_v49  ;;  %v6247_v49 = vld [vmem:[%s8674_s21 + $0x348] ss:$28 sps:$4 sm:$0xff]  }
 0x43d   :  { %4575 = vmatprep.subr.bf16.mxu1 %v6201_v51  ;;  %v6255_v51 = vld [vmem:[%s8674_s21 + $0x314] ss:$28 sps:$4 sm:$0xff]  }
 0x4bf   :  { %v2543_v61 = vpop.f32.mrf.mxu1 }
 0x4c0   :  { %v2544_v62 = vadd.f32 %v2543_v61, %v2479_v55  ;;  %v6261_v55 = vld [vmem:[%s8674_s21 + $0x2dc] ss:$28 sps:$4 sm:$0xff]   ;;  %v6267_v61 = vld [vmem:[%s8674_s21 + $0x2a4] ss:$28 sps:$4 sm:$0xff]  }
 0x4c1   :  { %v2545_v1 = vpop.f32.mrf.mxu1 }
 0x4c2   :  { %v2562_v2 = vmul.f32 %v2555_v58, %v2544_v62  ;;  %v2546_v3 = vadd.f32 %v2545_v1, %v2483_v60  ;;  %v6259_v58 = vld [vmem:[%s8674_s21 + $0x2d8] ss:$28 sps:$4 sm:$0xff]   ;;  %v6270_v62 = vld [vmem:[%s8674_s21 + $0x624] ss:$28 sps:$4 sm:$0xff]   ;;  %v6273_v1 = vld [vmem:[%s8674_s21 + $0x26c] ss:$28 sps:$4 sm:$0xff]  }
 0x4c3   :  { %v2547_v5 = vpop.f32.mrf.mxu1  ;;  %v6262_v60 = vld [vmem:[%s8674_s21 + $0x658] ss:$28 sps:$4 sm:$0xff]  }
 0x4c4   :  { %v2576_v6 = vadd.f32 %v2569_v63, %v2562_v2  ;;  %v2563_v7 = vmul.f32 %v2559_v0, %v2546_v3  ;;  %v6265_v63 = vld [vmem:[%s8674_s21 + $0x2a0] ss:$28 sps:$4 sm:$0xff]   ;;  %v6276_v2 = vld [vmem:[%s8674_s21 + $0x5ec] ss:$28 sps:$4 sm:$0xff]   ;;  %v6279_v5 = vld [vmem:[%s8674_s21 + $0x234] ss:$28 sps:$4 sm:$0xff]  }
 0x4c5   :  { %v2548_v10 = vpop.f32.mrf.mxu1  ;;  %v6268_v0 = vld [vmem:[%s8674_s21 + $0x620] ss:$28 sps:$4 sm:$0xff]   ;;  %v6271_v3 = vld [vmem:[%s8674_s21 + $0x268] ss:$28 sps:$4 sm:$0xff]  }
 0x4c6   :  { %v2577_v11 = vadd.f32 %v2573_v4, %v2563_v7  ;;  %v2578_v12 = vmax.f32 %v2576_v6, 0.0  ;;  %v6274_v4 = vld [vmem:[%s8674_s21 + $0x5e8] ss:$28 sps:$4 sm:$0xff]   ;;  %v6282_v6 = vld [vmem:[%s8674_s21 + $0x5b4] ss:$28 sps:$4 sm:$0xff]  }
 0x4c7   :  { %v6277_v7 = vld [vmem:[%s8674_s21 + $0x230] ss:$28 sps:$4 sm:$0xff]  }
 0x4c8   :  { %v2579_v14 = vmax.f32 %v2577_v11, 0.0  ;;  %v2580_v18 = vpack.c.bf16 %v2578_v12, %v2578_v12  ;;  %v6280_v10 = vld [vmem:[%s8674_s21 + $0x5b0] ss:$28 sps:$4 sm:$0xff]   ;;  %v6285_v11 = vld [vmem:[%s8674_s21 + $0x1fc] ss:$28 sps:$4 sm:$0xff]  }
 0x4c9   :  { %v6288_v12 = vld [vmem:[%s8674_s21 + $0x57c] ss:$28 sps:$4 sm:$0xff]  }
 0x4ca   :  { %v2581_v8 = vpack.c.bf16 %v2579_v14, %v2579_v14  ;;  %v6283_v14 = vld [vmem:[%s8674_s21 + $0x1f8] ss:$28 sps:$4 sm:$0xff]  }
 0x4cc   :  { %3020 = vmatprep.mubr.bf16.mxu1 %v2581_v8  ;;  %3061 = vmatprep.mubr.bf16.mxu0 %v2581_v8  ;;  %v6286_v8 = vld [vmem:[%s8674_s21 + $0x578] ss:$28 sps:$4 sm:$0xff]  }
 0x4cd   :  { %3021 = vmatmul.mubr.bf16.vlgmr.msra.gmra.mxu1 %v2580_v18  ;;  %3062 = vmatmul.mubr.bf16.vlgmr.msra.gmra.mxu0 %v2580_v18  ;;  %v6289_v18 = vld [vmem:[%s8674_s21 + $0x1c0] ss:$28 sps:$4 sm:$0xff]  }
 0x4ce   :  { %4576 = vmatpush1.bf16.msra.mxu1 %v6199_v9  ;;  %4617 = vmatpush1.bf16.msra.mxu0 %v6202_v17  ;;  %v6291_v9 = vld [vmem:[%s8674_s21 + $0x1c4] ss:$28 sps:$4 sm:$0xff]  }
 0x4cf   :  { %4577 = vmatprep.subr.bf16.mxu1 %v6207_v19  ;;  %4618 = vmatprep.subr.bf16.mxu0 %v6210_v20  ;;  %v6294_v17 = vld [vmem:[%s8674_s21 + $0x544] ss:$28 sps:$4 sm:$0xff]   ;;  %v6297_v20 = vld [vmem:[%s8674_s21 + $0x194] ss:$28 sps:$4 sm:$0xff]  }
 0x4d0   :  { %v6292_v19 = vld [vmem:[%s8674_s21 + $0x540] ss:$28 sps:$4 sm:$0xff]  }
 0x4d2   :  { %4578 = vmatpush1.bf16.msra.mxu1 %v6205_v21  ;;  %4619 = vmatpush1.bf16.msra.mxu0 %v6208_v22  ;;  %v6300_v21 = vld [vmem:[%s8674_s21 + $0x514] ss:$28 sps:$4 sm:$0xff]   ;;  %v2646_v22 = vld [vmem:[%s8671_s18] sm:$0xf] }
 0x4d3   :  { %4579 = vmatprep.subr.bf16.mxu1 %v6213_v23  ;;  %4620 = vmatprep.subr.bf16.mxu0 %v6216_v24  ;;  %v3070_v23 = vld [vmem:[%s8672_s19] sm:$0xf]  ;;  %v2651_v24 = vrot.slane %v2646_v22, %v7316_v15 }
 0x4d6   :  { %4580 = vmatpush1.bf16.msra.mxu1 %v6211_v25  ;;  %4621 = vmatpush1.bf16.msra.mxu0 %v6214_v26  ;;  %v3096_v25 = vld [vmem:[%s8673_s20] sm:$0xf]  ;;  %v2659_v26 = vrot.slane %v2646_v22, %v7407_v57 }
 0x4d7   :  { %4581 = vmatprep.subr.bf16.mxu1 %v6219_v27  ;;  %4622 = vmatprep.subr.bf16.mxu0 %v6222_v28  ;;  %v3075_v27 = vrot.slane %v3070_v23, %v7316_v15  ;;  %v3083_v28 = vrot.slane %v3070_v23, %v7407_v57 }
 0x4da   :  { %4582 = vmatpush1.bf16.msra.mxu1 %v6217_v29  ;;  %4623 = vmatpush1.bf16.msra.mxu0 %v6220_v30  ;;  %v2655_v29 = vrot.slane %v2646_v22, %v7319_v16  ;;  %v2663_v30 = vrot.slane %v2646_v22, %v7413_v59  ;;  %v6319_v22 = vld [vmem:[%s8674_s21 + $0xb0] ss:$28 sps:$4 sm:$0xff]  }
 0x4db   :  { %4583 = vmatprep.subr.bf16.mxu1 %v6225_v31  ;;  %4624 = vmatprep.subr.bf16.mxu0 %v6228_v32  ;;  %v3101_v32 = vrot.slane %v3096_v25, %v7316_v15 }
 0x4de   :  { %4584 = vmatpush1.bf16.msra.mxu1 %v6223_v33  ;;  %4625 = vmatpush1.bf16.msra.mxu0 %v6226_v34  ;;  %v3109_v34 = vrot.slane %v3096_v25, %v7407_v57 }
 0x4df   :  { %4585 = vmatprep.subr.bf16.mxu1 %v6231_v35  ;;  %4626 = vmatprep.subr.bf16.mxu0 %v6234_v36 }
 0x4e2   :  { %4586 = vmatpush1.bf16.msra.mxu1 %v6229_v37  ;;  %4627 = vmatpush1.bf16.msra.mxu0 %v6232_v38  ;;  %v3079_v37 = vrot.slane %v3070_v23, %v7319_v16  ;;  %v3087_v38 = vrot.slane %v3070_v23, %v7413_v59  ;;  %v6322_v23 = vld [vmem:[%s8674_s21 + $0x430] ss:$28 sps:$4 sm:$0xff]  }
 0x4e3   :  { %4587 = vmatprep.subr.bf16.mxu1 %v6237_v39  ;;  %4628 = vmatprep.subr.bf16.mxu0 %v6240_v40  ;;  %v3105_v40 = vrot.slane %v3096_v25, %v7319_v16 }
 0x4e6   :  { %4588 = vmatpush1.bf16.msra.mxu1 %v6235_v41  ;;  %4629 = vmatpush1.bf16.msra.mxu0 %v6238_v42  ;;  %v3113_v42 = vrot.slane %v3096_v25, %v7413_v59  ;;  %v6330_v25 = vld [vmem:[%s8674_s21 + $0x3fc] ss:$28 sps:$4 sm:$0xff]  }
 0x4e7   :  { %4589 = vmatprep.subr.bf16.mxu1 %v6243_v43  ;;  %4630 = vmatprep.subr.bf16.mxu0 %v6246_v44 }
 0x4ea   :  { %4590 = vmatpush1.bf16.msra.mxu1 %v6241_v45  ;;  %4631 = vmatpush1.bf16.msra.mxu0 %v6244_v46 }
 0x4eb   :  { %4591 = vmatprep.subr.bf16.mxu1 %v6249_v47  ;;  %4632 = vmatprep.subr.bf16.mxu0 %v6252_v48 }
 0x4ee   :  { %4592 = vmatpush2.bf16.msra.mxu1 %v6247_v49  ;;  %4633 = vmatpush2.bf16.msra.mxu0 %v6250_v50 }
 0x4ef   :  { %4593 = vmatprep.subr.bf16.mxu1 %v6255_v51  ;;  %4634 = vmatprep.subr.bf16.mxu0 %v6258_v52 }
 0x4f2   :  { %4594 = vmatpush2.bf16.msra.mxu1 %v6253_v53  ;;  %4635 = vmatpush2.bf16.msra.mxu0 %v6256_v54 }
 0x4f3   :  { %4595 = vmatprep.subr.bf16.mxu1 %v6261_v55  ;;  %4636 = vmatprep.subr.bf16.mxu0 %v6264_v56 }
 0x4f6   :  { %4596 = vmatpush2.bf16.msra.mxu1 %v6259_v58  ;;  %4637 = vmatpush2.bf16.msra.mxu0 %v6262_v60 }
 0x4f7   :  { %4597 = vmatprep.subr.bf16.mxu1 %v6267_v61  ;;  %4638 = vmatprep.subr.bf16.mxu0 %v6270_v62 }
 0x4fa   :  { %4598 = vmatpush2.bf16.msra.mxu1 %v6265_v63  ;;  %4639 = vmatpush2.bf16.msra.mxu0 %v6268_v0 }
 0x4fb   :  { %4599 = vmatprep.subr.bf16.mxu1 %v6273_v1  ;;  %4640 = vmatprep.subr.bf16.mxu0 %v6276_v2  ;;  %v6295_v1 = vld [vmem:[%s8674_s21 + $0x190] ss:$28 sps:$4 sm:$0xff]  }
 0x4fc   :  { %v6298_v2 = vld [vmem:[%s8674_s21 + $0x510] ss:$28 sps:$4 sm:$0xff]  }
 0x4fe   :  { %4600 = vmatpush2.bf16.msra.mxu1 %v6271_v3  ;;  %4641 = vmatpush2.bf16.msra.mxu0 %v6274_v4 }
 0x4ff   :  { %4601 = vmatprep.subr.bf16.mxu1 %v6279_v5  ;;  %4642 = vmatprep.subr.bf16.mxu0 %v6282_v6  ;;  %v6303_v5 = vld [vmem:[%s8674_s21 + $0x15c] ss:$28 sps:$4 sm:$0xff]  }
 0x500   :  { %v6306_v6 = vld [vmem:[%s8674_s21 + $0x4dc] ss:$28 sps:$4 sm:$0xff]  }
 0x502   :  { %4602 = vmatpush2.bf16.msra.mxu1 %v6277_v7  ;;  %4643 = vmatpush2.bf16.msra.mxu0 %v6280_v10  ;;  %v6301_v7 = vld [vmem:[%s8674_s21 + $0x158] ss:$28 sps:$4 sm:$0xff]  }
 0x503   :  { %4603 = vmatprep.subr.bf16.mxu1 %v6285_v11  ;;  %4644 = vmatprep.subr.bf16.mxu0 %v6288_v12  ;;  %v6304_v10 = vld [vmem:[%s8674_s21 + $0x4d8] ss:$28 sps:$4 sm:$0xff]   ;;  %v6309_v11 = vld [vmem:[%s8674_s21 + $0x124] ss:$28 sps:$4 sm:$0xff]  }
 0x504   :  { %v6312_v12 = vld [vmem:[%s8674_s21 + $0x4a4] ss:$28 sps:$4 sm:$0xff]  }
 0x506   :  { %4604 = vmatpush2.bf16.msra.mxu1 %v6283_v14  ;;  %4645 = vmatpush2.bf16.msra.mxu0 %v6286_v8  ;;  %v6307_v14 = vld [vmem:[%s8674_s21 + $0x120] ss:$28 sps:$4 sm:$0xff]  }
 0x507   :  { %4605 = vmatprep.subr.bf16.mxu1 %v6291_v9  ;;  %4646 = vmatprep.subr.bf16.mxu0 %v6294_v17  ;;  %v6310_v8 = vld [vmem:[%s8674_s21 + $0x4a0] ss:$28 sps:$4 sm:$0xff]   ;;  %v6315_v9 = vld [vmem:[%s8674_s21 + $0xec] ss:$28 sps:$4 sm:$0xff]  }
 0x508   :  { %v6318_v17 = vld [vmem:[%s8674_s21 + $0x46c] ss:$28 sps:$4 sm:$0xff]  }
 0x50a   :  { %4606 = vmatpush2.bf16.msra.mxu1 %v6289_v18  ;;  %4647 = vmatpush2.bf16.msra.mxu0 %v6292_v19  ;;  %v6313_v18 = vld [vmem:[%s8674_s21 + $0xe8] ss:$28 sps:$4 sm:$0xff]  }
 0x50b   :  { %4657 = vmatprep.subr.bf16.mxu1 %v6297_v20  ;;  %4698 = vmatprep.subr.bf16.mxu0 %v6300_v21  ;;  %v6316_v19 = vld [vmem:[%s8674_s21 + $0x468] ss:$28 sps:$4 sm:$0xff]   ;;  %v6321_v20 = vld [vmem:[%s8674_s21 + $0xb4] ss:$28 sps:$4 sm:$0xff]  }
 0x50c   :  { %v6324_v21 = vld [vmem:[%s8674_s21 + $0x434] ss:$28 sps:$4 sm:$0xff]  }
 0x58d   :  { %v3022_v31 = vpop.f32.mrf.mxu1  ;;  %v3063_v33 = vpop.f32.mrf.mxu0 }
 0x58e   :  { %v3023_v35 = vadd.f32 %v3022_v31, %v2651_v24  ;;  %v3064_v36 = vadd.f32 %v3063_v33, %v2659_v26  ;;  %v6327_v24 = vld [vmem:[%s8674_s21 + $0x7c] ss:$28 sps:$4 sm:$0xff]   ;;  %v6342_v33 = vld [vmem:[%s8674_s21 + $0x38c] ss:$28 sps:$4 sm:$0xff]  }
 0x58f   :  { %v3024_v39 = vpop.f32.mrf.mxu1  ;;  %v3065_v41 = vpop.f32.mrf.mxu0  ;;  %v6325_v26 = vld [vmem:[%s8674_s21 + $0x78] ss:$28 sps:$4 sm:$0xff]   ;;  %v6334_v31 = vld [vmem:[%s8674_s21 + $0x3c0] ss:$28 sps:$4 sm:$0xff]  }
 0x590   :  { %v3092_v43 = vmul.f32 %v3075_v27, %v3023_v35  ;;  %v3094_v44 = vmul.f32 %v3083_v28, %v3064_v36  ;;  %v3025_v45 = vadd.f32 %v3024_v39, %v2655_v29  ;;  %v3066_v46 = vadd.f32 %v3065_v41, %v2663_v30  ;;  %v6328_v27 = vld [vmem:[%s8674_s21 + $0x3f8] ss:$28 sps:$4 sm:$0xff]   ;;  %v6333_v28 = vld [vmem:[%s8674_s21 + $0x44] ss:$28 sps:$4 sm:$0xff]   ;;  %v6346_v39 = vld [vmem:[%s8674_s21 + $0x6d0] ss:$28 sps:$4 sm:$0xff]  }
 0x591   :  { %v3026_v47 = vpop.f32.mrf.mxu1  ;;  %v3067_v48 = vpop.f32.mrf.mxu0  ;;  %v6336_v29 = vld [vmem:[%s8674_s21 + $0x3c4] ss:$28 sps:$4 sm:$0xff]   ;;  %v6345_v36 = vld [vmem:[%s8674_s21 + $0x354] ss:$28 sps:$4 sm:$0xff]   ;;  %v6354_v41 = vld [vmem:[%s8674_s21 + $0x69c] ss:$28 sps:$4 sm:$0xff]  }
 0x592   :  { %v3118_v49 = vadd.f32 %v3101_v32, %v3092_v43  ;;  %v3120_v50 = vadd.f32 %v3109_v34, %v3094_v44  ;;  %v3093_v51 = vmul.f32 %v3079_v37, %v3025_v45  ;;  %v3095_v52 = vmul.f32 %v3087_v38, %v3066_v46  ;;  %v6331_v30 = vld [vmem:[%s8674_s21 + $0x40] ss:$28 sps:$4 sm:$0xff]   ;;  %v6339_v32 = vld [vmem:[%s8674_s21 + $0xc] ss:$28 sps:$4 sm:$0xff]   ;;  %v6348_v37 = vld [vmem:[%s8674_s21 + $0x6d4] ss:$28 sps:$4 sm:$0xff]  }
 0x593   :  { %v3027_v53 = vpop.f32.mrf.mxu1  ;;  %v3068_v54 = vpop.f32.mrf.mxu0  ;;  %v6337_v34 = vld [vmem:[%s8674_s21 + $0x8] ss:$28 sps:$4 sm:$0xff]   ;;  %v6343_v38 = vld [vmem:[%s8674_s21 + $0x350] ss:$28 sps:$4 sm:$0xff]   ;;  %v6352_v43 = vld [vmem:[%s8674_s21 + $0x698] ss:$28 sps:$4 sm:$0xff]  }
 0x594   :  { %v3119_v55 = vadd.f32 %v3105_v40, %v3093_v51  ;;  %v3121_v56 = vadd.f32 %v3113_v42, %v3095_v52  ;;  %v3122_v58 = vmax.f32 %v3118_v49, 0.0  ;;  %v3124_v60 = vmax.f32 %v3120_v50, 0.0  ;;  %v6340_v35 = vld [vmem:[%s8674_s21 + $0x388] ss:$28 sps:$4 sm:$0xff]   ;;  %v6351_v40 = vld [vmem:[%s8674_s21 + $0x31c] ss:$28 sps:$4 sm:$0xff]  }
 0x595   :  { %v6349_v42 = vld [vmem:[%s8674_s21 + $0x318] ss:$28 sps:$4 sm:$0xff]   ;;  %v6357_v44 = vld [vmem:[%s8674_s21 + $0x2e4] ss:$28 sps:$4 sm:$0xff]   ;;  %v6363_v48 = vld [vmem:[%s8674_s21 + $0x2ac] ss:$28 sps:$4 sm:$0xff]  }
 0x596   :  { %v3123_v61 = vmax.f32 %v3119_v55, 0.0  ;;  %v3125_v62 = vmax.f32 %v3121_v56, 0.0  ;;  %v8122_v3 = vpack.c.bf16 %v3122_v58, %v3122_v58  ;;  %v8124_v4 = vpack.c.bf16 %v3124_v60, %v3124_v60  ;;  %v6360_v45 = vld [vmem:[%s8674_s21 + $0x664] ss:$28 sps:$4 sm:$0xff]   ;;  %v6366_v49 = vld [vmem:[%s8674_s21 + $0x62c] ss:$28 sps:$4 sm:$0xff]  }
 0x597   :  { %v6355_v46 = vld [vmem:[%s8674_s21 + $0x2e0] ss:$28 sps:$4 sm:$0xff]   ;;  %v6361_v50 = vld [vmem:[%s8674_s21 + $0x2a8] ss:$28 sps:$4 sm:$0xff]   ;;  %v6369_v52 = vld [vmem:[%s8674_s21 + $0x274] ss:$28 sps:$4 sm:$0xff]  }
 0x598   :  { %v8112_v63 = vpack.c.bf16 %v3123_v61, %v3123_v61  ;;  %v8114_v0 = vpack.c.bf16 %v3125_v62, %v3125_v62  ;;  %v6358_v47 = vld [vmem:[%s8674_s21 + $0x660] ss:$28 sps:$4 sm:$0xff]   ;;  %v6364_v51 = vld [vmem:[%s8674_s21 + $0x628] ss:$28 sps:$4 sm:$0xff]   ;;  %v6372_v53 = vld [vmem:[%s8674_s21 + $0x5f4] ss:$28 sps:$4 sm:$0xff]  }
 0x599   :  { %v6367_v54 = vld [vmem:[%s8674_s21 + $0x270] ss:$28 sps:$4 sm:$0xff]   ;;  %v6375_v56 = vld [vmem:[%s8674_s21 + $0x23c] ss:$28 sps:$4 sm:$0xff]   ;;  %v6381_v62 = vld [vmem:[%s8674_s21 + $0x204] ss:$28 sps:$4 sm:$0xff]  }
 0x59a   :  { %4607 = vmatprep.mubr.bf16.mxu1 %v8112_v63  ;;  %4648 = vmatprep.mubr.bf16.mxu0 %v8114_v0  ;;  %v6370_v55 = vld [vmem:[%s8674_s21 + $0x5f0] ss:$28 sps:$4 sm:$0xff]   ;;  %v6378_v58 = vld [vmem:[%s8674_s21 + $0x5bc] ss:$28 sps:$4 sm:$0xff]  }
 0x59b   :  { %4608 = vmatmul.mubr.bf16.vlgmr.msra.gmra.mxu1 %v8122_v3  ;;  %4649 = vmatmul.mubr.bf16.vlgmr.msra.gmra.mxu0 %v8124_v4  ;;  %v6373_v60 = vld [vmem:[%s8674_s21 + $0x238] ss:$28 sps:$4 sm:$0xff]  }
 0x59c   :  { %4658 = vmatpush1.bf16.msra.mxu1 %v6295_v1  ;;  %4699 = vmatpush1.bf16.msra.mxu0 %v6298_v2  ;;  %v6376_v61 = vld [vmem:[%s8674_s21 + $0x5b8] ss:$28 sps:$4 sm:$0xff]   ;;  %v6384_v1 = vld [vmem:[%s8674_s21 + $0x584] ss:$28 sps:$4 sm:$0xff]  }
 0x59d   :  { %4689 = vmatprep.mubr.bf16.mxu1 %v8112_v63  ;;  %4730 = vmatprep.mubr.bf16.mxu0 %v8114_v0  ;;  %v6379_v2 = vld [vmem:[%s8674_s21 + $0x200] ss:$28 sps:$4 sm:$0xff]  }
 0x59e   :  { %4659 = vmatprep.subr.bf16.mxu1 %v6303_v5  ;;  %4700 = vmatprep.subr.bf16.mxu0 %v6306_v6  ;;  %v6382_v5 = vld [vmem:[%s8674_s21 + $0x580] ss:$28 sps:$4 sm:$0xff]   ;;  %v6387_v6 = vld [vmem:[%s8674_s21 + $0x1cc] ss:$28 sps:$4 sm:$0xff]  }
 0x5a0   :  { %4660 = vmatpush1.bf16.msra.mxu1 %v6301_v7  ;;  %4701 = vmatpush1.bf16.msra.mxu0 %v6304_v10  ;;  %v6390_v7 = vld [vmem:[%s8674_s21 + $0x54c] ss:$28 sps:$4 sm:$0xff]  }
 0x5a1   :  { %4661 = vmatprep.subr.bf16.mxu1 %v6309_v11  ;;  %4702 = vmatprep.subr.bf16.mxu0 %v6312_v12  ;;  %v6385_v10 = vld [vmem:[%s8674_s21 + $0x1c8] ss:$28 sps:$4 sm:$0xff]   ;;  %v6393_v12 = vld [vmem:[%s8674_s21 + $0x19c] ss:$28 sps:$4 sm:$0xff]  }
 0x5a2   :  { %v6388_v11 = vld [vmem:[%s8674_s21 + $0x548] ss:$28 sps:$4 sm:$0xff]  }
 0x5a4   :  { %4662 = vmatpush1.bf16.msra.mxu1 %v6307_v14  ;;  %4703 = vmatpush1.bf16.msra.mxu0 %v6310_v8  ;;  %v6396_v14 = vld [vmem:[%s8674_s21 + $0x51c] ss:$28 sps:$4 sm:$0xff]  }
 0x5a5   :  { %4663 = vmatprep.subr.bf16.mxu1 %v6315_v9  ;;  %4704 = vmatprep.subr.bf16.mxu0 %v6318_v17  ;;  %v6391_v8 = vld [vmem:[%s8674_s21 + $0x198] ss:$28 sps:$4 sm:$0xff]   ;;  %v6399_v17 = vld [vmem:[%s8674_s21 + $0x164] ss:$28 sps:$4 sm:$0xff]  }
 0x5a6   :  { %v6394_v9 = vld [vmem:[%s8674_s21 + $0x518] ss:$28 sps:$4 sm:$0xff]  }
 0x5a8   :  { %4664 = vmatpush1.bf16.msra.mxu1 %v6313_v18  ;;  %4705 = vmatpush1.bf16.msra.mxu0 %v6316_v19  ;;  %v6402_v18 = vld [vmem:[%s8674_s21 + $0x4e4] ss:$28 sps:$4 sm:$0xff]  }
 0x5a9   :  { %4665 = vmatprep.subr.bf16.mxu1 %v6321_v20  ;;  %4706 = vmatprep.subr.bf16.mxu0 %v6324_v21  ;;  %v6397_v19 = vld [vmem:[%s8674_s21 + $0x160] ss:$28 sps:$4 sm:$0xff]   ;;  %v6405_v21 = vld [vmem:[%s8674_s21 + $0x12c] ss:$28 sps:$4 sm:$0xff]  }
 0x5aa   :  { %v6400_v20 = vld [vmem:[%s8674_s21 + $0x4e0] ss:$28 sps:$4 sm:$0xff]  }
 0x5ac   :  { %4666 = vmatpush1.bf16.msra.mxu1 %v6319_v22  ;;  %4707 = vmatpush1.bf16.msra.mxu0 %v6322_v23  ;;  %v6408_v22 = vld [vmem:[%s8674_s21 + $0x4ac] ss:$28 sps:$4 sm:$0xff]  }
 0x5ad   :  { %4667 = vmatprep.subr.bf16.mxu1 %v6327_v24  ;;  %4708 = vmatprep.subr.bf16.mxu0 %v6330_v25  ;;  %v6403_v23 = vld [vmem:[%s8674_s21 + $0x128] ss:$28 sps:$4 sm:$0xff]   ;;  %v6411_v25 = vld [vmem:[%s8674_s21 + $0xf4] ss:$28 sps:$4 sm:$0xff]  }
 0x5ae   :  { %v6406_v24 = vld [vmem:[%s8674_s21 + $0x4a8] ss:$28 sps:$4 sm:$0xff]  }
 0x5b0   :  { %4668 = vmatpush1.bf16.msra.mxu1 %v6325_v26  ;;  %4709 = vmatpush1.bf16.msra.mxu0 %v6328_v27  ;;  %v6414_v26 = vld [vmem:[%s8674_s21 + $0x474] ss:$28 sps:$4 sm:$0xff]  }
 0x5b1   :  { %4669 = vmatprep.subr.bf16.mxu1 %v6333_v28  ;;  %4710 = vmatprep.subr.bf16.mxu0 %v6336_v29  ;;  %v6409_v27 = vld [vmem:[%s8674_s21 + $0xf0] ss:$28 sps:$4 sm:$0xff]   ;;  %v6417_v29 = vld [vmem:[%s8674_s21 + $0xbc] ss:$28 sps:$4 sm:$0xff]  }
 0x5b2   :  { %v6412_v28 = vld [vmem:[%s8674_s21 + $0x470] ss:$28 sps:$4 sm:$0xff]  }
 0x5b4   :  { %4670 = vmatpush1.bf16.msra.mxu1 %v6331_v30  ;;  %4711 = vmatpush1.bf16.msra.mxu0 %v6334_v31  ;;  %v6420_v30 = vld [vmem:[%s8674_s21 + $0x43c] ss:$28 sps:$4 sm:$0xff]  }
 0x5b5   :  { %4671 = vmatprep.subr.bf16.mxu1 %v6339_v32  ;;  %4712 = vmatprep.subr.bf16.mxu0 %v6342_v33  ;;  %v6415_v31 = vld [vmem:[%s8674_s21 + $0xb8] ss:$28 sps:$4 sm:$0xff]   ;;  %v6423_v33 = vld [vmem:[%s8674_s21 + $0x84] ss:$28 sps:$4 sm:$0xff]  }
 0x5b6   :  { %v6418_v32 = vld [vmem:[%s8674_s21 + $0x438] ss:$28 sps:$4 sm:$0xff]  }
 0x5b8   :  { %4672 = vmatpush1.bf16.msra.mxu1 %v6337_v34  ;;  %4713 = vmatpush1.bf16.msra.mxu0 %v6340_v35  ;;  %v6426_v34 = vld [vmem:[%s8674_s21 + $0x404] ss:$28 sps:$4 sm:$0xff]  }
 0x5b9   :  { %4673 = vmatprep.subr.bf16.mxu1 %v6345_v36  ;;  %4714 = vmatprep.subr.bf16.mxu0 %v6348_v37  ;;  %v6421_v35 = vld [vmem:[%s8674_s21 + $0x80] ss:$28 sps:$4 sm:$0xff]   ;;  %v6429_v37 = vld [vmem:[%s8674_s21 + $0x4c] ss:$28 sps:$4 sm:$0xff]  }
 0x5ba   :  { %v6424_v36 = vld [vmem:[%s8674_s21 + $0x400] ss:$28 sps:$4 sm:$0xff]  }
 0x5bc   :  { %4674 = vmatpush2.bf16.msra.mxu1 %v6343_v38  ;;  %4715 = vmatpush2.bf16.msra.mxu0 %v6346_v39  ;;  %v6432_v38 = vld [vmem:[%s8674_s21 + $0x3cc] ss:$28 sps:$4 sm:$0xff]  }
 0x5bd   :  { %4675 = vmatprep.subr.bf16.mxu1 %v6351_v40  ;;  %4716 = vmatprep.subr.bf16.mxu0 %v6354_v41  ;;  %v6427_v39 = vld [vmem:[%s8674_s21 + $0x48] ss:$28 sps:$4 sm:$0xff]   ;;  %v6435_v41 = vld [vmem:[%s8674_s21 + $0x14] ss:$28 sps:$4 sm:$0xff]  }
 0x5be   :  { %v6430_v40 = vld [vmem:[%s8674_s21 + $0x3c8] ss:$28 sps:$4 sm:$0xff]  }
 0x5c0   :  { %4676 = vmatpush2.bf16.msra.mxu1 %v6349_v42  ;;  %4717 = vmatpush2.bf16.msra.mxu0 %v6352_v43  ;;  %v6438_v42 = vld [vmem:[%s8674_s21 + $0x394] ss:$28 sps:$4 sm:$0xff]  }
 0x5c1   :  { %4677 = vmatprep.subr.bf16.mxu1 %v6357_v44  ;;  %4718 = vmatprep.subr.bf16.mxu0 %v6360_v45  ;;  %v6433_v43 = vld [vmem:[%s8674_s21 + $0x10] ss:$28 sps:$4 sm:$0xff]   ;;  %v6441_v45 = vld [vmem:[%s8674_s21 + $0x35c] ss:$28 sps:$4 sm:$0xff]  }
 0x5c2   :  { %v6436_v44 = vld [vmem:[%s8674_s21 + $0x390] ss:$28 sps:$4 sm:$0xff]  }
 0x5c4   :  { %4678 = vmatpush2.bf16.msra.mxu1 %v6355_v46  ;;  %4719 = vmatpush2.bf16.msra.mxu0 %v6358_v47  ;;  %v6444_v46 = vld [vmem:[%s8674_s21 + $0x6dc] ss:$28 sps:$4 sm:$0xff]  }
 0x5c5   :  { %4679 = vmatprep.subr.bf16.mxu1 %v6363_v48  ;;  %4720 = vmatprep.subr.bf16.mxu0 %v6366_v49  ;;  %v6439_v47 = vld [vmem:[%s8674_s21 + $0x358] ss:$28 sps:$4 sm:$0xff]   ;;  %v6447_v49 = vld [vmem:[%s8674_s21 + $0x324] ss:$28 sps:$4 sm:$0xff]  }
 0x5c6   :  { %v6442_v48 = vld [vmem:[%s8674_s21 + $0x6d8] ss:$28 sps:$4 sm:$0xff]  }
 0x5c8   :  { %4680 = vmatpush2.bf16.msra.mxu1 %v6361_v50  ;;  %4721 = vmatpush2.bf16.msra.mxu0 %v6364_v51  ;;  %v6450_v50 = vld [vmem:[%s8674_s21 + $0x6a4] ss:$28 sps:$4 sm:$0xff]  }
 0x5c9   :  { %4681 = vmatprep.subr.bf16.mxu1 %v6369_v52  ;;  %4722 = vmatprep.subr.bf16.mxu0 %v6372_v53  ;;  %v6445_v51 = vld [vmem:[%s8674_s21 + $0x320] ss:$28 sps:$4 sm:$0xff]   ;;  %v6453_v53 = vld [vmem:[%s8674_s21 + $0x2ec] ss:$28 sps:$4 sm:$0xff]  }
 0x5ca   :  { %v6448_v52 = vld [vmem:[%s8674_s21 + $0x6a0] ss:$28 sps:$4 sm:$0xff]  }
 0x5cc   :  { %4682 = vmatpush2.bf16.msra.mxu1 %v6367_v54  ;;  %4723 = vmatpush2.bf16.msra.mxu0 %v6370_v55  ;;  %v6456_v54 = vld [vmem:[%s8674_s21 + $0x66c] ss:$28 sps:$4 sm:$0xff]  }
 0x5cd   :  { %4683 = vmatprep.subr.bf16.mxu1 %v6375_v56  ;;  %4724 = vmatprep.subr.bf16.mxu0 %v6378_v58  ;;  %v6451_v55 = vld [vmem:[%s8674_s21 + $0x2e8] ss:$28 sps:$4 sm:$0xff]   ;;  %v6459_v58 = vld [vmem:[%s8674_s21 + $0x2b4] ss:$28 sps:$4 sm:$0xff]  }
 0x5ce   :  { %v6454_v56 = vld [vmem:[%s8674_s21 + $0x668] ss:$28 sps:$4 sm:$0xff]  }
 0x5d0   :  { %4684 = vmatpush2.bf16.msra.mxu1 %v6373_v60  ;;  %4725 = vmatpush2.bf16.msra.mxu0 %v6376_v61  ;;  %v6462_v60 = vld [vmem:[%s8674_s21 + $0x634] ss:$28 sps:$4 sm:$0xff]  }
 0x5d1   :  { %4685 = vmatprep.subr.bf16.mxu1 %v6381_v62  ;;  %4726 = vmatprep.subr.bf16.mxu0 %v6384_v1  ;;  %v6457_v61 = vld [vmem:[%s8674_s21 + $0x2b0] ss:$28 sps:$4 sm:$0xff]   ;;  %v6465_v1 = vld [vmem:[%s8674_s21 + $0x27c] ss:$28 sps:$4 sm:$0xff]  }
 0x5d2   :  { %v6460_v62 = vld [vmem:[%s8674_s21 + $0x630] ss:$28 sps:$4 sm:$0xff]  }
 0x5d4   :  { %4686 = vmatpush2.bf16.msra.mxu1 %v6379_v2  ;;  %4727 = vmatpush2.bf16.msra.mxu0 %v6382_v5  ;;  %v6468_v2 = vld [vmem:[%s8674_s21 + $0x5fc] ss:$28 sps:$4 sm:$0xff]  }
 0x5d5   :  { %4687 = vmatprep.subr.bf16.mxu1 %v6387_v6  ;;  %4728 = vmatprep.subr.bf16.mxu0 %v6390_v7  ;;  %v6463_v5 = vld [vmem:[%s8674_s21 + $0x278] ss:$28 sps:$4 sm:$0xff]   ;;  %v6471_v7 = vld [vmem:[%s8674_s21 + $0x244] ss:$28 sps:$4 sm:$0xff]  }
 0x5d6   :  { %v6466_v6 = vld [vmem:[%s8674_s21 + $0x5f8] ss:$28 sps:$4 sm:$0xff]  }
 0x5d8   :  { %4688 = vmatpush2.bf16.msra.mxu1 %v6385_v10  ;;  %4729 = vmatpush2.bf16.msra.mxu0 %v6388_v11  ;;  %v6474_v10 = vld [vmem:[%s8674_s21 + $0x5c4] ss:$28 sps:$4 sm:$0xff]  }
 0x5d9   :  { %4739 = vmatprep.subr.bf16.mxu1 %v6393_v12  ;;  %4780 = vmatprep.subr.bf16.mxu0 %v6396_v14  ;;  %v6469_v11 = vld [vmem:[%s8674_s21 + $0x240] ss:$28 sps:$4 sm:$0xff]   ;;  %v6477_v14 = vld [vmem:[%s8674_s21 + $0x20c] ss:$28 sps:$4 sm:$0xff]  }
 0x5da   :  { %v6472_v12 = vld [vmem:[%s8674_s21 + $0x5c0] ss:$28 sps:$4 sm:$0xff]  }
 0x5db   :  { %4690 = vmatmul.mubr.bf16.vlgmr.msra.gmra.mxu1 %v8122_v3  ;;  %4731 = vmatmul.mubr.bf16.vlgmr.msra.gmra.mxu0 %v8124_v4 }
 0x5dc   :  { %4740 = vmatpush1.bf16.msra.mxu1 %v6391_v8  ;;  %4771 = vmatprep.mubr.bf16.mxu1 %v8112_v63  ;;  %v6480_v8 = vld [vmem:[%s8674_s21 + $0x58c] ss:$28 sps:$4 sm:$0xff]  }
 0x5dd   :  { %4781 = vmatpush1.bf16.msra.mxu0 %v6394_v9  ;;  %4812 = vmatprep.mubr.bf16.mxu0 %v8114_v0  ;;  %v6475_v9 = vld [vmem:[%s8674_s21 + $0x208] ss:$28 sps:$4 sm:$0xff]  }
 0x5de   :  { %4741 = vmatprep.subr.bf16.mxu1 %v6399_v17  ;;  %4782 = vmatprep.subr.bf16.mxu0 %v6402_v18  ;;  %v6478_v17 = vld [vmem:[%s8674_s21 + $0x588] ss:$28 sps:$4 sm:$0xff]   ;;  %v6483_v18 = vld [vmem:[%s8674_s21 + $0x1d4] ss:$28 sps:$4 sm:$0xff]  }
 0x5e0   :  { %4742 = vmatpush1.bf16.msra.mxu1 %v6397_v19  ;;  %v6486_v19 = vld [vmem:[%s8674_s21 + $0x554] ss:$28 sps:$4 sm:$0xff]  }
 0x5e1   :  { %4783 = vmatpush1.bf16.msra.mxu0 %v6400_v20  ;;  %4743 = vmatprep.subr.bf16.mxu1 %v6405_v21  ;;  %v6481_v20 = vld [vmem:[%s8674_s21 + $0x1d0] ss:$28 sps:$4 sm:$0xff]  }
 0x5e2   :  { %4784 = vmatprep.subr.bf16.mxu0 %v6408_v22  ;;  %v6484_v21 = vld [vmem:[%s8674_s21 + $0x550] ss:$28 sps:$4 sm:$0xff]   ;;  %v6487_v22 = vld [vmem:[%s8674_s21 + $0x360] ss:$28 sps:$4 sm:$0xff]  }
 0x5e4   :  { %4744 = vmatpush1.bf16.msra.mxu1 %v6403_v23  ;;  %v6488_v23 = vld [vmem:[%s8674_s21 + $0x6e0] ss:$28 sps:$4 sm:$0xff]  }
 0x5e5   :  { %4785 = vmatpush1.bf16.msra.mxu0 %v6406_v24  ;;  %4745 = vmatprep.subr.bf16.mxu1 %v6411_v25  ;;  %v6489_v24 = vld [vmem:[%s8674_s21 + $0x1a0] ss:$28 sps:$4 sm:$0xff]  }
 0x5e6   :  { %4786 = vmatprep.subr.bf16.mxu0 %v6414_v26  ;;  %v6490_v25 = vld [vmem:[%s8674_s21 + $0x520] ss:$28 sps:$4 sm:$0xff]   ;;  %v6491_v26 = vld [vmem:[%s8674_s21 + $0x328] ss:$28 sps:$4 sm:$0xff]  }
 0x5e8   :  { %4746 = vmatpush1.bf16.msra.mxu1 %v6409_v27  ;;  %v6492_v27 = vld [vmem:[%s8674_s21 + $0x6a8] ss:$28 sps:$4 sm:$0xff]  }
 0x5e9   :  { %4787 = vmatpush1.bf16.msra.mxu0 %v6412_v28  ;;  %4747 = vmatprep.subr.bf16.mxu1 %v6417_v29  ;;  %v6493_v28 = vld [vmem:[%s8674_s21 + $0x168] ss:$28 sps:$4 sm:$0xff]  }
 0x5ea   :  { %4788 = vmatprep.subr.bf16.mxu0 %v6420_v30  ;;  %v6494_v29 = vld [vmem:[%s8674_s21 + $0x4e8] ss:$28 sps:$4 sm:$0xff]   ;;  %v6495_v30 = vld [vmem:[%s8674_s21 + $0x2f0] ss:$28 sps:$4 sm:$0xff]  }
 0x5ec   :  { %4748 = vmatpush1.bf16.msra.mxu1 %v6415_v31  ;;  %v6496_v31 = vld [vmem:[%s8674_s21 + $0x670] ss:$28 sps:$4 sm:$0xff]  }
 0x5ed   :  { %4789 = vmatpush1.bf16.msra.mxu0 %v6418_v32  ;;  %4749 = vmatprep.subr.bf16.mxu1 %v6423_v33  ;;  %v6498_v32 = vld [vmem:[%s8674_s21 + $0x4b0] ss:$28 sps:$4 sm:$0xff]   ;;  %v6500_v33 = vld [vmem:[%s8674_s21 + $0x638] ss:$28 sps:$4 sm:$0xff]  }
 0x5ee   :  { %4790 = vmatprep.subr.bf16.mxu0 %v6426_v34  ;;  %v6501_v34 = vld [vmem:[%s8674_s21 + $0xf8] ss:$28 sps:$4 sm:$0xff]  }
 0x5f0   :  { %4750 = vmatpush1.bf16.msra.mxu1 %v6421_v35  ;;  %v6502_v35 = vld [vmem:[%s8674_s21 + $0x478] ss:$28 sps:$4 sm:$0xff]  }
 0x5f1   :  { %4791 = vmatpush1.bf16.msra.mxu0 %v6424_v36  ;;  %4751 = vmatprep.subr.bf16.mxu1 %v6429_v37  ;;  %v6503_v36 = vld [vmem:[%s8674_s21 + $0x280] ss:$28 sps:$4 sm:$0xff]  }
 0x5f2   :  { %4792 = vmatprep.subr.bf16.mxu0 %v6432_v38  ;;  %v6504_v37 = vld [vmem:[%s8674_s21 + $0x600] ss:$28 sps:$4 sm:$0xff]  }
 0x5f3   :  { %v6505_v38 = vld [vmem:[%s8674_s21 + $0xc0] ss:$28 sps:$4 sm:$0xff]  }
 0x5f4   :  { %4752 = vmatpush1.bf16.msra.mxu1 %v6427_v39  ;;  %v6506_v39 = vld [vmem:[%s8674_s21 + $0x440] ss:$28 sps:$4 sm:$0xff]  }
 0x5f5   :  { %4793 = vmatpush1.bf16.msra.mxu0 %v6430_v40  ;;  %4753 = vmatprep.subr.bf16.mxu1 %v6435_v41  ;;  %v6507_v40 = vld [vmem:[%s8674_s21 + $0x248] ss:$28 sps:$4 sm:$0xff]  }
 0x5f6   :  { %4794 = vmatprep.subr.bf16.mxu0 %v6438_v42  ;;  %v6508_v41 = vld [vmem:[%s8674_s21 + $0x5c8] ss:$28 sps:$4 sm:$0xff]  }
 0x5f7   :  { %v6509_v42 = vld [vmem:[%s8674_s21 + $0x88] ss:$28 sps:$4 sm:$0xff]  }
 0x5f8   :  { %4754 = vmatpush1.bf16.msra.mxu1 %v6433_v43  ;;  %v6510_v43 = vld [vmem:[%s8674_s21 + $0x408] ss:$28 sps:$4 sm:$0xff]  }
 0x5f9   :  { %4795 = vmatpush1.bf16.msra.mxu0 %v6436_v44  ;;  %4755 = vmatprep.subr.bf16.mxu1 %v6441_v45  ;;  %v6511_v44 = vld [vmem:[%s8674_s21 + $0x210] ss:$28 sps:$4 sm:$0xff]  }
 0x5fa   :  { %4796 = vmatprep.subr.bf16.mxu0 %v6444_v46  ;;  %v6512_v45 = vld [vmem:[%s8674_s21 + $0x590] ss:$28 sps:$4 sm:$0xff]  }
 0x5fb   :  { %v6513_v46 = vld [vmem:[%s8674_s21 + $0x50] ss:$28 sps:$4 sm:$0xff]  }
 0x5fc   :  { %4756 = vmatpush2.bf16.msra.mxu1 %v6439_v47  ;;  %v6514_v47 = vld [vmem:[%s8674_s21 + $0x3d0] ss:$28 sps:$4 sm:$0xff]  }
 0x5fd   :  { %4797 = vmatpush2.bf16.msra.mxu0 %v6442_v48  ;;  %4757 = vmatprep.subr.bf16.mxu1 %v6447_v49  ;;  %v6515_v48 = vld [vmem:[%s8674_s21 + $0x1d8] ss:$28 sps:$4 sm:$0xff]  }
 0x5fe   :  { %4798 = vmatprep.subr.bf16.mxu0 %v6450_v50  ;;  %v6516_v49 = vld [vmem:[%s8674_s21 + $0x558] ss:$28 sps:$4 sm:$0xff]  }
 0x5ff   :  { %v6517_v50 = vld [vmem:[%s8674_s21 + $0x18] ss:$28 sps:$4 sm:$0xff]  }
 0x600   :  { %4758 = vmatpush2.bf16.msra.mxu1 %v6445_v51  ;;  %v6518_v51 = vld [vmem:[%s8674_s21 + $0x398] ss:$28 sps:$4 sm:$0xff]  }
 0x601   :  { %4799 = vmatpush2.bf16.msra.mxu0 %v6448_v52  ;;  %4759 = vmatprep.subr.bf16.mxu1 %v6453_v53  ;;  %v8613_v52 = vld [vmem:[%s8675_s22] sm:$0x7f] }
 0x602   :  { %4800 = vmatprep.subr.bf16.mxu0 %v6456_v54  ;;  %v3391_v53 = vrot.slane %v8613_v52, %v7316_v15  ;;  %v3395_v54 = vrot.slane %v8613_v52, %v7319_v16 }
 0x604   :  { %4760 = vmatpush2.bf16.msra.mxu1 %v6451_v55 }
 0x605   :  { %4801 = vmatpush2.bf16.msra.mxu0 %v6454_v56  ;;  %4761 = vmatprep.subr.bf16.mxu1 %v6459_v58 }
 0x606   :  { %4802 = vmatprep.subr.bf16.mxu0 %v6462_v60 }
 0x608   :  { %4762 = vmatpush2.bf16.msra.mxu1 %v6457_v61 }
 0x609   :  { %4803 = vmatpush2.bf16.msra.mxu0 %v6460_v62  ;;  %4763 = vmatprep.subr.bf16.mxu1 %v6465_v1 }
 0x60a   :  { %4804 = vmatprep.subr.bf16.mxu0 %v6468_v2 }
 0x60c   :  { %4764 = vmatpush2.bf16.msra.mxu1 %v6463_v5 }
 0x60d   :  { %4805 = vmatpush2.bf16.msra.mxu0 %v6466_v6  ;;  %4765 = vmatprep.subr.bf16.mxu1 %v6471_v7 }
 0x60e   :  { %4806 = vmatprep.subr.bf16.mxu0 %v6474_v10 }
 0x610   :  { %4766 = vmatpush2.bf16.msra.mxu1 %v6469_v11 }
 0x611   :  { %4807 = vmatpush2.bf16.msra.mxu0 %v6472_v12  ;;  %4767 = vmatprep.subr.bf16.mxu1 %v6477_v14 }
 0x612   :  { %4808 = vmatprep.subr.bf16.mxu0 %v6480_v8 }
 0x614   :  { %4768 = vmatpush2.bf16.msra.mxu1 %v6475_v9  ;;  %v3399_v9 = vrot.slane %v8613_v52, %v7407_v57 }
 0x615   :  { %4809 = vmatpush2.bf16.msra.mxu0 %v6478_v17  ;;  %4769 = vmatprep.subr.bf16.mxu1 %v6483_v18  ;;  %v3403_v17 = vrot.slane %v8613_v52, %v7413_v59 }
 0x616   :  { %4810 = vmatprep.subr.bf16.mxu0 %v6486_v19 }
 0x618   :  { %4770 = vmatpush2.bf16.msra.mxu1 %v6481_v20 }
 0x619   :  { %4811 = vmatpush2.bf16.msra.mxu0 %v6484_v21  ;;  %5617 = vmatprep.subr.bf16.mxu1 %v6487_v22 }
 0x61a   :  { %5639 = vmatprep.subr.bf16.mxu0 %v6488_v23 }
 0x61b   :  { %4772 = vmatmul.mubr.bf16.vlgmr.msra.gmra.mxu1 %v8122_v3 }
 0x61c   :  { %4813 = vmatmul.mubr.bf16.vlgmr.msra.gmra.mxu0 %v8124_v4  ;;  %5618 = vmatpush3.bf16.msra.mxu1 %v6489_v24 }
 0x61d   :  { %4853 = vmatprep.mubr.bf16.mxu1 %v8112_v63  ;;  %5640 = vmatpush3.bf16.msra.mxu0 %v6490_v25  ;;  %v6497_v63 = vld [vmem:[%s8674_s21 + $0x130] ss:$28 sps:$4 sm:$0xff]  }
 0x61e   :  { %4893 = vmatprep.mubr.bf16.mxu0 %v8114_v0  ;;  %5619 = vmatprep.subr.bf16.mxu1 %v6491_v26  ;;  %v6499_v0 = vld [vmem:[%s8674_s21 + $0x2b8] ss:$28 sps:$4 sm:$0xff]  }
 0x61f   :  { %5641 = vmatprep.subr.bf16.mxu0 %v6492_v27 }
 0x620   :  { %5620 = vmatpush3.bf16.msra.mxu1 %v6493_v28 }
 0x621   :  { %5642 = vmatpush3.bf16.msra.mxu0 %v6494_v29  ;;  %5621 = vmatprep.subr.bf16.mxu1 %v6495_v30 }
 0x622   :  { %5643 = vmatprep.subr.bf16.mxu0 %v6496_v31 }
 0x624   :  { %5622 = vmatpush3.bf16.msra.mxu1 %v6497_v63 }
 0x625   :  { %5644 = vmatpush3.bf16.msra.mxu0 %v6498_v32  ;;  %5623 = vmatprep.subr.bf16.mxu1 %v6499_v0 }
 0x626   :  { %5645 = vmatprep.subr.bf16.mxu0 %v6500_v33 }
 0x628   :  { %5624 = vmatpush3.bf16.msra.mxu1 %v6501_v34 }
 0x629   :  { %5646 = vmatpush3.bf16.msra.mxu0 %v6502_v35  ;;  %5625 = vmatprep.subr.bf16.mxu1 %v6503_v36 }
 0x62a   :  { %5647 = vmatprep.subr.bf16.mxu0 %v6504_v37 }
 0x62c   :  { %5626 = vmatpush3.bf16.msra.mxu1 %v6505_v38 }
 0x62d   :  { %5648 = vmatpush3.bf16.msra.mxu0 %v6506_v39  ;;  %5627 = vmatprep.subr.bf16.mxu1 %v6507_v40 }
 0x62e   :  { %5649 = vmatprep.subr.bf16.mxu0 %v6508_v41 }
 0x630   :  { %5628 = vmatpush3.bf16.msra.mxu1 %v6509_v42 }
 0x631   :  { %5650 = vmatpush3.bf16.msra.mxu0 %v6510_v43  ;;  %5629 = vmatprep.subr.bf16.mxu1 %v6511_v44 }
 0x632   :  { %5651 = vmatprep.subr.bf16.mxu0 %v6512_v45 }
 0x634   :  { %5630 = vmatpush3.bf16.msra.mxu1 %v6513_v46 }
 0x635   :  { %5652 = vmatpush3.bf16.msra.mxu0 %v6514_v47  ;;  %5631 = vmatprep.subr.bf16.mxu1 %v6515_v48 }
 0x636   :  { %5653 = vmatprep.subr.bf16.mxu0 %v6516_v49 }
 0x638   :  { %5632 = vmatpush3.bf16.msra.mxu1 %v6517_v50 }
 0x639   :  { %5654 = vmatpush3.bf16.msra.mxu0 %v6518_v51 }
 0x63b   :  { %4854 = vmatmul.mubr.bf16.vlgmr.msra.gmra.mxu1 %v8122_v3 }
 0x63c   :  { %4894 = vmatmul.mubr.bf16.vlgmr.msra.gmra.mxu0 %v8124_v4 }
 0x65b   :  { %v4609_v55 = vpop.f32.mrf.mxu1  ;;  %v4650_v56 = vpop.f32.mrf.mxu0 }
 0x65c   :  { %v4610_v58 = vadd.f32 %v4609_v55, %v3391_v53 }
 0x65d   :  { %v4611_v60 = vpop.f32.mrf.mxu1  ;;  %v4652_v61 = vpop.f32.mrf.mxu0 }
 0x65e   :  { %v4651_v62 = vadd.f32 %v4650_v56, %v4610_v58  ;;  %v4612_v3 = vadd.f32 %v4611_v60, %v3395_v54 }
 0x65f   :  { %v4613_v1 = vpop.f32.mrf.mxu1  ;;  %v4654_v4 = vpop.f32.mrf.mxu0 }
 0x660   :  { %v5561_v2 = vmul.f32 -1.442695, %v4651_v62  ;;  %v4653_v5 = vadd.f32 %v4652_v61, %v4612_v3 }
 0x661   :  { %v4614_v6 = vpop.f32.mrf.mxu1  ;;  %v4655_v7 = vpop.f32.mrf.mxu0 }
 0x662   :  { %6519 = vpow2.f32 %v5561_v2  ;;  %v5562_v10 = vmul.f32 -1.442695, %v4653_v5 }
 0x664   :  { %6521 = vpow2.f32 %v5562_v10 }
 0x66f   :  { %v6520_v15 = vpop.eup %6519 }
 0x670   :  { %v4922_v11 = vadd.f32 1.0, %v6520_v15 }
 0x671   :  { %v6522_v12 = vpop.eup %6521 }
 0x672   :  { %6523 = vrcp.f32 %v4922_v11  ;;  %v4923_v16 = vadd.f32 1.0, %v6522_v12 }
 0x674   :  { %6525 = vrcp.f32 %v4923_v16 }
 0x67f   :  { %v6524_v14 = vpop.eup %6523 }
 0x680   :  { %4943 = vst [vmem:[%s8676_s23] sm:$0xff] %v6524_v14 }
 0x681   :  { %v6526_v8 = vpop.eup %6525 }
 0x682   :  { %4944 = vst [vmem:[%s8676_s23 + $0x8] sm:$0xff] %v6526_v8 }
 0x69b   :  { %v4691_v18 = vpop.f32.mrf.mxu1  ;;  %v4732_v19 = vpop.f32.mrf.mxu0 }
 0x69c   :  { %v4692_v20 = vadd.f32 %v4691_v18, %v3399_v9 }
 0x69d   :  { %v4693_v21 = vpop.f32.mrf.mxu1  ;;  %v4734_v22 = vpop.f32.mrf.mxu0 }
 0x69e   :  { %v4733_v23 = vadd.f32 %v4732_v19, %v4692_v20  ;;  %v4694_v24 = vadd.f32 %v4693_v21, %v3403_v17 }
 0x69f   :  { %v4695_v25 = vpop.f32.mrf.mxu1  ;;  %v4736_v26 = vpop.f32.mrf.mxu0 }
 0x6a0   :  { %v5563_v27 = vmul.f32 -1.442695, %v4733_v23  ;;  %v4735_v28 = vadd.f32 %v4734_v22, %v4694_v24 }
 0x6a1   :  { %v4696_v29 = vpop.f32.mrf.mxu1  ;;  %v4737_v30 = vpop.f32.mrf.mxu0 }
 0x6a2   :  { %6527 = vpow2.f32 %v5563_v27  ;;  %v5564_v31 = vmul.f32 -1.442695, %v4735_v28 }
 0x6a4   :  { %6529 = vpow2.f32 %v5564_v31 }
 0x6a5   :  { %6562 = shalt.err (!%p6559_p4)
}
 0x6a6   :  { %4962 = dma.vmem_to_hbm [thread:$0]  %s4960_s0, 128, %s8677_s24, [#allocation3]   ;;  %v3406_v34 = vsub.s32 4, %v7308_v13  ;;  %v3410_v35 = vsub.s32 5, %v7308_v13  ;;  %v3414_v58 = vsub.s32 6, %v7308_v13  ;;  %vm4949_vm3 = vcmask 130048  }
 0x6a8   :  { %v3407_v36 = vrot.slane %v8613_v52, %v3406_v34  ;;  %v3411_v37 = vrot.slane %v8613_v52, %v3410_v35  ;;  %v3415_v62 = vrot.slane %v8613_v52, %v3414_v58 }
 0x6af   :  { %v6528_v57 = vpop.eup %6527 }
 0x6b0   :  { %v4924_v59 = vadd.f32 1.0, %v6528_v57 }
 0x6b1   :  { %v6530_v63 = vpop.eup %6529 }
 0x6b2   :  { %6531 = vrcp.f32 %v4924_v59  ;;  %v4925_v32 = vadd.f32 1.0, %v6530_v63 }
 0x6b4   :  { %6533 = vrcp.f32 %v4925_v32 }
 0x6bf   :  { %v6532_v0 = vpop.eup %6531 }
 0x6c0   :  { %4945 = vst [vmem:[%s8676_s23 + $0x10] sm:$0xff] %v6532_v0 }
 0x6c1   :  { %v6534_v33 = vpop.eup %6533 }
 0x6c2   :  { %4946 = vst [vmem:[%s8676_s23 + $0x18] sm:$0xff] %v6534_v33 }
 0x6db   :  { %v4773_v38 = vpop.f32.mrf.mxu1 }
 0x6dc   :  { %v4774_v39 = vadd.f32 %v4773_v38, %v3407_v36  ;;  %v4814_v40 = vpop.f32.mrf.mxu0 }
 0x6dd   :  { %v4775_v41 = vpop.f32.mrf.mxu1 }
 0x6de   :  { %v4815_v42 = vadd.f32 %v4814_v40, %v4774_v39  ;;  %v4776_v43 = vadd.f32 %v4775_v41, %v3411_v37  ;;  %v4816_v44 = vpop.f32.mrf.mxu0 }
 0x6df   :  { %v4777_v45 = vpop.f32.mrf.mxu1 }
 0x6e0   :  { %v5565_v46 = vmul.f32 -1.442695, %v4815_v42  ;;  %v4817_v47 = vadd.f32 %v4816_v44, %v4776_v43  ;;  %v4818_v48 = vpop.f32.mrf.mxu0 }
 0x6e1   :  { %v4778_v49 = vpop.f32.mrf.mxu1 }
 0x6e2   :  { %6535 = vpow2.f32 %v5565_v46  ;;  %v5566_v50 = vmul.f32 -1.442695, %v4817_v47  ;;  %v4819_v51 = vpop.f32.mrf.mxu0 }
 0x6e4   :  { %6537 = vpow2.f32 %v5566_v50 }
 0x6ef   :  { %v6536_v53 = vpop.eup %6535 }
 0x6f0   :  { %v4926_v54 = vadd.f32 1.0, %v6536_v53 }
 0x6f1   :  { %v6538_v55 = vpop.eup %6537 }
 0x6f2   :  { %6539 = vrcp.f32 %v4926_v54  ;;  %v4927_v56 = vadd.f32 1.0, %v6538_v55 }
 0x6f4   :  { %6541 = vrcp.f32 %v4927_v56 }
 0x6fb   :  { %v5633_v60 = vpop.f32.mrf.mxu1 }
 0x6fc   :  { %v5655_v61 = vpop.f32.mrf.mxu0 }
 0x6fd   :  { %v5634_v3 = vpop.f32.mrf.mxu1 }
 0x6fe   :  { %v5635_v1 = vadd.f32 %v5634_v3, %v5633_v60  ;;  %v5656_v4 = vpop.f32.mrf.mxu0 }
 0x6ff   :  { %v6540_v2 = vpop.eup %6539  ;;  %v5636_v5 = vpop.f32.mrf.mxu1  ;;  %v5657_v7 = vadd.f32 %v5656_v4, %v5655_v61 }
 0x700   :  { %4947 = vst [vmem:[%s8676_s23 + $0x20] sm:$0xff] %v6540_v2  ;;  %v4856_v6 = vadd.f32 %v5635_v1, %v3415_v62  ;;  %v5658_v10 = vpop.f32.mrf.mxu0 }
 0x701   :  { %v6542_v15 = vpop.eup %6541  ;;  %v5637_v11 = vpop.f32.mrf.mxu1 }
 0x702   :  { %4948 = vst [vmem:[%s8676_s23 + $0x28] sm:$0xff] %v6542_v15  ;;  %v4896_v13 = vadd.f32 %v5657_v7, %v4856_v6  ;;  %v5659_v52 = vpop.f32.mrf.mxu0 }
 0x704   :  { %v5567_v12 = vmul.f32 -1.442695, %v4896_v13 }
 0x706   :  { %6543 = vpow2.f32 %v5567_v12 }
 0x713   :  { %v6544_v16 = vpop.eup %6543 }
 0x714   :  { %v4928_v14 = vadd.f32 1.0, %v6544_v16 }
 0x716   :  { %6545 = vrcp.f32 %v4928_v14 }
 0x723   :  { %v6546_v8 = vpop.eup %6545 }
 0x724   :  { %4950 = vst.msk [vmem:[%s8676_s23 + $0x30] sm:$0xff] %vm4949_vm3, %v6546_v8 }
 0x725   :  { %6571 = dma.done.wait [#allocation3], 128  }
 0x726   :  { %6572 = vsyncadd [#allocation3], 4294967168 }
 0x727   :  { %4968 = vsyncpa [#allocation3], 1 }

</bundles_post_ra>
